<compile_context>
chip_gen: v7x
topology: tpu7x:2x2x1
jax: 0.10.0
libtpu: 0.0.40
codegen_flags: <defaults>
</compile_context>

<pallas_src>
import math
import functools
import numpy as np
import jax
import jax.numpy as jnp
from jax import lax
from jax.experimental import pallas as pl
from jax.experimental.pallas import tpu as pltpu


# ----------------------------------------------------------------------------
# Pallas kernel: one bidirectional LSTM layer, both directions, one call.
# grid=(num_chunks,), sequential ("arbitrary").  Each grid step processes
# T_CHUNK timesteps for the forward direction (chunk c, ascending time) and
# T_CHUNK timesteps for the backward direction (chunk NC-1-c, descending
# time); the chunk-level time reversal is done purely in the BlockSpec
# index_map (free in the DMA).
#
# All sequence tensors are time-major-flat 2-D: row t*B + b  ->  (T*B, F).
# ----------------------------------------------------------------------------
def _make_bilstm_kernel(n_x, t_chunk, hidden, batch, t_valid, t_pad,
                        write_outputs):
    H = hidden
    G = 4 * H
    B = batch
    NC = t_pad // t_chunk
    has_pad = (t_pad != t_valid)

    def kernel(*refs):
        r = 0
        xf_refs = refs[r:r + n_x]; r += n_x            # fwd-chunk views (TC*B, F)
        xb_refs = refs[r:r + n_x]; r += n_x            # bwd-chunk views (TC*B, F)
        wif_refs = refs[r:r + n_x]; r += n_x            # W_ih fwd, one per input
        wib_refs = refs[r:r + n_x]; r += n_x            # W_ih bwd, one per input
        whf_ref, whb_ref, bf_ref, bb_ref = refs[r:r + 4]; r += 4
        if write_outputs:
            out_f_ref, out_b_ref = refs[r:r + 2]; r += 2
        hf_ref, cf_ref, hb_ref, cb_ref = refs[r:r + 4]; r += 4
        if write_outputs:
            of_sc, ob_sc = refs[r:r + 2]; r += 2        # VMEM f32 chunk slabs

        c_idx = pl.program_id(0)

        # Resident-output-as-accumulator: init state on the first chunk only.
        @pl.when(c_idx == 0)
        def _init():
            hf_ref[...] = jnp.zeros_like(hf_ref)
            cf_ref[...] = jnp.zeros_like(cf_ref)
            hb_ref[...] = jnp.zeros_like(hb_ref)
            cb_ref[...] = jnp.zeros_like(cb_ref)

        # Hoisted input projection: one big (TC*B, F) @ (F, 4H) matmul per
        # layer input, f32 accumulate, bias folded in once per chunk.
        def project(x_refs, w_refs, b_ref):
            acc = None
            for xr, wr in zip(x_refs, w_refs):
                p = jnp.dot(xr[...].astype(jnp.bfloat16), wr[...],
                            preferred_element_type=jnp.float32)
                acc = p if acc is None else acc + p
            return acc + b_ref[...]                     # (TC*B, 4H) f32

        gx_f = project(xf_refs, wif_refs, bf_ref)
        gx_b = project(xb_refs, wib_refs, bb_ref)

        w_hh_f = whf_ref[...]                           # (H, 4H) bf16
        w_hh_b = whb_ref[...]

        h_f, c_f = hf_ref[...], cf_ref[...]             # (B, H) f32
        h_b, c_b = hb_ref[...], cb_ref[...]

        def lstm_step(g, c_prev):
            # gate order [i, f, o, g]: one contiguous 3H sigmoid + one H tanh
            s = jax.nn.sigmoid(g[:, 0:3 * H])
            i_g = s[:, 0:H]
            f_g = s[:, H:2 * H]
            o_g = s[:, 2 * H:3 * H]
            g_g = jnp.tanh(g[:, 3 * H:4 * H])
            c_new = f_g * c_prev + i_g * g_g
            h_new = o_g * jnp.tanh(c_new)
            return h_new, c_new

        # Interleaved recurrences: fwd step j and bwd step (t_chunk-1-j) are
        # independent chains -> both in flight each unrolled iteration.
        for j in range(t_chunk):
            jr = t_chunk - 1 - j
            row_f = j * B
            row_b = jr * B
            gf = gx_f[row_f:row_f + B, :] + jnp.dot(
                h_f.astype(jnp.bfloat16), w_hh_f,
                preferred_element_type=jnp.float32)
            gb = gx_b[row_b:row_b + B, :] + jnp.dot(
                h_b.astype(jnp.bfloat16), w_hh_b,
                preferred_element_type=jnp.float32)
            hf_new, cf_new = lstm_step(gf, c_f)
            hb_new, cb_new = lstm_step(gb, c_b)
            if has_pad:
                # Mask padded timesteps: carry state through unchanged.
                vf = (c_idx * t_chunk + j) < t_valid
                vb = ((NC - 1 - c_idx) * t_chunk + jr) < t_valid
                hf_new = jnp.where(vf, hf_new, h_f)
                cf_new = jnp.where(vf, cf_new, c_f)
                hb_new = jnp.where(vb, hb_new, h_b)
                cb_new = jnp.where(vb, cb_new, c_b)
            h_f, c_f = hf_new, cf_new
            h_b, c_b = hb_new, cb_new
            if write_outputs:
                of_sc[row_f:row_f + B, :] = h_f
                ob_sc[row_b:row_b + B, :] = h_b

        hf_ref[...] = h_f
        cf_ref[...] = c_f
        hb_ref[...] = h_b
        cb_ref[...] = c_b
        if write_outputs:
            # One dense slab store per direction per chunk (bf16 inter-layer).
            out_f_ref[...] = of_sc[...].astype(out_f_ref.dtype)
            out_b_ref[...] = ob_sc[...].astype(out_b_ref.dtype)

    return kernel


def bilstm_layer(xs, w_ih_f, w_ih_b, w_hh_f, w_hh_b, b_f, b_b,
                 *, batch, t_chunk, t_valid, write_outputs):
    """One bidirectional LSTM layer.

    xs        : list of time-major-flat inputs [(T_pad*B, F_i)] (bf16) whose
                feature-concat is the layer input.
    w_ih_*    : list of (F_i, 4H) bf16 (one per xs entry).
    w_hh_*    : (H, 4H) bf16.   b_* : (1, 4H) f32.  Gate order [i, f, o, g].
    Returns (out_f, out_b, h_f, c_f, h_b, c_b) when write_outputs else
            (h_f, c_f, h_b, c_b); out_* are (T_pad*B, H) bf16, states (B, H) f32.
    """
    TB, _ = xs[0].shape
    B = batch
    T_pad = TB // B
    H = w_hh_f.shape[0]
    assert T_pad % t_chunk == 0
    NC = T_pad // t_chunk
    n_x = len(xs)
    rows = t_chunk * B

    def fwd_map(c):
        return (c, 0)

    def bwd_map(c):
        return (NC - 1 - c, 0)             # chunk-level time reversal, free in DMA

    def const_map(c):
        return (0, 0)

    x_specs_f = [pl.BlockSpec((rows, x.shape[-1]), fwd_map) for x in xs]
    x_specs_b = [pl.BlockSpec((rows, x.shape[-1]), bwd_map) for x in xs]
    wih_specs_f = [pl.BlockSpec(w.shape, const_map) for w in w_ih_f]
    wih_specs_b = [pl.BlockSpec(w.shape, const_map) for w in w_ih_b]
    whh_spec = pl.BlockSpec(w_hh_f.shape, const_map)
    b_spec = pl.BlockSpec(b_f.shape, const_map)
    state_spec = pl.BlockSpec((B, H), const_map)       # resident accumulator block

    out_shape = []
    out_specs = []
    if write_outputs:
        out_shape += [jax.ShapeDtypeStruct((T_pad * B, H), jnp.bfloat16)] * 2
        out_specs += [pl.BlockSpec((rows, H), fwd_map),
                      pl.BlockSpec((rows, H), bwd_map)]
    out_shape += [jax.ShapeDtypeStruct((B, H), jnp.float32)] * 4
    out_specs += [state_spec] * 4

    scratch = ([pltpu.VMEM((rows, H), jnp.float32)] * 2) if write_outputs else []

    kernel = _make_bilstm_kernel(n_x, t_chunk, H, B, t_valid, T_pad,
                                 write_outputs)
    return pl.pallas_call(
        kernel,
        out_shape=tuple(out_shape),
        grid_spec=pltpu.PrefetchScalarGridSpec(
            num_scalar_prefetch=0,
            grid=(NC,),
            in_specs=(x_specs_f + x_specs_b + wih_specs_f + wih_specs_b
                      + [whh_spec, whh_spec, b_spec, b_spec]),
            out_specs=tuple(out_specs),
            scratch_shapes=scratch,
        ),
        compiler_params=pltpu.CompilerParams(
            dimension_semantics=("arbitrary",),   # h/c state carries across chunks
        ),
    )(*xs, *xs, *w_ih_f, *w_ih_b, w_hh_f, w_hh_b, b_f, b_b)


def _pick_chunk(T, t_chunk):
    """Sublane-aligned chunk size + padded T (never collapses to tc=1)."""
    tc = max(8, (t_chunk // 8) * 8)
    tc = min(tc, ((T + 7) // 8) * 8)
    T_pad = ((T + tc - 1) // tc) * tc
    return tc, T_pad


# ----------------------------------------------------------------------------
# Encoder forward (mirrors the PyTorch module's forward: returns (h_n, c_n)).
# The unused self.linear_layer / self.activation are intentionally omitted.
# ----------------------------------------------------------------------------
def encoder_forward(params, input_ids, t_chunk=32):
    B, T = input_ids.shape
    tc, T_pad = _pick_chunk(T, t_chunk)

    # embedding lookup (plain-JAX glue); activations kept in bf16, then laid
    # out time-major-flat (T*B, E) - mirrors the module's permute(1,0,-1).
    emb = jnp.take(params["embedding"], input_ids, axis=0).astype(jnp.bfloat16)
    if T_pad != T:
        emb = jnp.pad(emb, ((0, 0), (0, T_pad - T), (0, 0)))
    x0 = jnp.swapaxes(emb, 0, 1).reshape(T_pad * B, emb.shape[-1])

    xs = [x0]
    h_list, c_list = [], []
    n_layers = len(params["layers"])
    for li, layer in enumerate(params["layers"]):
        feats = [x.shape[-1] for x in xs]
        offs = [0] + list(np.cumsum(feats))
        wih_f = [layer["w_ih_f"][offs[i]:offs[i + 1]] for i in range(len(feats))]
        wih_b = [layer["w_ih_b"][offs[i]:offs[i + 1]] for i in range(len(feats))]
        write_outputs = (li != n_layers - 1)   # last layer: h_n/c_n only
        outs = bilstm_layer(
            xs, wih_f, wih_b, layer["w_hh_f"], layer["w_hh_b"],
            layer["b_f"], layer["b_b"],
            batch=B, t_chunk=tc, t_valid=T, write_outputs=write_outputs)
        if write_outputs:
            out_f, out_b, h_f, c_f, h_b, c_b = outs
            xs = [out_f, out_b]                # consumed by next layer; no HBM concat
        else:
            h_f, c_f, h_b, c_b = outs
        h_list += [h_f, h_b]
        c_list += [c_f, c_b]
    h_n = jnp.stack(h_list, axis=0)            # (num_layers*2, B, H)
    c_n = jnp.stack(c_list, axis=0)
    return h_n, c_n


# ----------------------------------------------------------------------------
# Pure-JAX reference (same bf16-matmul / f32-gate numerics, same gate order,
# same hoisted x@W_ih projection) for correctness checking.
# ----------------------------------------------------------------------------
def _lstm_dir_ref(xs_list, w_ih_list, w_hh, b, H, reverse):
    B, T, _ = xs_list[0].shape
    gx = None
    for x, w in zip(xs_list, w_ih_list):
        p = jnp.einsum("btf,fg->btg", x.astype(jnp.bfloat16), w,
                       preferred_element_type=jnp.float32)
        gx = p if gx is None else gx + p
    gx = gx + b                                       # (B, T, 4H) f32
    gseq = jnp.swapaxes(gx, 0, 1)                     # (T, B, 4H)
    if reverse:
        gseq = gseq[::-1]

    def step(carry, g_t):
        h, c = carry
        g = g_t + jnp.dot(h.astype(jnp.bfloat16), w_hh,
                          preferred_element_type=jnp.float32)
        i = jax.nn.sigmoid(g[:, 0:H])
        f = jax.nn.sigmoid(g[:, H:2 * H])
        o = jax.nn.sigmoid(g[:, 2 * H:3 * H])
        gg = jnp.tanh(g[:, 3 * H:4 * H])
        c = f * c + i * gg
        h = o * jnp.tanh(c)
        return (h, c), h

    init = (jnp.zeros((B, H), jnp.float32), jnp.zeros((B, H), jnp.float32))
    (h, c), out = lax.scan(step, init, gseq)
    if reverse:
        out = out[::-1]
    return jnp.swapaxes(out, 0, 1), h, c              # (B, T, H), (B,H), (B,H)


def encoder_forward_ref(params, input_ids):
    x_list = [jnp.take(params["embedding"], input_ids, axis=0).astype(jnp.bfloat16)]
    h_list, c_list = [], []
    for layer in params["layers"]:
        H = layer["w_hh_f"].shape[0]
        feats = [x.shape[-1] for x in x_list]
        offs = [0] + list(np.cumsum(feats))
        wih_f = [layer["w_ih_f"][offs[i]:offs[i + 1]] for i in range(len(feats))]
        wih_b = [layer["w_ih_b"][offs[i]:offs[i + 1]] for i in range(len(feats))]
        out_f, h_f, c_f = _lstm_dir_ref(x_list, wih_f, layer["w_hh_f"],
                                        layer["b_f"], H, False)
        out_b, h_b, c_b = _lstm_dir_ref(x_list, wih_b, layer["w_hh_b"],
                                        layer["b_b"], H, True)
        x_list = [out_f.astype(jnp.bfloat16), out_b.astype(jnp.bfloat16)]
        h_list += [h_f, h_b]
        c_list += [c_f, c_b]
    return jnp.stack(h_list, 0), jnp.stack(c_list, 0)


# ----------------------------------------------------------------------------
# Deterministic parameter init (shapes per nn.Embedding / nn.LSTM __init__).
# Weights stored split & transposed: W_ih (Din, 4H) bf16, W_hh (H, 4H) bf16,
# bias = b_ih + b_hh combined (1, 4H) f32.  Gate column order is [i, f, o, g]
# (a PyTorch checkpoint would need its (i, f, g, o) columns permuted).
# ----------------------------------------------------------------------------
def init_params(key, num_embeddings, embed_size, hidden_size, num_layers):
    key, k_emb = jax.random.split(key)
    emb = jax.random.normal(k_emb, (num_embeddings, embed_size), jnp.float32)
    emb = emb.at[0].set(0.0)                          # padding_idx=0 row is zeros

    bound = 1.0 / math.sqrt(hidden_size)
    layers = []
    for l in range(num_layers):
        din = embed_size if l == 0 else 2 * hidden_size
        layer = {}
        for tag in ("f", "b"):
            key, k1, k2, k3, k4 = jax.random.split(key, 5)
            w_ih = jax.random.uniform(k1, (din, 4 * hidden_size),
                                      jnp.float32, -bound, bound)
            w_hh = jax.random.uniform(k2, (hidden_size, 4 * hidden_size),
                                      jnp.float32, -bound, bound)
            bias = (jax.random.uniform(k3, (1, 4 * hidden_size),
                                       jnp.float32, -bound, bound)
                    + jax.random.uniform(k4, (1, 4 * hidden_size),
                                         jnp.float32, -bound, bound))
            layer["w_ih_" + tag] = w_ih.astype(jnp.bfloat16)
            layer["w_hh_" + tag] = w_hh.astype(jnp.bfloat16)
            layer["b_" + tag] = bias
        layers.append(layer)
    return {"embedding": emb, "layers": layers}


if __name__ == "__main__":
    NUM_EMBEDDINGS = 50
    EMBED_SIZE = 32
    HIDDEN_SIZE = 32
    NUM_LAYERS = 2          # module default is 5; small value for a quick run
    BATCH = 2
    SEQ = 20                # not a multiple of the chunk -> exercises padding+masking

    key = jax.random.PRNGKey(0)
    key, k_par, k_ids = jax.random.split(key, 3)
    params = init_params(k_par, NUM_EMBEDDINGS, EMBED_SIZE, HIDDEN_SIZE, NUM_LAYERS)
    input_ids = jax.random.randint(k_ids, (BATCH, SEQ), 0, NUM_EMBEDDINGS,
                                   dtype=jnp.int32)

    # t_chunk=8 with SEQ=20 -> 3 chunks (last one partially masked)
    fwd = jax.jit(functools.partial(encoder_forward, t_chunk=8))
    h_n, c_n = fwd(params, input_ids)
    (h_n, c_n) = jax.block_until_ready((h_n, c_n))

    assert h_n.shape == (NUM_LAYERS * 2, BATCH, HIDDEN_SIZE)
    assert c_n.shape == (NUM_LAYERS * 2, BATCH, HIDDEN_SIZE)

    h_ref, c_ref = encoder_forward_ref(params, input_ids)
    np.testing.assert_allclose(np.asarray(h_n), np.asarray(h_ref),
                               rtol=2e-3, atol=2e-3)
    np.testing.assert_allclose(np.asarray(c_n), np.asarray(c_ref),
                               rtol=2e-3, atol=2e-3)

    print("KERNEL_OK")
</pallas_src>

<mosaic_0001>
module attributes {stable_mosaic.version = 11 : i64} {
  func.func @kernel(%arg0: i32, %arg1: memref<16x32xbf16, #tpu.memory_space<vmem>>, %arg2: memref<16x32xbf16, #tpu.memory_space<vmem>>, %arg3: memref<32x128xbf16, #tpu.memory_space<vmem>>, %arg4: memref<32x128xbf16, #tpu.memory_space<vmem>>, %arg5: memref<32x128xbf16, #tpu.memory_space<vmem>>, %arg6: memref<32x128xbf16, #tpu.memory_space<vmem>>, %arg7: memref<1x128xf32, #tpu.memory_space<vmem>>, %arg8: memref<1x128xf32, #tpu.memory_space<vmem>>, %arg9: memref<16x32xbf16, #tpu.memory_space<vmem>>, %arg10: memref<16x32xbf16, #tpu.memory_space<vmem>>, %arg11: memref<2x32xf32, #tpu.memory_space<vmem>>, %arg12: memref<2x32xf32, #tpu.memory_space<vmem>>, %arg13: memref<2x32xf32, #tpu.memory_space<vmem>>, %arg14: memref<2x32xf32, #tpu.memory_space<vmem>>, %arg15: memref<16x32xf32, #tpu.memory_space<vmem>>, %arg16: memref<16x32xf32, #tpu.memory_space<vmem>>) attributes {dimension_semantics = [#tpu.dimension_semantics<arbitrary>], iteration_bounds = array<i64: 3>, scalar_prefetch = 0 : i64, scratch_operands = 2 : i64, tpu.core_type = #tpu.core_type<tc>, window_params = [{transform_indices = @transform_0, window_bounds = array<i64: 16, 32>}, {transform_indices = @transform_1, window_bounds = array<i64: 16, 32>}, {pipeline_mode = #tpu.pipeline_mode<synchronous>, transform_indices = @transform_2, window_bounds = array<i64: 32, 128>}, {pipeline_mode = #tpu.pipeline_mode<synchronous>, transform_indices = @transform_3, window_bounds = array<i64: 32, 128>}, {pipeline_mode = #tpu.pipeline_mode<synchronous>, transform_indices = @transform_4, window_bounds = array<i64: 32, 128>}, {pipeline_mode = #tpu.pipeline_mode<synchronous>, transform_indices = @transform_5, window_bounds = array<i64: 32, 128>}, {pipeline_mode = #tpu.pipeline_mode<synchronous>, transform_indices = @transform_6, window_bounds = array<i64: 1, 128>}, {pipeline_mode = #tpu.pipeline_mode<synchronous>, transform_indices = @transform_7, window_bounds = array<i64: 1, 128>}, {transform_indices = @transform_8, window_bounds = array<i64: 16, 32>}, {transform_indices = @transform_9, window_bounds = array<i64: 16, 32>}, {pipeline_mode = #tpu.pipeline_mode<synchronous>, transform_indices = @transform_10, window_bounds = array<i64: 2, 32>}, {pipeline_mode = #tpu.pipeline_mode<synchronous>, transform_indices = @transform_11, window_bounds = array<i64: 2, 32>}, {pipeline_mode = #tpu.pipeline_mode<synchronous>, transform_indices = @transform_12, window_bounds = array<i64: 2, 32>}, {pipeline_mode = #tpu.pipeline_mode<synchronous>, transform_indices = @transform_13, window_bounds = array<i64: 2, 32>}]} {
    %c0_i32 = arith.constant 0 : i32
    %0 = arith.cmpi eq, %arg0, %c0_i32 : i32
    %1 = arith.extui %0 : i1 to i32
    %c0_i32_0 = arith.constant 0 : i32
    %2 = arith.cmpi ne, %1, %c0_i32_0 : i32
    scf.if %2 {
      %cst_145 = arith.constant 0.000000e+00 : f32
      %455 = vector.broadcast %cst_145 : f32 to vector<2x32xf32>
      %c0_146 = arith.constant 0 : index
      %c0_147 = arith.constant 0 : index
      %456 = vector.load %arg11[%c0_146, %c0_147] : memref<2x32xf32, #tpu.memory_space<vmem>>, vector<2x32xf32>
      tpu.vector_store %arg11[%c0_146, %c0_147], %455 {strides = array<i32>} : memref<2x32xf32, #tpu.memory_space<vmem>>, vector<2x32xf32>,
      %cst_148 = arith.constant 0.000000e+00 : f32
      %457 = vector.broadcast %cst_148 : f32 to vector<2x32xf32>
      %c0_149 = arith.constant 0 : index
      %c0_150 = arith.constant 0 : index
      %458 = vector.load %arg12[%c0_149, %c0_150] : memref<2x32xf32, #tpu.memory_space<vmem>>, vector<2x32xf32>
      tpu.vector_store %arg12[%c0_149, %c0_150], %457 {strides = array<i32>} : memref<2x32xf32, #tpu.memory_space<vmem>>, vector<2x32xf32>,
      %cst_151 = arith.constant 0.000000e+00 : f32
      %459 = vector.broadcast %cst_151 : f32 to vector<2x32xf32>
      %c0_152 = arith.constant 0 : index
      %c0_153 = arith.constant 0 : index
      %460 = vector.load %arg13[%c0_152, %c0_153] : memref<2x32xf32, #tpu.memory_space<vmem>>, vector<2x32xf32>
      tpu.vector_store %arg13[%c0_152, %c0_153], %459 {strides = array<i32>} : memref<2x32xf32, #tpu.memory_space<vmem>>, vector<2x32xf32>,
      %cst_154 = arith.constant 0.000000e+00 : f32
      %461 = vector.broadcast %cst_154 : f32 to vector<2x32xf32>
      %c0_155 = arith.constant 0 : index
      %c0_156 = arith.constant 0 : index
      %462 = vector.load %arg14[%c0_155, %c0_156] : memref<2x32xf32, #tpu.memory_space<vmem>>, vector<2x32xf32>
      tpu.vector_store %arg14[%c0_155, %c0_156], %461 {strides = array<i32>} : memref<2x32xf32, #tpu.memory_space<vmem>>, vector<2x32xf32>,
    } else {
    }
    %c0 = arith.constant 0 : index
    %c0_1 = arith.constant 0 : index
    %3 = vector.load %arg1[%c0, %c0_1] : memref<16x32xbf16, #tpu.memory_space<vmem>>, vector<16x32xbf16>
    %c0_2 = arith.constant 0 : index
    %c0_3 = arith.constant 0 : index
    %4 = vector.load %arg3[%c0_2, %c0_3] : memref<32x128xbf16, #tpu.memory_space<vmem>>, vector<32x128xbf16>
    %cst = arith.constant dense<0.000000e+00> : vector<16x128xf32>
    %5 = tpu.matmul %3, %4, %cst {dimension_numbers = #tpu.dot_dimension_numbers<[1], [0], [0], [1], [0, 0, 1, 1], [], []>} : vector<16x32xbf16>, vector<32x128xbf16>, vector<16x128xf32> -> vector<16x128xf32>
    %c0_4 = arith.constant 0 : index
    %c0_5 = arith.constant 0 : index
    %6 = vector.load %arg7[%c0_4, %c0_5] : memref<1x128xf32, #tpu.memory_space<vmem>>, vector<1x128xf32>
    %7 = vector.broadcast %6 : vector<1x128xf32> to vector<16x128xf32>
    %8 = arith.addf %5, %7 : vector<16x128xf32>
    %c0_6 = arith.constant 0 : index
    %c0_7 = arith.constant 0 : index
    %9 = vector.load %arg2[%c0_6, %c0_7] : memref<16x32xbf16, #tpu.memory_space<vmem>>, vector<16x32xbf16>
    %c0_8 = arith.constant 0 : index
    %c0_9 = arith.constant 0 : index
    %10 = vector.load %arg4[%c0_8, %c0_9] : memref<32x128xbf16, #tpu.memory_space<vmem>>, vector<32x128xbf16>
    %cst_10 = arith.constant dense<0.000000e+00> : vector<16x128xf32>
    %11 = tpu.matmul %9, %10, %cst_10 {dimension_numbers = #tpu.dot_dimension_numbers<[1], [0], [0], [1], [0, 0, 1, 1], [], []>} : vector<16x32xbf16>, vector<32x128xbf16>, vector<16x128xf32> -> vector<16x128xf32>
    %c0_11 = arith.constant 0 : index
    %c0_12 = arith.constant 0 : index
    %12 = vector.load %arg8[%c0_11, %c0_12] : memref<1x128xf32, #tpu.memory_space<vmem>>, vector<1x128xf32>
    %13 = vector.broadcast %12 : vector<1x128xf32> to vector<16x128xf32>
    %14 = arith.addf %11, %13 : vector<16x128xf32>
    %c0_13 = arith.constant 0 : index
    %c0_14 = arith.constant 0 : index
    %15 = vector.load %arg5[%c0_13, %c0_14] : memref<32x128xbf16, #tpu.memory_space<vmem>>, vector<32x128xbf16>
    %c0_15 = arith.constant 0 : index
    %c0_16 = arith.constant 0 : index
    %16 = vector.load %arg6[%c0_15, %c0_16] : memref<32x128xbf16, #tpu.memory_space<vmem>>, vector<32x128xbf16>
    %c0_17 = arith.constant 0 : index
    %c0_18 = arith.constant 0 : index
    %17 = vector.load %arg11[%c0_17, %c0_18] : memref<2x32xf32, #tpu.memory_space<vmem>>, vector<2x32xf32>
    %c0_19 = arith.constant 0 : index
    %c0_20 = arith.constant 0 : index
    %18 = vector.load %arg12[%c0_19, %c0_20] : memref<2x32xf32, #tpu.memory_space<vmem>>, vector<2x32xf32>
    %c0_21 = arith.constant 0 : index
    %c0_22 = arith.constant 0 : index
    %19 = vector.load %arg13[%c0_21, %c0_22] : memref<2x32xf32, #tpu.memory_space<vmem>>, vector<2x32xf32>
    %c0_23 = arith.constant 0 : index
    %c0_24 = arith.constant 0 : index
    %20 = vector.load %arg14[%c0_23, %c0_24] : memref<2x32xf32, #tpu.memory_space<vmem>>, vector<2x32xf32>
    %21 = vector.extract_strided_slice %8 {offsets = [0, 0], sizes = [2, 128], strides = [1, 1]} : vector<16x128xf32> to vector<2x128xf32>
    %22 = arith.truncf %17 : vector<2x32xf32> to vector<2x32xbf16>
    %cst_25 = arith.constant dense<0.000000e+00> : vector<2x128xf32>
    %23 = tpu.matmul %22, %15, %cst_25 {dimension_numbers = #tpu.dot_dimension_numbers<[1], [0], [0], [1], [0, 0, 1, 1], [], []>} : vector<2x32xbf16>, vector<32x128xbf16>, vector<2x128xf32> -> vector<2x128xf32>
    %24 = arith.addf %21, %23 : vector<2x128xf32>
    %25 = vector.extract_strided_slice %14 {offsets = [14, 0], sizes = [2, 128], strides = [1, 1]} : vector<16x128xf32> to vector<2x128xf32>
    %26 = arith.truncf %19 : vector<2x32xf32> to vector<2x32xbf16>
    %cst_26 = arith.constant dense<0.000000e+00> : vector<2x128xf32>
    %27 = tpu.matmul %26, %16, %cst_26 {dimension_numbers = #tpu.dot_dimension_numbers<[1], [0], [0], [1], [0, 0, 1, 1], [], []>} : vector<2x32xbf16>, vector<32x128xbf16>, vector<2x128xf32> -> vector<2x128xf32>
    %28 = arith.addf %25, %27 : vector<2x128xf32>
    %29 = vector.extract_strided_slice %24 {offsets = [0, 0], sizes = [2, 96], strides = [1, 1]} : vector<2x128xf32> to vector<2x96xf32>
    %30 = arith.negf %29 : vector<2x96xf32>
    %31 = math.exp %30 : vector<2x96xf32>
    %cst_27 = arith.constant 1.000000e+00 : f32
    %32 = vector.broadcast %cst_27 : f32 to vector<2x96xf32>
    %33 = arith.addf %32, %31 : vector<2x96xf32>
    %34 = arith.divf %32, %33 : vector<2x96xf32>
    %35 = vector.extract_strided_slice %34 {offsets = [0, 0], sizes = [2, 32], strides = [1, 1]} : vector<2x96xf32> to vector<2x32xf32>
    %36 = vector.extract_strided_slice %34 {offsets = [0, 32], sizes = [2, 32], strides = [1, 1]} : vector<2x96xf32> to vector<2x32xf32>
    %37 = vector.extract_strided_slice %34 {offsets = [0, 64], sizes = [2, 32], strides = [1, 1]} : vector<2x96xf32> to vector<2x32xf32>
    %38 = vector.extract_strided_slice %24 {offsets = [0, 96], sizes = [2, 32], strides = [1, 1]} : vector<2x128xf32> to vector<2x32xf32>
    %39 = math.tanh %38 : vector<2x32xf32>
    %40 = arith.mulf %36, %18 : vector<2x32xf32>
    %41 = arith.mulf %35, %39 : vector<2x32xf32>
    %42 = arith.addf %40, %41 : vector<2x32xf32>
    %43 = math.tanh %42 : vector<2x32xf32>
    %44 = arith.mulf %37, %43 : vector<2x32xf32>
    %45 = vector.extract_strided_slice %28 {offsets = [0, 0], sizes = [2, 96], strides = [1, 1]} : vector<2x128xf32> to vector<2x96xf32>
    %46 = arith.negf %45 : vector<2x96xf32>
    %47 = math.exp %46 : vector<2x96xf32>
    %cst_28 = arith.constant 1.000000e+00 : f32
    %48 = vector.broadcast %cst_28 : f32 to vector<2x96xf32>
    %49 = arith.addf %48, %47 : vector<2x96xf32>
    %50 = arith.divf %48, %49 : vector<2x96xf32>
    %51 = vector.extract_strided_slice %50 {offsets = [0, 0], sizes = [2, 32], strides = [1, 1]} : vector<2x96xf32> to vector<2x32xf32>
    %52 = vector.extract_strided_slice %50 {offsets = [0, 32], sizes = [2, 32], strides = [1, 1]} : vector<2x96xf32> to vector<2x32xf32>
    %53 = vector.extract_strided_slice %50 {offsets = [0, 64], sizes = [2, 32], strides = [1, 1]} : vector<2x96xf32> to vector<2x32xf32>
    %54 = vector.extract_strided_slice %28 {offsets = [0, 96], sizes = [2, 32], strides = [1, 1]} : vector<2x128xf32> to vector<2x32xf32>
    %55 = math.tanh %54 : vector<2x32xf32>
    %56 = arith.mulf %52, %20 : vector<2x32xf32>
    %57 = arith.mulf %51, %55 : vector<2x32xf32>
    %58 = arith.addf %56, %57 : vector<2x32xf32>
    %59 = math.tanh %58 : vector<2x32xf32>
    %60 = arith.mulf %53, %59 : vector<2x32xf32>
    %c8_i32 = arith.constant 8 : i32
    %61 = arith.muli %arg0, %c8_i32 : i32
    %c0_i32_29 = arith.constant 0 : i32
    %62 = arith.addi %61, %c0_i32_29 : i32
    %c20_i32 = arith.constant 20 : i32
    %63 = arith.cmpi slt, %62, %c20_i32 : i32
    %c2_i32 = arith.constant 2 : i32
    %64 = arith.subi %c2_i32, %arg0 : i32
    %c8_i32_30 = arith.constant 8 : i32
    %65 = arith.muli %64, %c8_i32_30 : i32
    %c7_i32 = arith.constant 7 : i32
    %66 = arith.addi %65, %c7_i32 : i32
    %c20_i32_31 = arith.constant 20 : i32
    %67 = arith.cmpi slt, %66, %c20_i32_31 : i32
    %68 = arith.select %63, %44, %17 : vector<2x32xf32>
    %69 = arith.select %63, %42, %18 : vector<2x32xf32>
    %70 = arith.select %67, %60, %19 : vector<2x32xf32>
    %71 = arith.select %67, %58, %20 : vector<2x32xf32>
    %c0_32 = arith.constant 0 : index
    %c0_33 = arith.constant 0 : index
    %72 = vector.load %arg15[%c0_32, %c0_33] : memref<16x32xf32, #tpu.memory_space<vmem>>, vector<2x32xf32>
    tpu.vector_store %arg15[%c0_32, %c0_33], %68 {strides = array<i32>} : memref<16x32xf32, #tpu.memory_space<vmem>>, vector<2x32xf32>,
    %c14 = arith.constant 14 : index
    %c0_34 = arith.constant 0 : index
    %73 = vector.load %arg16[%c14, %c0_34] : memref<16x32xf32, #tpu.memory_space<vmem>>, vector<2x32xf32>
    tpu.vector_store %arg16[%c14, %c0_34], %70 {strides = array<i32>} : memref<16x32xf32, #tpu.memory_space<vmem>>, vector<2x32xf32>,
    %74 = vector.extract_strided_slice %8 {offsets = [2, 0], sizes = [2, 128], strides = [1, 1]} : vector<16x128xf32> to vector<2x128xf32>
    %75 = arith.truncf %68 : vector<2x32xf32> to vector<2x32xbf16>
    %cst_35 = arith.constant dense<0.000000e+00> : vector<2x128xf32>
    %76 = tpu.matmul %75, %15, %cst_35 {dimension_numbers = #tpu.dot_dimension_numbers<[1], [0], [0], [1], [0, 0, 1, 1], [], []>} : vector<2x32xbf16>, vector<32x128xbf16>, vector<2x128xf32> -> vector<2x128xf32>
    %77 = arith.addf %74, %76 : vector<2x128xf32>
    %78 = vector.extract_strided_slice %14 {offsets = [12, 0], sizes = [2, 128], strides = [1, 1]} : vector<16x128xf32> to vector<2x128xf32>
    %79 = arith.truncf %70 : vector<2x32xf32> to vector<2x32xbf16>
    %cst_36 = arith.constant dense<0.000000e+00> : vector<2x128xf32>
    %80 = tpu.matmul %79, %16, %cst_36 {dimension_numbers = #tpu.dot_dimension_numbers<[1], [0], [0], [1], [0, 0, 1, 1], [], []>} : vector<2x32xbf16>, vector<32x128xbf16>, vector<2x128xf32> -> vector<2x128xf32>
    %81 = arith.addf %78, %80 : vector<2x128xf32>
    %82 = vector.extract_strided_slice %77 {offsets = [0, 0], sizes = [2, 96], strides = [1, 1]} : vector<2x128xf32> to vector<2x96xf32>
    %83 = arith.negf %82 : vector<2x96xf32>
    %84 = math.exp %83 : vector<2x96xf32>
    %cst_37 = arith.constant 1.000000e+00 : f32
    %85 = vector.broadcast %cst_37 : f32 to vector<2x96xf32>
    %86 = arith.addf %85, %84 : vector<2x96xf32>
    %87 = arith.divf %85, %86 : vector<2x96xf32>
    %88 = vector.extract_strided_slice %87 {offsets = [0, 0], sizes = [2, 32], strides = [1, 1]} : vector<2x96xf32> to vector<2x32xf32>
    %89 = vector.extract_strided_slice %87 {offsets = [0, 32], sizes = [2, 32], strides = [1, 1]} : vector<2x96xf32> to vector<2x32xf32>
    %90 = vector.extract_strided_slice %87 {offsets = [0, 64], sizes = [2, 32], strides = [1, 1]} : vector<2x96xf32> to vector<2x32xf32>
    %91 = vector.extract_strided_slice %77 {offsets = [0, 96], sizes = [2, 32], strides = [1, 1]} : vector<2x128xf32> to vector<2x32xf32>
    %92 = math.tanh %91 : vector<2x32xf32>
    %93 = arith.mulf %89, %69 : vector<2x32xf32>
    %94 = arith.mulf %88, %92 : vector<2x32xf32>
    %95 = arith.addf %93, %94 : vector<2x32xf32>
    %96 = math.tanh %95 : vector<2x32xf32>
    %97 = arith.mulf %90, %96 : vector<2x32xf32>
    %98 = vector.extract_strided_slice %81 {offsets = [0, 0], sizes = [2, 96], strides = [1, 1]} : vector<2x128xf32> to vector<2x96xf32>
    %99 = arith.negf %98 : vector<2x96xf32>
    %100 = math.exp %99 : vector<2x96xf32>
    %cst_38 = arith.constant 1.000000e+00 : f32
    %101 = vector.broadcast %cst_38 : f32 to vector<2x96xf32>
    %102 = arith.addf %101, %100 : vector<2x96xf32>
    %103 = arith.divf %101, %102 : vector<2x96xf32>
    %104 = vector.extract_strided_slice %103 {offsets = [0, 0], sizes = [2, 32], strides = [1, 1]} : vector<2x96xf32> to vector<2x32xf32>
    %105 = vector.extract_strided_slice %103 {offsets = [0, 32], sizes = [2, 32], strides = [1, 1]} : vector<2x96xf32> to vector<2x32xf32>
    %106 = vector.extract_strided_slice %103 {offsets = [0, 64], sizes = [2, 32], strides = [1, 1]} : vector<2x96xf32> to vector<2x32xf32>
    %107 = vector.extract_strided_slice %81 {offsets = [0, 96], sizes = [2, 32], strides = [1, 1]} : vector<2x128xf32> to vector<2x32xf32>
    %108 = math.tanh %107 : vector<2x32xf32>
    %109 = arith.mulf %105, %71 : vector<2x32xf32>
    %110 = arith.mulf %104, %108 : vector<2x32xf32>
    %111 = arith.addf %109, %110 : vector<2x32xf32>
    %112 = math.tanh %111 : vector<2x32xf32>
    %113 = arith.mulf %106, %112 : vector<2x32xf32>
    %c8_i32_39 = arith.constant 8 : i32
    %114 = arith.muli %arg0, %c8_i32_39 : i32
    %c1_i32 = arith.constant 1 : i32
    %115 = arith.addi %114, %c1_i32 : i32
    %c20_i32_40 = arith.constant 20 : i32
    %116 = arith.cmpi slt, %115, %c20_i32_40 : i32
    %c2_i32_41 = arith.constant 2 : i32
    %117 = arith.subi %c2_i32_41, %arg0 : i32
    %c8_i32_42 = arith.constant 8 : i32
    %118 = arith.muli %117, %c8_i32_42 : i32
    %c6_i32 = arith.constant 6 : i32
    %119 = arith.addi %118, %c6_i32 : i32
    %c20_i32_43 = arith.constant 20 : i32
    %120 = arith.cmpi slt, %119, %c20_i32_43 : i32
    %121 = arith.select %116, %97, %68 : vector<2x32xf32>
    %122 = arith.select %116, %95, %69 : vector<2x32xf32>
    %123 = arith.select %120, %113, %70 : vector<2x32xf32>
    %124 = arith.select %120, %111, %71 : vector<2x32xf32>
    %c2 = arith.constant 2 : index
    %c0_44 = arith.constant 0 : index
    %125 = vector.load %arg15[%c2, %c0_44] : memref<16x32xf32, #tpu.memory_space<vmem>>, vector<2x32xf32>
    tpu.vector_store %arg15[%c2, %c0_44], %121 {strides = array<i32>} : memref<16x32xf32, #tpu.memory_space<vmem>>, vector<2x32xf32>,
    %c12 = arith.constant 12 : index
    %c0_45 = arith.constant 0 : index
    %126 = vector.load %arg16[%c12, %c0_45] : memref<16x32xf32, #tpu.memory_space<vmem>>, vector<2x32xf32>
    tpu.vector_store %arg16[%c12, %c0_45], %123 {strides = array<i32>} : memref<16x32xf32, #tpu.memory_space<vmem>>, vector<2x32xf32>,
    %127 = vector.extract_strided_slice %8 {offsets = [4, 0], sizes = [2, 128], strides = [1, 1]} : vector<16x128xf32> to vector<2x128xf32>
    %128 = arith.truncf %121 : vector<2x32xf32> to vector<2x32xbf16>
    %cst_46 = arith.constant dense<0.000000e+00> : vector<2x128xf32>
    %129 = tpu.matmul %128, %15, %cst_46 {dimension_numbers = #tpu.dot_dimension_numbers<[1], [0], [0], [1], [0, 0, 1, 1], [], []>} : vector<2x32xbf16>, vector<32x128xbf16>, vector<2x128xf32> -> vector<2x128xf32>
    %130 = arith.addf %127, %129 : vector<2x128xf32>
    %131 = vector.extract_strided_slice %14 {offsets = [10, 0], sizes = [2, 128], strides = [1, 1]} : vector<16x128xf32> to vector<2x128xf32>
    %132 = arith.truncf %123 : vector<2x32xf32> to vector<2x32xbf16>
    %cst_47 = arith.constant dense<0.000000e+00> : vector<2x128xf32>
    %133 = tpu.matmul %132, %16, %cst_47 {dimension_numbers = #tpu.dot_dimension_numbers<[1], [0], [0], [1], [0, 0, 1, 1], [], []>} : vector<2x32xbf16>, vector<32x128xbf16>, vector<2x128xf32> -> vector<2x128xf32>
    %134 = arith.addf %131, %133 : vector<2x128xf32>
    %135 = vector.extract_strided_slice %130 {offsets = [0, 0], sizes = [2, 96], strides = [1, 1]} : vector<2x128xf32> to vector<2x96xf32>
    %136 = arith.negf %135 : vector<2x96xf32>
    %137 = math.exp %136 : vector<2x96xf32>
    %cst_48 = arith.constant 1.000000e+00 : f32
    %138 = vector.broadcast %cst_48 : f32 to vector<2x96xf32>
    %139 = arith.addf %138, %137 : vector<2x96xf32>
    %140 = arith.divf %138, %139 : vector<2x96xf32>
    %141 = vector.extract_strided_slice %140 {offsets = [0, 0], sizes = [2, 32], strides = [1, 1]} : vector<2x96xf32> to vector<2x32xf32>
    %142 = vector.extract_strided_slice %140 {offsets = [0, 32], sizes = [2, 32], strides = [1, 1]} : vector<2x96xf32> to vector<2x32xf32>
    %143 = vector.extract_strided_slice %140 {offsets = [0, 64], sizes = [2, 32], strides = [1, 1]} : vector<2x96xf32> to vector<2x32xf32>
    %144 = vector.extract_strided_slice %130 {offsets = [0, 96], sizes = [2, 32], strides = [1, 1]} : vector<2x128xf32> to vector<2x32xf32>
    %145 = math.tanh %144 : vector<2x32xf32>
    %146 = arith.mulf %142, %122 : vector<2x32xf32>
    %147 = arith.mulf %141, %145 : vector<2x32xf32>
    %148 = arith.addf %146, %147 : vector<2x32xf32>
    %149 = math.tanh %148 : vector<2x32xf32>
    %150 = arith.mulf %143, %149 : vector<2x32xf32>
    %151 = vector.extract_strided_slice %134 {offsets = [0, 0], sizes = [2, 96], strides = [1, 1]} : vector<2x128xf32> to vector<2x96xf32>
    %152 = arith.negf %151 : vector<2x96xf32>
    %153 = math.exp %152 : vector<2x96xf32>
    %cst_49 = arith.constant 1.000000e+00 : f32
    %154 = vector.broadcast %cst_49 : f32 to vector<2x96xf32>
    %155 = arith.addf %154, %153 : vector<2x96xf32>
    %156 = arith.divf %154, %155 : vector<2x96xf32>
    %157 = vector.extract_strided_slice %156 {offsets = [0, 0], sizes = [2, 32], strides = [1, 1]} : vector<2x96xf32> to vector<2x32xf32>
    %158 = vector.extract_strided_slice %156 {offsets = [0, 32], sizes = [2, 32], strides = [1, 1]} : vector<2x96xf32> to vector<2x32xf32>
    %159 = vector.extract_strided_slice %156 {offsets = [0, 64], sizes = [2, 32], strides = [1, 1]} : vector<2x96xf32> to vector<2x32xf32>
    %160 = vector.extract_strided_slice %134 {offsets = [0, 96], sizes = [2, 32], strides = [1, 1]} : vector<2x128xf32> to vector<2x32xf32>
    %161 = math.tanh %160 : vector<2x32xf32>
    %162 = arith.mulf %158, %124 : vector<2x32xf32>
    %163 = arith.mulf %157, %161 : vector<2x32xf32>
    %164 = arith.addf %162, %163 : vector<2x32xf32>
    %165 = math.tanh %164 : vector<2x32xf32>
    %166 = arith.mulf %159, %165 : vector<2x32xf32>
    %c8_i32_50 = arith.constant 8 : i32
    %167 = arith.muli %arg0, %c8_i32_50 : i32
    %c2_i32_51 = arith.constant 2 : i32
    %168 = arith.addi %167, %c2_i32_51 : i32
    %c20_i32_52 = arith.constant 20 : i32
    %169 = arith.cmpi slt, %168, %c20_i32_52 : i32
    %c2_i32_53 = arith.constant 2 : i32
    %170 = arith.subi %c2_i32_53, %arg0 : i32
    %c8_i32_54 = arith.constant 8 : i32
    %171 = arith.muli %170, %c8_i32_54 : i32
    %c5_i32 = arith.constant 5 : i32
    %172 = arith.addi %171, %c5_i32 : i32
    %c20_i32_55 = arith.constant 20 : i32
    %173 = arith.cmpi slt, %172, %c20_i32_55 : i32
    %174 = arith.select %169, %150, %121 : vector<2x32xf32>
    %175 = arith.select %169, %148, %122 : vector<2x32xf32>
    %176 = arith.select %173, %166, %123 : vector<2x32xf32>
    %177 = arith.select %173, %164, %124 : vector<2x32xf32>
    %c4 = arith.constant 4 : index
    %c0_56 = arith.constant 0 : index
    %178 = vector.load %arg15[%c4, %c0_56] : memref<16x32xf32, #tpu.memory_space<vmem>>, vector<2x32xf32>
    tpu.vector_store %arg15[%c4, %c0_56], %174 {strides = array<i32>} : memref<16x32xf32, #tpu.memory_space<vmem>>, vector<2x32xf32>,
    %c10 = arith.constant 10 : index
    %c0_57 = arith.constant 0 : index
    %179 = vector.load %arg16[%c10, %c0_57] : memref<16x32xf32, #tpu.memory_space<vmem>>, vector<2x32xf32>
    tpu.vector_store %arg16[%c10, %c0_57], %176 {strides = array<i32>} : memref<16x32xf32, #tpu.memory_space<vmem>>, vector<2x32xf32>,
    %180 = vector.extract_strided_slice %8 {offsets = [6, 0], sizes = [2, 128], strides = [1, 1]} : vector<16x128xf32> to vector<2x128xf32>
    %181 = arith.truncf %174 : vector<2x32xf32> to vector<2x32xbf16>
    %cst_58 = arith.constant dense<0.000000e+00> : vector<2x128xf32>
    %182 = tpu.matmul %181, %15, %cst_58 {dimension_numbers = #tpu.dot_dimension_numbers<[1], [0], [0], [1], [0, 0, 1, 1], [], []>} : vector<2x32xbf16>, vector<32x128xbf16>, vector<2x128xf32> -> vector<2x128xf32>
    %183 = arith.addf %180, %182 : vector<2x128xf32>
    %184 = vector.extract_strided_slice %14 {offsets = [8, 0], sizes = [2, 128], strides = [1, 1]} : vector<16x128xf32> to vector<2x128xf32>
    %185 = arith.truncf %176 : vector<2x32xf32> to vector<2x32xbf16>
    %cst_59 = arith.constant dense<0.000000e+00> : vector<2x128xf32>
    %186 = tpu.matmul %185, %16, %cst_59 {dimension_numbers = #tpu.dot_dimension_numbers<[1], [0], [0], [1], [0, 0, 1, 1], [], []>} : vector<2x32xbf16>, vector<32x128xbf16>, vector<2x128xf32> -> vector<2x128xf32>
    %187 = arith.addf %184, %186 : vector<2x128xf32>
    %188 = vector.extract_strided_slice %183 {offsets = [0, 0], sizes = [2, 96], strides = [1, 1]} : vector<2x128xf32> to vector<2x96xf32>
    %189 = arith.negf %188 : vector<2x96xf32>
    %190 = math.exp %189 : vector<2x96xf32>
    %cst_60 = arith.constant 1.000000e+00 : f32
    %191 = vector.broadcast %cst_60 : f32 to vector<2x96xf32>
    %192 = arith.addf %191, %190 : vector<2x96xf32>
    %193 = arith.divf %191, %192 : vector<2x96xf32>
    %194 = vector.extract_strided_slice %193 {offsets = [0, 0], sizes = [2, 32], strides = [1, 1]} : vector<2x96xf32> to vector<2x32xf32>
    %195 = vector.extract_strided_slice %193 {offsets = [0, 32], sizes = [2, 32], strides = [1, 1]} : vector<2x96xf32> to vector<2x32xf32>
    %196 = vector.extract_strided_slice %193 {offsets = [0, 64], sizes = [2, 32], strides = [1, 1]} : vector<2x96xf32> to vector<2x32xf32>
    %197 = vector.extract_strided_slice %183 {offsets = [0, 96], sizes = [2, 32], strides = [1, 1]} : vector<2x128xf32> to vector<2x32xf32>
    %198 = math.tanh %197 : vector<2x32xf32>
    %199 = arith.mulf %195, %175 : vector<2x32xf32>
    %200 = arith.mulf %194, %198 : vector<2x32xf32>
    %201 = arith.addf %199, %200 : vector<2x32xf32>
    %202 = math.tanh %201 : vector<2x32xf32>
    %203 = arith.mulf %196, %202 : vector<2x32xf32>
    %204 = vector.extract_strided_slice %187 {offsets = [0, 0], sizes = [2, 96], strides = [1, 1]} : vector<2x128xf32> to vector<2x96xf32>
    %205 = arith.negf %204 : vector<2x96xf32>
    %206 = math.exp %205 : vector<2x96xf32>
    %cst_61 = arith.constant 1.000000e+00 : f32
    %207 = vector.broadcast %cst_61 : f32 to vector<2x96xf32>
    %208 = arith.addf %207, %206 : vector<2x96xf32>
    %209 = arith.divf %207, %208 : vector<2x96xf32>
    %210 = vector.extract_strided_slice %209 {offsets = [0, 0], sizes = [2, 32], strides = [1, 1]} : vector<2x96xf32> to vector<2x32xf32>
    %211 = vector.extract_strided_slice %209 {offsets = [0, 32], sizes = [2, 32], strides = [1, 1]} : vector<2x96xf32> to vector<2x32xf32>
    %212 = vector.extract_strided_slice %209 {offsets = [0, 64], sizes = [2, 32], strides = [1, 1]} : vector<2x96xf32> to vector<2x32xf32>
    %213 = vector.extract_strided_slice %187 {offsets = [0, 96], sizes = [2, 32], strides = [1, 1]} : vector<2x128xf32> to vector<2x32xf32>
    %214 = math.tanh %213 : vector<2x32xf32>
    %215 = arith.mulf %211, %177 : vector<2x32xf32>
    %216 = arith.mulf %210, %214 : vector<2x32xf32>
    %217 = arith.addf %215, %216 : vector<2x32xf32>
    %218 = math.tanh %217 : vector<2x32xf32>
    %219 = arith.mulf %212, %218 : vector<2x32xf32>
    %c8_i32_62 = arith.constant 8 : i32
    %220 = arith.muli %arg0, %c8_i32_62 : i32
    %c3_i32 = arith.constant 3 : i32
    %221 = arith.addi %220, %c3_i32 : i32
    %c20_i32_63 = arith.constant 20 : i32
    %222 = arith.cmpi slt, %221, %c20_i32_63 : i32
    %c2_i32_64 = arith.constant 2 : i32
    %223 = arith.subi %c2_i32_64, %arg0 : i32
    %c8_i32_65 = arith.constant 8 : i32
    %224 = arith.muli %223, %c8_i32_65 : i32
    %c4_i32 = arith.constant 4 : i32
    %225 = arith.addi %224, %c4_i32 : i32
    %c20_i32_66 = arith.constant 20 : i32
    %226 = arith.cmpi slt, %225, %c20_i32_66 : i32
    %227 = arith.select %222, %203, %174 : vector<2x32xf32>
    %228 = arith.select %222, %201, %175 : vector<2x32xf32>
    %229 = arith.select %226, %219, %176 : vector<2x32xf32>
    %230 = arith.select %226, %217, %177 : vector<2x32xf32>
    %c6 = arith.constant 6 : index
    %c0_67 = arith.constant 0 : index
    %231 = vector.load %arg15[%c6, %c0_67] : memref<16x32xf32, #tpu.memory_space<vmem>>, vector<2x32xf32>
    tpu.vector_store %arg15[%c6, %c0_67], %227 {strides = array<i32>} : memref<16x32xf32, #tpu.memory_space<vmem>>, vector<2x32xf32>,
    %c8 = arith.constant 8 : index
    %c0_68 = arith.constant 0 : index
    %232 = vector.load %arg16[%c8, %c0_68] : memref<16x32xf32, #tpu.memory_space<vmem>>, vector<2x32xf32>
    tpu.vector_store %arg16[%c8, %c0_68], %229 {strides = array<i32>} : memref<16x32xf32, #tpu.memory_space<vmem>>, vector<2x32xf32>,
    %233 = vector.extract_strided_slice %8 {offsets = [8, 0], sizes = [2, 128], strides = [1, 1]} : vector<16x128xf32> to vector<2x128xf32>
    %234 = arith.truncf %227 : vector<2x32xf32> to vector<2x32xbf16>
    %cst_69 = arith.constant dense<0.000000e+00> : vector<2x128xf32>
    %235 = tpu.matmul %234, %15, %cst_69 {dimension_numbers = #tpu.dot_dimension_numbers<[1], [0], [0], [1], [0, 0, 1, 1], [], []>} : vector<2x32xbf16>, vector<32x128xbf16>, vector<2x128xf32> -> vector<2x128xf32>
    %236 = arith.addf %233, %235 : vector<2x128xf32>
    %237 = vector.extract_strided_slice %14 {offsets = [6, 0], sizes = [2, 128], strides = [1, 1]} : vector<16x128xf32> to vector<2x128xf32>
    %238 = arith.truncf %229 : vector<2x32xf32> to vector<2x32xbf16>
    %cst_70 = arith.constant dense<0.000000e+00> : vector<2x128xf32>
    %239 = tpu.matmul %238, %16, %cst_70 {dimension_numbers = #tpu.dot_dimension_numbers<[1], [0], [0], [1], [0, 0, 1, 1], [], []>} : vector<2x32xbf16>, vector<32x128xbf16>, vector<2x128xf32> -> vector<2x128xf32>
    %240 = arith.addf %237, %239 : vector<2x128xf32>
    %241 = vector.extract_strided_slice %236 {offsets = [0, 0], sizes = [2, 96], strides = [1, 1]} : vector<2x128xf32> to vector<2x96xf32>
    %242 = arith.negf %241 : vector<2x96xf32>
    %243 = math.exp %242 : vector<2x96xf32>
    %cst_71 = arith.constant 1.000000e+00 : f32
    %244 = vector.broadcast %cst_71 : f32 to vector<2x96xf32>
    %245 = arith.addf %244, %243 : vector<2x96xf32>
    %246 = arith.divf %244, %245 : vector<2x96xf32>
    %247 = vector.extract_strided_slice %246 {offsets = [0, 0], sizes = [2, 32], strides = [1, 1]} : vector<2x96xf32> to vector<2x32xf32>
    %248 = vector.extract_strided_slice %246 {offsets = [0, 32], sizes = [2, 32], strides = [1, 1]} : vector<2x96xf32> to vector<2x32xf32>
    %249 = vector.extract_strided_slice %246 {offsets = [0, 64], sizes = [2, 32], strides = [1, 1]} : vector<2x96xf32> to vector<2x32xf32>
    %250 = vector.extract_strided_slice %236 {offsets = [0, 96], sizes = [2, 32], strides = [1, 1]} : vector<2x128xf32> to vector<2x32xf32>
    %251 = math.tanh %250 : vector<2x32xf32>
    %252 = arith.mulf %248, %228 : vector<2x32xf32>
    %253 = arith.mulf %247, %251 : vector<2x32xf32>
    %254 = arith.addf %252, %253 : vector<2x32xf32>
    %255 = math.tanh %254 : vector<2x32xf32>
    %256 = arith.mulf %249, %255 : vector<2x32xf32>
    %257 = vector.extract_strided_slice %240 {offsets = [0, 0], sizes = [2, 96], strides = [1, 1]} : vector<2x128xf32> to vector<2x96xf32>
    %258 = arith.negf %257 : vector<2x96xf32>
    %259 = math.exp %258 : vector<2x96xf32>
    %cst_72 = arith.constant 1.000000e+00 : f32
    %260 = vector.broadcast %cst_72 : f32 to vector<2x96xf32>
    %261 = arith.addf %260, %259 : vector<2x96xf32>
    %262 = arith.divf %260, %261 : vector<2x96xf32>
    %263 = vector.extract_strided_slice %262 {offsets = [0, 0], sizes = [2, 32], strides = [1, 1]} : vector<2x96xf32> to vector<2x32xf32>
    %264 = vector.extract_strided_slice %262 {offsets = [0, 32], sizes = [2, 32], strides = [1, 1]} : vector<2x96xf32> to vector<2x32xf32>
    %265 = vector.extract_strided_slice %262 {offsets = [0, 64], sizes = [2, 32], strides = [1, 1]} : vector<2x96xf32> to vector<2x32xf32>
    %266 = vector.extract_strided_slice %240 {offsets = [0, 96], sizes = [2, 32], strides = [1, 1]} : vector<2x128xf32> to vector<2x32xf32>
    %267 = math.tanh %266 : vector<2x32xf32>
    %268 = arith.mulf %264, %230 : vector<2x32xf32>
    %269 = arith.mulf %263, %267 : vector<2x32xf32>
    %270 = arith.addf %268, %269 : vector<2x32xf32>
    %271 = math.tanh %270 : vector<2x32xf32>
    %272 = arith.mulf %265, %271 : vector<2x32xf32>
    %c8_i32_73 = arith.constant 8 : i32
    %273 = arith.muli %arg0, %c8_i32_73 : i32
    %c4_i32_74 = arith.constant 4 : i32
    %274 = arith.addi %273, %c4_i32_74 : i32
    %c20_i32_75 = arith.constant 20 : i32
    %275 = arith.cmpi slt, %274, %c20_i32_75 : i32
    %c2_i32_76 = arith.constant 2 : i32
    %276 = arith.subi %c2_i32_76, %arg0 : i32
    %c8_i32_77 = arith.constant 8 : i32
    %277 = arith.muli %276, %c8_i32_77 : i32
    %c3_i32_78 = arith.constant 3 : i32
    %278 = arith.addi %277, %c3_i32_78 : i32
    %c20_i32_79 = arith.constant 20 : i32
    %279 = arith.cmpi slt, %278, %c20_i32_79 : i32
    %280 = arith.select %275, %256, %227 : vector<2x32xf32>
    %281 = arith.select %275, %254, %228 : vector<2x32xf32>
    %282 = arith.select %279, %272, %229 : vector<2x32xf32>
    %283 = arith.select %279, %270, %230 : vector<2x32xf32>
    %c8_80 = arith.constant 8 : index
    %c0_81 = arith.constant 0 : index
    %284 = vector.load %arg15[%c8_80, %c0_81] : memref<16x32xf32, #tpu.memory_space<vmem>>, vector<2x32xf32>
    tpu.vector_store %arg15[%c8_80, %c0_81], %280 {strides = array<i32>} : memref<16x32xf32, #tpu.memory_space<vmem>>, vector<2x32xf32>,
    %c6_82 = arith.constant 6 : index
    %c0_83 = arith.constant 0 : index
    %285 = vector.load %arg16[%c6_82, %c0_83] : memref<16x32xf32, #tpu.memory_space<vmem>>, vector<2x32xf32>
    tpu.vector_store %arg16[%c6_82, %c0_83], %282 {strides = array<i32>} : memref<16x32xf32, #tpu.memory_space<vmem>>, vector<2x32xf32>,
    %286 = vector.extract_strided_slice %8 {offsets = [10, 0], sizes = [2, 128], strides = [1, 1]} : vector<16x128xf32> to vector<2x128xf32>
    %287 = arith.truncf %280 : vector<2x32xf32> to vector<2x32xbf16>
    %cst_84 = arith.constant dense<0.000000e+00> : vector<2x128xf32>
    %288 = tpu.matmul %287, %15, %cst_84 {dimension_numbers = #tpu.dot_dimension_numbers<[1], [0], [0], [1], [0, 0, 1, 1], [], []>} : vector<2x32xbf16>, vector<32x128xbf16>, vector<2x128xf32> -> vector<2x128xf32>
    %289 = arith.addf %286, %288 : vector<2x128xf32>
    %290 = vector.extract_strided_slice %14 {offsets = [4, 0], sizes = [2, 128], strides = [1, 1]} : vector<16x128xf32> to vector<2x128xf32>
    %291 = arith.truncf %282 : vector<2x32xf32> to vector<2x32xbf16>
    %cst_85 = arith.constant dense<0.000000e+00> : vector<2x128xf32>
    %292 = tpu.matmul %291, %16, %cst_85 {dimension_numbers = #tpu.dot_dimension_numbers<[1], [0], [0], [1], [0, 0, 1, 1], [], []>} : vector<2x32xbf16>, vector<32x128xbf16>, vector<2x128xf32> -> vector<2x128xf32>
    %293 = arith.addf %290, %292 : vector<2x128xf32>
    %294 = vector.extract_strided_slice %289 {offsets = [0, 0], sizes = [2, 96], strides = [1, 1]} : vector<2x128xf32> to vector<2x96xf32>
    %295 = arith.negf %294 : vector<2x96xf32>
    %296 = math.exp %295 : vector<2x96xf32>
    %cst_86 = arith.constant 1.000000e+00 : f32
    %297 = vector.broadcast %cst_86 : f32 to vector<2x96xf32>
    %298 = arith.addf %297, %296 : vector<2x96xf32>
    %299 = arith.divf %297, %298 : vector<2x96xf32>
    %300 = vector.extract_strided_slice %299 {offsets = [0, 0], sizes = [2, 32], strides = [1, 1]} : vector<2x96xf32> to vector<2x32xf32>
    %301 = vector.extract_strided_slice %299 {offsets = [0, 32], sizes = [2, 32], strides = [1, 1]} : vector<2x96xf32> to vector<2x32xf32>
    %302 = vector.extract_strided_slice %299 {offsets = [0, 64], sizes = [2, 32], strides = [1, 1]} : vector<2x96xf32> to vector<2x32xf32>
    %303 = vector.extract_strided_slice %289 {offsets = [0, 96], sizes = [2, 32], strides = [1, 1]} : vector<2x128xf32> to vector<2x32xf32>
    %304 = math.tanh %303 : vector<2x32xf32>
    %305 = arith.mulf %301, %281 : vector<2x32xf32>
    %306 = arith.mulf %300, %304 : vector<2x32xf32>
    %307 = arith.addf %305, %306 : vector<2x32xf32>
    %308 = math.tanh %307 : vector<2x32xf32>
    %309 = arith.mulf %302, %308 : vector<2x32xf32>
    %310 = vector.extract_strided_slice %293 {offsets = [0, 0], sizes = [2, 96], strides = [1, 1]} : vector<2x128xf32> to vector<2x96xf32>
    %311 = arith.negf %310 : vector<2x96xf32>
    %312 = math.exp %311 : vector<2x96xf32>
    %cst_87 = arith.constant 1.000000e+00 : f32
    %313 = vector.broadcast %cst_87 : f32 to vector<2x96xf32>
    %314 = arith.addf %313, %312 : vector<2x96xf32>
    %315 = arith.divf %313, %314 : vector<2x96xf32>
    %316 = vector.extract_strided_slice %315 {offsets = [0, 0], sizes = [2, 32], strides = [1, 1]} : vector<2x96xf32> to vector<2x32xf32>
    %317 = vector.extract_strided_slice %315 {offsets = [0, 32], sizes = [2, 32], strides = [1, 1]} : vector<2x96xf32> to vector<2x32xf32>
    %318 = vector.extract_strided_slice %315 {offsets = [0, 64], sizes = [2, 32], strides = [1, 1]} : vector<2x96xf32> to vector<2x32xf32>
    %319 = vector.extract_strided_slice %293 {offsets = [0, 96], sizes = [2, 32], strides = [1, 1]} : vector<2x128xf32> to vector<2x32xf32>
    %320 = math.tanh %319 : vector<2x32xf32>
    %321 = arith.mulf %317, %283 : vector<2x32xf32>
    %322 = arith.mulf %316, %320 : vector<2x32xf32>
    %323 = arith.addf %321, %322 : vector<2x32xf32>
    %324 = math.tanh %323 : vector<2x32xf32>
    %325 = arith.mulf %318, %324 : vector<2x32xf32>
    %c8_i32_88 = arith.constant 8 : i32
    %326 = arith.muli %arg0, %c8_i32_88 : i32
    %c5_i32_89 = arith.constant 5 : i32
    %327 = arith.addi %326, %c5_i32_89 : i32
    %c20_i32_90 = arith.constant 20 : i32
    %328 = arith.cmpi slt, %327, %c20_i32_90 : i32
    %c2_i32_91 = arith.constant 2 : i32
    %329 = arith.subi %c2_i32_91, %arg0 : i32
    %c8_i32_92 = arith.constant 8 : i32
    %330 = arith.muli %329, %c8_i32_92 : i32
    %c2_i32_93 = arith.constant 2 : i32
    %331 = arith.addi %330, %c2_i32_93 : i32
    %c20_i32_94 = arith.constant 20 : i32
    %332 = arith.cmpi slt, %331, %c20_i32_94 : i32
    %333 = arith.select %328, %309, %280 : vector<2x32xf32>
    %334 = arith.select %328, %307, %281 : vector<2x32xf32>
    %335 = arith.select %332, %325, %282 : vector<2x32xf32>
    %336 = arith.select %332, %323, %283 : vector<2x32xf32>
    %c10_95 = arith.constant 10 : index
    %c0_96 = arith.constant 0 : index
    %337 = vector.load %arg15[%c10_95, %c0_96] : memref<16x32xf32, #tpu.memory_space<vmem>>, vector<2x32xf32>
    tpu.vector_store %arg15[%c10_95, %c0_96], %333 {strides = array<i32>} : memref<16x32xf32, #tpu.memory_space<vmem>>, vector<2x32xf32>,
    %c4_97 = arith.constant 4 : index
    %c0_98 = arith.constant 0 : index
    %338 = vector.load %arg16[%c4_97, %c0_98] : memref<16x32xf32, #tpu.memory_space<vmem>>, vector<2x32xf32>
    tpu.vector_store %arg16[%c4_97, %c0_98], %335 {strides = array<i32>} : memref<16x32xf32, #tpu.memory_space<vmem>>, vector<2x32xf32>,
    %339 = vector.extract_strided_slice %8 {offsets = [12, 0], sizes = [2, 128], strides = [1, 1]} : vector<16x128xf32> to vector<2x128xf32>
    %340 = arith.truncf %333 : vector<2x32xf32> to vector<2x32xbf16>
    %cst_99 = arith.constant dense<0.000000e+00> : vector<2x128xf32>
    %341 = tpu.matmul %340, %15, %cst_99 {dimension_numbers = #tpu.dot_dimension_numbers<[1], [0], [0], [1], [0, 0, 1, 1], [], []>} : vector<2x32xbf16>, vector<32x128xbf16>, vector<2x128xf32> -> vector<2x128xf32>
    %342 = arith.addf %339, %341 : vector<2x128xf32>
    %343 = vector.extract_strided_slice %14 {offsets = [2, 0], sizes = [2, 128], strides = [1, 1]} : vector<16x128xf32> to vector<2x128xf32>
    %344 = arith.truncf %335 : vector<2x32xf32> to vector<2x32xbf16>
    %cst_100 = arith.constant dense<0.000000e+00> : vector<2x128xf32>
    %345 = tpu.matmul %344, %16, %cst_100 {dimension_numbers = #tpu.dot_dimension_numbers<[1], [0], [0], [1], [0, 0, 1, 1], [], []>} : vector<2x32xbf16>, vector<32x128xbf16>, vector<2x128xf32> -> vector<2x128xf32>
    %346 = arith.addf %343, %345 : vector<2x128xf32>
    %347 = vector.extract_strided_slice %342 {offsets = [0, 0], sizes = [2, 96], strides = [1, 1]} : vector<2x128xf32> to vector<2x96xf32>
    %348 = arith.negf %347 : vector<2x96xf32>
    %349 = math.exp %348 : vector<2x96xf32>
    %cst_101 = arith.constant 1.000000e+00 : f32
    %350 = vector.broadcast %cst_101 : f32 to vector<2x96xf32>
    %351 = arith.addf %350, %349 : vector<2x96xf32>
    %352 = arith.divf %350, %351 : vector<2x96xf32>
    %353 = vector.extract_strided_slice %352 {offsets = [0, 0], sizes = [2, 32], strides = [1, 1]} : vector<2x96xf32> to vector<2x32xf32>
    %354 = vector.extract_strided_slice %352 {offsets = [0, 32], sizes = [2, 32], strides = [1, 1]} : vector<2x96xf32> to vector<2x32xf32>
    %355 = vector.extract_strided_slice %352 {offsets = [0, 64], sizes = [2, 32], strides = [1, 1]} : vector<2x96xf32> to vector<2x32xf32>
    %356 = vector.extract_strided_slice %342 {offsets = [0, 96], sizes = [2, 32], strides = [1, 1]} : vector<2x128xf32> to vector<2x32xf32>
    %357 = math.tanh %356 : vector<2x32xf32>
    %358 = arith.mulf %354, %334 : vector<2x32xf32>
    %359 = arith.mulf %353, %357 : vector<2x32xf32>
    %360 = arith.addf %358, %359 : vector<2x32xf32>
    %361 = math.tanh %360 : vector<2x32xf32>
    %362 = arith.mulf %355, %361 : vector<2x32xf32>
    %363 = vector.extract_strided_slice %346 {offsets = [0, 0], sizes = [2, 96], strides = [1, 1]} : vector<2x128xf32> to vector<2x96xf32>
    %364 = arith.negf %363 : vector<2x96xf32>
    %365 = math.exp %364 : vector<2x96xf32>
    %cst_102 = arith.constant 1.000000e+00 : f32
    %366 = vector.broadcast %cst_102 : f32 to vector<2x96xf32>
    %367 = arith.addf %366, %365 : vector<2x96xf32>
    %368 = arith.divf %366, %367 : vector<2x96xf32>
    %369 = vector.extract_strided_slice %368 {offsets = [0, 0], sizes = [2, 32], strides = [1, 1]} : vector<2x96xf32> to vector<2x32xf32>
    %370 = vector.extract_strided_slice %368 {offsets = [0, 32], sizes = [2, 32], strides = [1, 1]} : vector<2x96xf32> to vector<2x32xf32>
    %371 = vector.extract_strided_slice %368 {offsets = [0, 64], sizes = [2, 32], strides = [1, 1]} : vector<2x96xf32> to vector<2x32xf32>
    %372 = vector.extract_strided_slice %346 {offsets = [0, 96], sizes = [2, 32], strides = [1, 1]} : vector<2x128xf32> to vector<2x32xf32>
    %373 = math.tanh %372 : vector<2x32xf32>
    %374 = arith.mulf %370, %336 : vector<2x32xf32>
    %375 = arith.mulf %369, %373 : vector<2x32xf32>
    %376 = arith.addf %374, %375 : vector<2x32xf32>
    %377 = math.tanh %376 : vector<2x32xf32>
    %378 = arith.mulf %371, %377 : vector<2x32xf32>
    %c8_i32_103 = arith.constant 8 : i32
    %379 = arith.muli %arg0, %c8_i32_103 : i32
    %c6_i32_104 = arith.constant 6 : i32
    %380 = arith.addi %379, %c6_i32_104 : i32
    %c20_i32_105 = arith.constant 20 : i32
    %381 = arith.cmpi slt, %380, %c20_i32_105 : i32
    %c2_i32_106 = arith.constant 2 : i32
    %382 = arith.subi %c2_i32_106, %arg0 : i32
    %c8_i32_107 = arith.constant 8 : i32
    %383 = arith.muli %382, %c8_i32_107 : i32
    %c1_i32_108 = arith.constant 1 : i32
    %384 = arith.addi %383, %c1_i32_108 : i32
    %c20_i32_109 = arith.constant 20 : i32
    %385 = arith.cmpi slt, %384, %c20_i32_109 : i32
    %386 = arith.select %381, %362, %333 : vector<2x32xf32>
    %387 = arith.select %381, %360, %334 : vector<2x32xf32>
    %388 = arith.select %385, %378, %335 : vector<2x32xf32>
    %389 = arith.select %385, %376, %336 : vector<2x32xf32>
    %c12_110 = arith.constant 12 : index
    %c0_111 = arith.constant 0 : index
    %390 = vector.load %arg15[%c12_110, %c0_111] : memref<16x32xf32, #tpu.memory_space<vmem>>, vector<2x32xf32>
    tpu.vector_store %arg15[%c12_110, %c0_111], %386 {strides = array<i32>} : memref<16x32xf32, #tpu.memory_space<vmem>>, vector<2x32xf32>,
    %c2_112 = arith.constant 2 : index
    %c0_113 = arith.constant 0 : index
    %391 = vector.load %arg16[%c2_112, %c0_113] : memref<16x32xf32, #tpu.memory_space<vmem>>, vector<2x32xf32>
    tpu.vector_store %arg16[%c2_112, %c0_113], %388 {strides = array<i32>} : memref<16x32xf32, #tpu.memory_space<vmem>>, vector<2x32xf32>,
    %392 = vector.extract_strided_slice %8 {offsets = [14, 0], sizes = [2, 128], strides = [1, 1]} : vector<16x128xf32> to vector<2x128xf32>
    %393 = arith.truncf %386 : vector<2x32xf32> to vector<2x32xbf16>
    %cst_114 = arith.constant dense<0.000000e+00> : vector<2x128xf32>
    %394 = tpu.matmul %393, %15, %cst_114 {dimension_numbers = #tpu.dot_dimension_numbers<[1], [0], [0], [1], [0, 0, 1, 1], [], []>} : vector<2x32xbf16>, vector<32x128xbf16>, vector<2x128xf32> -> vector<2x128xf32>
    %395 = arith.addf %392, %394 : vector<2x128xf32>
    %396 = vector.extract_strided_slice %14 {offsets = [0, 0], sizes = [2, 128], strides = [1, 1]} : vector<16x128xf32> to vector<2x128xf32>
    %397 = arith.truncf %388 : vector<2x32xf32> to vector<2x32xbf16>
    %cst_115 = arith.constant dense<0.000000e+00> : vector<2x128xf32>
    %398 = tpu.matmul %397, %16, %cst_115 {dimension_numbers = #tpu.dot_dimension_numbers<[1], [0], [0], [1], [0, 0, 1, 1], [], []>} : vector<2x32xbf16>, vector<32x128xbf16>, vector<2x128xf32> -> vector<2x128xf32>
    %399 = arith.addf %396, %398 : vector<2x128xf32>
    %400 = vector.extract_strided_slice %395 {offsets = [0, 0], sizes = [2, 96], strides = [1, 1]} : vector<2x128xf32> to vector<2x96xf32>
    %401 = arith.negf %400 : vector<2x96xf32>
    %402 = math.exp %401 : vector<2x96xf32>
    %cst_116 = arith.constant 1.000000e+00 : f32
    %403 = vector.broadcast %cst_116 : f32 to vector<2x96xf32>
    %404 = arith.addf %403, %402 : vector<2x96xf32>
    %405 = arith.divf %403, %404 : vector<2x96xf32>
    %406 = vector.extract_strided_slice %405 {offsets = [0, 0], sizes = [2, 32], strides = [1, 1]} : vector<2x96xf32> to vector<2x32xf32>
    %407 = vector.extract_strided_slice %405 {offsets = [0, 32], sizes = [2, 32], strides = [1, 1]} : vector<2x96xf32> to vector<2x32xf32>
    %408 = vector.extract_strided_slice %405 {offsets = [0, 64], sizes = [2, 32], strides = [1, 1]} : vector<2x96xf32> to vector<2x32xf32>
    %409 = vector.extract_strided_slice %395 {offsets = [0, 96], sizes = [2, 32], strides = [1, 1]} : vector<2x128xf32> to vector<2x32xf32>
    %410 = math.tanh %409 : vector<2x32xf32>
    %411 = arith.mulf %407, %387 : vector<2x32xf32>
    %412 = arith.mulf %406, %410 : vector<2x32xf32>
    %413 = arith.addf %411, %412 : vector<2x32xf32>
    %414 = math.tanh %413 : vector<2x32xf32>
    %415 = arith.mulf %408, %414 : vector<2x32xf32>
    %416 = vector.extract_strided_slice %399 {offsets = [0, 0], sizes = [2, 96], strides = [1, 1]} : vector<2x128xf32> to vector<2x96xf32>
    %417 = arith.negf %416 : vector<2x96xf32>
    %418 = math.exp %417 : vector<2x96xf32>
    %cst_117 = arith.constant 1.000000e+00 : f32
    %419 = vector.broadcast %cst_117 : f32 to vector<2x96xf32>
    %420 = arith.addf %419, %418 : vector<2x96xf32>
    %421 = arith.divf %419, %420 : vector<2x96xf32>
    %422 = vector.extract_strided_slice %421 {offsets = [0, 0], sizes = [2, 32], strides = [1, 1]} : vector<2x96xf32> to vector<2x32xf32>
    %423 = vector.extract_strided_slice %421 {offsets = [0, 32], sizes = [2, 32], strides = [1, 1]} : vector<2x96xf32> to vector<2x32xf32>
    %424 = vector.extract_strided_slice %421 {offsets = [0, 64], sizes = [2, 32], strides = [1, 1]} : vector<2x96xf32> to vector<2x32xf32>
    %425 = vector.extract_strided_slice %399 {offsets = [0, 96], sizes = [2, 32], strides = [1, 1]} : vector<2x128xf32> to vector<2x32xf32>
    %426 = math.tanh %425 : vector<2x32xf32>
    %427 = arith.mulf %423, %389 : vector<2x32xf32>
    %428 = arith.mulf %422, %426 : vector<2x32xf32>
    %429 = arith.addf %427, %428 : vector<2x32xf32>
    %430 = math.tanh %429 : vector<2x32xf32>
    %431 = arith.mulf %424, %430 : vector<2x32xf32>
    %c8_i32_118 = arith.constant 8 : i32
    %432 = arith.muli %arg0, %c8_i32_118 : i32
    %c7_i32_119 = arith.constant 7 : i32
    %433 = arith.addi %432, %c7_i32_119 : i32
    %c20_i32_120 = arith.constant 20 : i32
    %434 = arith.cmpi slt, %433, %c20_i32_120 : i32
    %c2_i32_121 = arith.constant 2 : i32
    %435 = arith.subi %c2_i32_121, %arg0 : i32
    %c8_i32_122 = arith.constant 8 : i32
    %436 = arith.muli %435, %c8_i32_122 : i32
    %c0_i32_123 = arith.constant 0 : i32
    %437 = arith.addi %436, %c0_i32_123 : i32
    %c20_i32_124 = arith.constant 20 : i32
    %438 = arith.cmpi slt, %437, %c20_i32_124 : i32
    %439 = arith.select %434, %415, %386 : vector<2x32xf32>
    %440 = arith.select %434, %413, %387 : vector<2x32xf32>
    %441 = arith.select %438, %431, %388 : vector<2x32xf32>
    %442 = arith.select %438, %429, %389 : vector<2x32xf32>
    %c14_125 = arith.constant 14 : index
    %c0_126 = arith.constant 0 : index
    %443 = vector.load %arg15[%c14_125, %c0_126] : memref<16x32xf32, #tpu.memory_space<vmem>>, vector<2x32xf32>
    tpu.vector_store %arg15[%c14_125, %c0_126], %439 {strides = array<i32>} : memref<16x32xf32, #tpu.memory_space<vmem>>, vector<2x32xf32>,
    %c0_127 = arith.constant 0 : index
    %c0_128 = arith.constant 0 : index
    %444 = vector.load %arg16[%c0_127, %c0_128] : memref<16x32xf32, #tpu.memory_space<vmem>>, vector<2x32xf32>
    tpu.vector_store %arg16[%c0_127, %c0_128], %441 {strides = array<i32>} : memref<16x32xf32, #tpu.memory_space<vmem>>, vector<2x32xf32>,
    %c0_129 = arith.constant 0 : index
    %c0_130 = arith.constant 0 : index
    %445 = vector.load %arg11[%c0_129, %c0_130] : memref<2x32xf32, #tpu.memory_space<vmem>>, vector<2x32xf32>
    tpu.vector_store %arg11[%c0_129, %c0_130], %439 {strides = array<i32>} : memref<2x32xf32, #tpu.memory_space<vmem>>, vector<2x32xf32>,
    %c0_131 = arith.constant 0 : index
    %c0_132 = arith.constant 0 : index
    %446 = vector.load %arg12[%c0_131, %c0_132] : memref<2x32xf32, #tpu.memory_space<vmem>>, vector<2x32xf32>
    tpu.vector_store %arg12[%c0_131, %c0_132], %440 {strides = array<i32>} : memref<2x32xf32, #tpu.memory_space<vmem>>, vector<2x32xf32>,
    %c0_133 = arith.constant 0 : index
    %c0_134 = arith.constant 0 : index
    %447 = vector.load %arg13[%c0_133, %c0_134] : memref<2x32xf32, #tpu.memory_space<vmem>>, vector<2x32xf32>
    tpu.vector_store %arg13[%c0_133, %c0_134], %441 {strides = array<i32>} : memref<2x32xf32, #tpu.memory_space<vmem>>, vector<2x32xf32>,
    %c0_135 = arith.constant 0 : index
    %c0_136 = arith.constant 0 : index
    %448 = vector.load %arg14[%c0_135, %c0_136] : memref<2x32xf32, #tpu.memory_space<vmem>>, vector<2x32xf32>
    tpu.vector_store %arg14[%c0_135, %c0_136], %442 {strides = array<i32>} : memref<2x32xf32, #tpu.memory_space<vmem>>, vector<2x32xf32>,
    %c0_137 = arith.constant 0 : index
    %c0_138 = arith.constant 0 : index
    %449 = vector.load %arg15[%c0_137, %c0_138] : memref<16x32xf32, #tpu.memory_space<vmem>>, vector<16x32xf32>
    %450 = arith.truncf %449 : vector<16x32xf32> to vector<16x32xbf16>
    %c0_139 = arith.constant 0 : index
    %c0_140 = arith.constant 0 : index
    %451 = vector.load %arg9[%c0_139, %c0_140] : memref<16x32xbf16, #tpu.memory_space<vmem>>, vector<16x32xbf16>
    tpu.vector_store %arg9[%c0_139, %c0_140], %450 {strides = array<i32>} : memref<16x32xbf16, #tpu.memory_space<vmem>>, vector<16x32xbf16>,
    %c0_141 = arith.constant 0 : index
    %c0_142 = arith.constant 0 : index
    %452 = vector.load %arg16[%c0_141, %c0_142] : memref<16x32xf32, #tpu.memory_space<vmem>>, vector<16x32xf32>
    %453 = arith.truncf %452 : vector<16x32xf32> to vector<16x32xbf16>
    %c0_143 = arith.constant 0 : index
    %c0_144 = arith.constant 0 : index
    %454 = vector.load %arg10[%c0_143, %c0_144] : memref<16x32xbf16, #tpu.memory_space<vmem>>, vector<16x32xbf16>
    tpu.vector_store %arg10[%c0_143, %c0_144], %453 {strides = array<i32>} : memref<16x32xbf16, #tpu.memory_space<vmem>>, vector<16x32xbf16>,
    return
  }
  func.func @transform_0(%arg0: i32) -> (i32, i32) {
    %c0_i32 = arith.constant 0 : i32
    %c0_i32_0 = arith.constant 0 : i32
    return %arg0, %c0_i32 : i32, i32
  }
  func.func @transform_1(%arg0: i32) -> (i32, i32) {
    %c2_i32 = arith.constant 2 : i32
    %0 = arith.subi %c2_i32, %arg0 : i32
    %c0_i32 = arith.constant 0 : i32
    %c0_i32_0 = arith.constant 0 : i32
    return %0, %c0_i32 : i32, i32
  }
  func.func @transform_2(%arg0: i32) -> (i32, i32) {
    %c0_i32 = arith.constant 0 : i32
    %c0_i32_0 = arith.constant 0 : i32
    %c0_i32_1 = arith.constant 0 : i32
    return %c0_i32, %c0_i32_0 : i32, i32
  }
  func.func @transform_3(%arg0: i32) -> (i32, i32) {
    %c0_i32 = arith.constant 0 : i32
    %c0_i32_0 = arith.constant 0 : i32
    %c0_i32_1 = arith.constant 0 : i32
    return %c0_i32, %c0_i32_0 : i32, i32
  }
  func.func @transform_4(%arg0: i32) -> (i32, i32) {
    %c0_i32 = arith.constant 0 : i32
    %c0_i32_0 = arith.constant 0 : i32
    %c0_i32_1 = arith.constant 0 : i32
    return %c0_i32, %c0_i32_0 : i32, i32
  }
  func.func @transform_5(%arg0: i32) -> (i32, i32) {
    %c0_i32 = arith.constant 0 : i32
    %c0_i32_0 = arith.constant 0 : i32
    %c0_i32_1 = arith.constant 0 : i32
    return %c0_i32, %c0_i32_0 : i32, i32
  }
  func.func @transform_6(%arg0: i32) -> (i32, i32) {
    %c0_i32 = arith.constant 0 : i32
    %c0_i32_0 = arith.constant 0 : i32
    %c0_i32_1 = arith.constant 0 : i32
    return %c0_i32, %c0_i32_0 : i32, i32
  }
  func.func @transform_7(%arg0: i32) -> (i32, i32) {
    %c0_i32 = arith.constant 0 : i32
    %c0_i32_0 = arith.constant 0 : i32
    %c0_i32_1 = arith.constant 0 : i32
    return %c0_i32, %c0_i32_0 : i32, i32
  }
  func.func @transform_8(%arg0: i32) -> (i32, i32) {
    %c0_i32 = arith.constant 0 : i32
    %c0_i32_0 = arith.constant 0 : i32
    return %arg0, %c0_i32 : i32, i32
  }
  func.func @transform_9(%arg0: i32) -> (i32, i32) {
    %c2_i32 = arith.constant 2 : i32
    %0 = arith.subi %c2_i32, %arg0 : i32
    %c0_i32 = arith.constant 0 : i32
    %c0_i32_0 = arith.constant 0 : i32
    return %0, %c0_i32 : i32, i32
  }
  func.func @transform_10(%arg0: i32) -> (i32, i32) {
    %c0_i32 = arith.constant 0 : i32
    %c0_i32_0 = arith.constant 0 : i32
    %c0_i32_1 = arith.constant 0 : i32
    return %c0_i32, %c0_i32_0 : i32, i32
  }
  func.func @transform_11(%arg0: i32) -> (i32, i32) {
    %c0_i32 = arith.constant 0 : i32
    %c0_i32_0 = arith.constant 0 : i32
    %c0_i32_1 = arith.constant 0 : i32
    return %c0_i32, %c0_i32_0 : i32, i32
  }
  func.func @transform_12(%arg0: i32) -> (i32, i32) {
    %c0_i32 = arith.constant 0 : i32
    %c0_i32_0 = arith.constant 0 : i32
    %c0_i32_1 = arith.constant 0 : i32
    return %c0_i32, %c0_i32_0 : i32, i32
  }
  func.func @transform_13(%arg0: i32) -> (i32, i32) {
    %c0_i32 = arith.constant 0 : i32
    %c0_i32_0 = arith.constant 0 : i32
    %c0_i32_1 = arith.constant 0 : i32
    return %c0_i32, %c0_i32_0 : i32, i32
  }
}

module attributes {stable_mosaic.version = 11 : i64} {
  func.func @kernel(%arg0: i32, %arg1: memref<16x32xbf16, #tpu.memory_space<vmem>>, %arg2: memref<16x32xbf16, #tpu.memory_space<vmem>>, %arg3: memref<16x32xbf16, #tpu.memory_space<vmem>>, %arg4: memref<16x32xbf16, #tpu.memory_space<vmem>>, %arg5: memref<32x128xbf16, #tpu.memory_space<vmem>>, %arg6: memref<32x128xbf16, #tpu.memory_space<vmem>>, %arg7: memref<32x128xbf16, #tpu.memory_space<vmem>>, %arg8: memref<32x128xbf16, #tpu.memory_space<vmem>>, %arg9: memref<32x128xbf16, #tpu.memory_space<vmem>>, %arg10: memref<32x128xbf16, #tpu.memory_space<vmem>>, %arg11: memref<1x128xf32, #tpu.memory_space<vmem>>, %arg12: memref<1x128xf32, #tpu.memory_space<vmem>>, %arg13: memref<2x32xf32, #tpu.memory_space<vmem>>, %arg14: memref<2x32xf32, #tpu.memory_space<vmem>>, %arg15: memref<2x32xf32, #tpu.memory_space<vmem>>, %arg16: memref<2x32xf32, #tpu.memory_space<vmem>>) attributes {dimension_semantics = [#tpu.dimension_semantics<arbitrary>], iteration_bounds = array<i64: 3>, scalar_prefetch = 0 : i64, scratch_operands = 0 : i64, tpu.core_type = #tpu.core_type<tc>, window_params = [{transform_indices = @transform_0, window_bounds = array<i64: 16, 32>}, {transform_indices = @transform_1, window_bounds = array<i64: 16, 32>}, {transform_indices = @transform_2, window_bounds = array<i64: 16, 32>}, {transform_indices = @transform_3, window_bounds = array<i64: 16, 32>}, {pipeline_mode = #tpu.pipeline_mode<synchronous>, transform_indices = @transform_4, window_bounds = array<i64: 32, 128>}, {pipeline_mode = #tpu.pipeline_mode<synchronous>, transform_indices = @transform_5, window_bounds = array<i64: 32, 128>}, {pipeline_mode = #tpu.pipeline_mode<synchronous>, transform_indices = @transform_6, window_bounds = array<i64: 32, 128>}, {pipeline_mode = #tpu.pipeline_mode<synchronous>, transform_indices = @transform_7, window_bounds = array<i64: 32, 128>}, {pipeline_mode = #tpu.pipeline_mode<synchronous>, transform_indices = @transform_8, window_bounds = array<i64: 32, 128>}, {pipeline_mode = #tpu.pipeline_mode<synchronous>, transform_indices = @transform_9, window_bounds = array<i64: 32, 128>}, {pipeline_mode = #tpu.pipeline_mode<synchronous>, transform_indices = @transform_10, window_bounds = array<i64: 1, 128>}, {pipeline_mode = #tpu.pipeline_mode<synchronous>, transform_indices = @transform_11, window_bounds = array<i64: 1, 128>}, {pipeline_mode = #tpu.pipeline_mode<synchronous>, transform_indices = @transform_12, window_bounds = array<i64: 2, 32>}, {pipeline_mode = #tpu.pipeline_mode<synchronous>, transform_indices = @transform_13, window_bounds = array<i64: 2, 32>}, {pipeline_mode = #tpu.pipeline_mode<synchronous>, transform_indices = @transform_14, window_bounds = array<i64: 2, 32>}, {pipeline_mode = #tpu.pipeline_mode<synchronous>, transform_indices = @transform_15, window_bounds = array<i64: 2, 32>}]} {
    %c0_i32 = arith.constant 0 : i32
    %0 = arith.cmpi eq, %arg0, %c0_i32 : i32
    %1 = arith.extui %0 : i1 to i32
    %c0_i32_0 = arith.constant 0 : i32
    %2 = arith.cmpi ne, %1, %c0_i32_0 : i32
    scf.if %2 {
      %cst_122 = arith.constant 0.000000e+00 : f32
      %441 = vector.broadcast %cst_122 : f32 to vector<2x32xf32>
      %c0_123 = arith.constant 0 : index
      %c0_124 = arith.constant 0 : index
      %442 = vector.load %arg13[%c0_123, %c0_124] : memref<2x32xf32, #tpu.memory_space<vmem>>, vector<2x32xf32>
      tpu.vector_store %arg13[%c0_123, %c0_124], %441 {strides = array<i32>} : memref<2x32xf32, #tpu.memory_space<vmem>>, vector<2x32xf32>,
      %cst_125 = arith.constant 0.000000e+00 : f32
      %443 = vector.broadcast %cst_125 : f32 to vector<2x32xf32>
      %c0_126 = arith.constant 0 : index
      %c0_127 = arith.constant 0 : index
      %444 = vector.load %arg14[%c0_126, %c0_127] : memref<2x32xf32, #tpu.memory_space<vmem>>, vector<2x32xf32>
      tpu.vector_store %arg14[%c0_126, %c0_127], %443 {strides = array<i32>} : memref<2x32xf32, #tpu.memory_space<vmem>>, vector<2x32xf32>,
      %cst_128 = arith.constant 0.000000e+00 : f32
      %445 = vector.broadcast %cst_128 : f32 to vector<2x32xf32>
      %c0_129 = arith.constant 0 : index
      %c0_130 = arith.constant 0 : index
      %446 = vector.load %arg15[%c0_129, %c0_130] : memref<2x32xf32, #tpu.memory_space<vmem>>, vector<2x32xf32>
      tpu.vector_store %arg15[%c0_129, %c0_130], %445 {strides = array<i32>} : memref<2x32xf32, #tpu.memory_space<vmem>>, vector<2x32xf32>,
      %cst_131 = arith.constant 0.000000e+00 : f32
      %447 = vector.broadcast %cst_131 : f32 to vector<2x32xf32>
      %c0_132 = arith.constant 0 : index
      %c0_133 = arith.constant 0 : index
      %448 = vector.load %arg16[%c0_132, %c0_133] : memref<2x32xf32, #tpu.memory_space<vmem>>, vector<2x32xf32>
      tpu.vector_store %arg16[%c0_132, %c0_133], %447 {strides = array<i32>} : memref<2x32xf32, #tpu.memory_space<vmem>>, vector<2x32xf32>,
    } else {
    }
    %c0 = arith.constant 0 : index
    %c0_1 = arith.constant 0 : index
    %3 = vector.load %arg1[%c0, %c0_1] : memref<16x32xbf16, #tpu.memory_space<vmem>>, vector<16x32xbf16>
    %c0_2 = arith.constant 0 : index
    %c0_3 = arith.constant 0 : index
    %4 = vector.load %arg5[%c0_2, %c0_3] : memref<32x128xbf16, #tpu.memory_space<vmem>>, vector<32x128xbf16>
    %cst = arith.constant dense<0.000000e+00> : vector<16x128xf32>
    %5 = tpu.matmul %3, %4, %cst {dimension_numbers = #tpu.dot_dimension_numbers<[1], [0], [0], [1], [0, 0, 1, 1], [], []>} : vector<16x32xbf16>, vector<32x128xbf16>, vector<16x128xf32> -> vector<16x128xf32>
    %c0_4 = arith.constant 0 : index
    %c0_5 = arith.constant 0 : index
    %6 = vector.load %arg2[%c0_4, %c0_5] : memref<16x32xbf16, #tpu.memory_space<vmem>>, vector<16x32xbf16>
    %c0_6 = arith.constant 0 : index
    %c0_7 = arith.constant 0 : index
    %7 = vector.load %arg6[%c0_6, %c0_7] : memref<32x128xbf16, #tpu.memory_space<vmem>>, vector<32x128xbf16>
    %cst_8 = arith.constant dense<0.000000e+00> : vector<16x128xf32>
    %8 = tpu.matmul %6, %7, %cst_8 {dimension_numbers = #tpu.dot_dimension_numbers<[1], [0], [0], [1], [0, 0, 1, 1], [], []>} : vector<16x32xbf16>, vector<32x128xbf16>, vector<16x128xf32> -> vector<16x128xf32>
    %9 = arith.addf %5, %8 : vector<16x128xf32>
    %c0_9 = arith.constant 0 : index
    %c0_10 = arith.constant 0 : index
    %10 = vector.load %arg11[%c0_9, %c0_10] : memref<1x128xf32, #tpu.memory_space<vmem>>, vector<1x128xf32>
    %11 = vector.broadcast %10 : vector<1x128xf32> to vector<16x128xf32>
    %12 = arith.addf %9, %11 : vector<16x128xf32>
    %c0_11 = arith.constant 0 : index
    %c0_12 = arith.constant 0 : index
    %13 = vector.load %arg3[%c0_11, %c0_12] : memref<16x32xbf16, #tpu.memory_space<vmem>>, vector<16x32xbf16>
    %c0_13 = arith.constant 0 : index
    %c0_14 = arith.constant 0 : index
    %14 = vector.load %arg7[%c0_13, %c0_14] : memref<32x128xbf16, #tpu.memory_space<vmem>>, vector<32x128xbf16>
    %cst_15 = arith.constant dense<0.000000e+00> : vector<16x128xf32>
    %15 = tpu.matmul %13, %14, %cst_15 {dimension_numbers = #tpu.dot_dimension_numbers<[1], [0], [0], [1], [0, 0, 1, 1], [], []>} : vector<16x32xbf16>, vector<32x128xbf16>, vector<16x128xf32> -> vector<16x128xf32>
    %c0_16 = arith.constant 0 : index
    %c0_17 = arith.constant 0 : index
    %16 = vector.load %arg4[%c0_16, %c0_17] : memref<16x32xbf16, #tpu.memory_space<vmem>>, vector<16x32xbf16>
    %c0_18 = arith.constant 0 : index
    %c0_19 = arith.constant 0 : index
    %17 = vector.load %arg8[%c0_18, %c0_19] : memref<32x128xbf16, #tpu.memory_space<vmem>>, vector<32x128xbf16>
    %cst_20 = arith.constant dense<0.000000e+00> : vector<16x128xf32>
    %18 = tpu.matmul %16, %17, %cst_20 {dimension_numbers = #tpu.dot_dimension_numbers<[1], [0], [0], [1], [0, 0, 1, 1], [], []>} : vector<16x32xbf16>, vector<32x128xbf16>, vector<16x128xf32> -> vector<16x128xf32>
    %19 = arith.addf %15, %18 : vector<16x128xf32>
    %c0_21 = arith.constant 0 : index
    %c0_22 = arith.constant 0 : index
    %20 = vector.load %arg12[%c0_21, %c0_22] : memref<1x128xf32, #tpu.memory_space<vmem>>, vector<1x128xf32>
    %21 = vector.broadcast %20 : vector<1x128xf32> to vector<16x128xf32>
    %22 = arith.addf %19, %21 : vector<16x128xf32>
    %c0_23 = arith.constant 0 : index
    %c0_24 = arith.constant 0 : index
    %23 = vector.load %arg9[%c0_23, %c0_24] : memref<32x128xbf16, #tpu.memory_space<vmem>>, vector<32x128xbf16>
    %c0_25 = arith.constant 0 : index
    %c0_26 = arith.constant 0 : index
    %24 = vector.load %arg10[%c0_25, %c0_26] : memref<32x128xbf16, #tpu.memory_space<vmem>>, vector<32x128xbf16>
    %c0_27 = arith.constant 0 : index
    %c0_28 = arith.constant 0 : index
    %25 = vector.load %arg13[%c0_27, %c0_28] : memref<2x32xf32, #tpu.memory_space<vmem>>, vector<2x32xf32>
    %c0_29 = arith.constant 0 : index
    %c0_30 = arith.constant 0 : index
    %26 = vector.load %arg14[%c0_29, %c0_30] : memref<2x32xf32, #tpu.memory_space<vmem>>, vector<2x32xf32>
    %c0_31 = arith.constant 0 : index
    %c0_32 = arith.constant 0 : index
    %27 = vector.load %arg15[%c0_31, %c0_32] : memref<2x32xf32, #tpu.memory_space<vmem>>, vector<2x32xf32>
    %c0_33 = arith.constant 0 : index
    %c0_34 = arith.constant 0 : index
    %28 = vector.load %arg16[%c0_33, %c0_34] : memref<2x32xf32, #tpu.memory_space<vmem>>, vector<2x32xf32>
    %29 = vector.extract_strided_slice %12 {offsets = [0, 0], sizes = [2, 128], strides = [1, 1]} : vector<16x128xf32> to vector<2x128xf32>
    %30 = arith.truncf %25 : vector<2x32xf32> to vector<2x32xbf16>
    %cst_35 = arith.constant dense<0.000000e+00> : vector<2x128xf32>
    %31 = tpu.matmul %30, %23, %cst_35 {dimension_numbers = #tpu.dot_dimension_numbers<[1], [0], [0], [1], [0, 0, 1, 1], [], []>} : vector<2x32xbf16>, vector<32x128xbf16>, vector<2x128xf32> -> vector<2x128xf32>
    %32 = arith.addf %29, %31 : vector<2x128xf32>
    %33 = vector.extract_strided_slice %22 {offsets = [14, 0], sizes = [2, 128], strides = [1, 1]} : vector<16x128xf32> to vector<2x128xf32>
    %34 = arith.truncf %27 : vector<2x32xf32> to vector<2x32xbf16>
    %cst_36 = arith.constant dense<0.000000e+00> : vector<2x128xf32>
    %35 = tpu.matmul %34, %24, %cst_36 {dimension_numbers = #tpu.dot_dimension_numbers<[1], [0], [0], [1], [0, 0, 1, 1], [], []>} : vector<2x32xbf16>, vector<32x128xbf16>, vector<2x128xf32> -> vector<2x128xf32>
    %36 = arith.addf %33, %35 : vector<2x128xf32>
    %37 = vector.extract_strided_slice %32 {offsets = [0, 0], sizes = [2, 96], strides = [1, 1]} : vector<2x128xf32> to vector<2x96xf32>
    %38 = arith.negf %37 : vector<2x96xf32>
    %39 = math.exp %38 : vector<2x96xf32>
    %cst_37 = arith.constant 1.000000e+00 : f32
    %40 = vector.broadcast %cst_37 : f32 to vector<2x96xf32>
    %41 = arith.addf %40, %39 : vector<2x96xf32>
    %42 = arith.divf %40, %41 : vector<2x96xf32>
    %43 = vector.extract_strided_slice %42 {offsets = [0, 0], sizes = [2, 32], strides = [1, 1]} : vector<2x96xf32> to vector<2x32xf32>
    %44 = vector.extract_strided_slice %42 {offsets = [0, 32], sizes = [2, 32], strides = [1, 1]} : vector<2x96xf32> to vector<2x32xf32>
    %45 = vector.extract_strided_slice %42 {offsets = [0, 64], sizes = [2, 32], strides = [1, 1]} : vector<2x96xf32> to vector<2x32xf32>
    %46 = vector.extract_strided_slice %32 {offsets = [0, 96], sizes = [2, 32], strides = [1, 1]} : vector<2x128xf32> to vector<2x32xf32>
    %47 = math.tanh %46 : vector<2x32xf32>
    %48 = arith.mulf %44, %26 : vector<2x32xf32>
    %49 = arith.mulf %43, %47 : vector<2x32xf32>
    %50 = arith.addf %48, %49 : vector<2x32xf32>
    %51 = math.tanh %50 : vector<2x32xf32>
    %52 = arith.mulf %45, %51 : vector<2x32xf32>
    %53 = vector.extract_strided_slice %36 {offsets = [0, 0], sizes = [2, 96], strides = [1, 1]} : vector<2x128xf32> to vector<2x96xf32>
    %54 = arith.negf %53 : vector<2x96xf32>
    %55 = math.exp %54 : vector<2x96xf32>
    %cst_38 = arith.constant 1.000000e+00 : f32
    %56 = vector.broadcast %cst_38 : f32 to vector<2x96xf32>
    %57 = arith.addf %56, %55 : vector<2x96xf32>
    %58 = arith.divf %56, %57 : vector<2x96xf32>
    %59 = vector.extract_strided_slice %58 {offsets = [0, 0], sizes = [2, 32], strides = [1, 1]} : vector<2x96xf32> to vector<2x32xf32>
    %60 = vector.extract_strided_slice %58 {offsets = [0, 32], sizes = [2, 32], strides = [1, 1]} : vector<2x96xf32> to vector<2x32xf32>
    %61 = vector.extract_strided_slice %58 {offsets = [0, 64], sizes = [2, 32], strides = [1, 1]} : vector<2x96xf32> to vector<2x32xf32>
    %62 = vector.extract_strided_slice %36 {offsets = [0, 96], sizes = [2, 32], strides = [1, 1]} : vector<2x128xf32> to vector<2x32xf32>
    %63 = math.tanh %62 : vector<2x32xf32>
    %64 = arith.mulf %60, %28 : vector<2x32xf32>
    %65 = arith.mulf %59, %63 : vector<2x32xf32>
    %66 = arith.addf %64, %65 : vector<2x32xf32>
    %67 = math.tanh %66 : vector<2x32xf32>
    %68 = arith.mulf %61, %67 : vector<2x32xf32>
    %c8_i32 = arith.constant 8 : i32
    %69 = arith.muli %arg0, %c8_i32 : i32
    %c0_i32_39 = arith.constant 0 : i32
    %70 = arith.addi %69, %c0_i32_39 : i32
    %c20_i32 = arith.constant 20 : i32
    %71 = arith.cmpi slt, %70, %c20_i32 : i32
    %c2_i32 = arith.constant 2 : i32
    %72 = arith.subi %c2_i32, %arg0 : i32
    %c8_i32_40 = arith.constant 8 : i32
    %73 = arith.muli %72, %c8_i32_40 : i32
    %c7_i32 = arith.constant 7 : i32
    %74 = arith.addi %73, %c7_i32 : i32
    %c20_i32_41 = arith.constant 20 : i32
    %75 = arith.cmpi slt, %74, %c20_i32_41 : i32
    %76 = arith.select %71, %52, %25 : vector<2x32xf32>
    %77 = arith.select %71, %50, %26 : vector<2x32xf32>
    %78 = arith.select %75, %68, %27 : vector<2x32xf32>
    %79 = arith.select %75, %66, %28 : vector<2x32xf32>
    %80 = vector.extract_strided_slice %12 {offsets = [2, 0], sizes = [2, 128], strides = [1, 1]} : vector<16x128xf32> to vector<2x128xf32>
    %81 = arith.truncf %76 : vector<2x32xf32> to vector<2x32xbf16>
    %cst_42 = arith.constant dense<0.000000e+00> : vector<2x128xf32>
    %82 = tpu.matmul %81, %23, %cst_42 {dimension_numbers = #tpu.dot_dimension_numbers<[1], [0], [0], [1], [0, 0, 1, 1], [], []>} : vector<2x32xbf16>, vector<32x128xbf16>, vector<2x128xf32> -> vector<2x128xf32>
    %83 = arith.addf %80, %82 : vector<2x128xf32>
    %84 = vector.extract_strided_slice %22 {offsets = [12, 0], sizes = [2, 128], strides = [1, 1]} : vector<16x128xf32> to vector<2x128xf32>
    %85 = arith.truncf %78 : vector<2x32xf32> to vector<2x32xbf16>
    %cst_43 = arith.constant dense<0.000000e+00> : vector<2x128xf32>
    %86 = tpu.matmul %85, %24, %cst_43 {dimension_numbers = #tpu.dot_dimension_numbers<[1], [0], [0], [1], [0, 0, 1, 1], [], []>} : vector<2x32xbf16>, vector<32x128xbf16>, vector<2x128xf32> -> vector<2x128xf32>
    %87 = arith.addf %84, %86 : vector<2x128xf32>
    %88 = vector.extract_strided_slice %83 {offsets = [0, 0], sizes = [2, 96], strides = [1, 1]} : vector<2x128xf32> to vector<2x96xf32>
    %89 = arith.negf %88 : vector<2x96xf32>
    %90 = math.exp %89 : vector<2x96xf32>
    %cst_44 = arith.constant 1.000000e+00 : f32
    %91 = vector.broadcast %cst_44 : f32 to vector<2x96xf32>
    %92 = arith.addf %91, %90 : vector<2x96xf32>
    %93 = arith.divf %91, %92 : vector<2x96xf32>
    %94 = vector.extract_strided_slice %93 {offsets = [0, 0], sizes = [2, 32], strides = [1, 1]} : vector<2x96xf32> to vector<2x32xf32>
    %95 = vector.extract_strided_slice %93 {offsets = [0, 32], sizes = [2, 32], strides = [1, 1]} : vector<2x96xf32> to vector<2x32xf32>
    %96 = vector.extract_strided_slice %93 {offsets = [0, 64], sizes = [2, 32], strides = [1, 1]} : vector<2x96xf32> to vector<2x32xf32>
    %97 = vector.extract_strided_slice %83 {offsets = [0, 96], sizes = [2, 32], strides = [1, 1]} : vector<2x128xf32> to vector<2x32xf32>
    %98 = math.tanh %97 : vector<2x32xf32>
    %99 = arith.mulf %95, %77 : vector<2x32xf32>
    %100 = arith.mulf %94, %98 : vector<2x32xf32>
    %101 = arith.addf %99, %100 : vector<2x32xf32>
    %102 = math.tanh %101 : vector<2x32xf32>
    %103 = arith.mulf %96, %102 : vector<2x32xf32>
    %104 = vector.extract_strided_slice %87 {offsets = [0, 0], sizes = [2, 96], strides = [1, 1]} : vector<2x128xf32> to vector<2x96xf32>
    %105 = arith.negf %104 : vector<2x96xf32>
    %106 = math.exp %105 : vector<2x96xf32>
    %cst_45 = arith.constant 1.000000e+00 : f32
    %107 = vector.broadcast %cst_45 : f32 to vector<2x96xf32>
    %108 = arith.addf %107, %106 : vector<2x96xf32>
    %109 = arith.divf %107, %108 : vector<2x96xf32>
    %110 = vector.extract_strided_slice %109 {offsets = [0, 0], sizes = [2, 32], strides = [1, 1]} : vector<2x96xf32> to vector<2x32xf32>
    %111 = vector.extract_strided_slice %109 {offsets = [0, 32], sizes = [2, 32], strides = [1, 1]} : vector<2x96xf32> to vector<2x32xf32>
    %112 = vector.extract_strided_slice %109 {offsets = [0, 64], sizes = [2, 32], strides = [1, 1]} : vector<2x96xf32> to vector<2x32xf32>
    %113 = vector.extract_strided_slice %87 {offsets = [0, 96], sizes = [2, 32], strides = [1, 1]} : vector<2x128xf32> to vector<2x32xf32>
    %114 = math.tanh %113 : vector<2x32xf32>
    %115 = arith.mulf %111, %79 : vector<2x32xf32>
    %116 = arith.mulf %110, %114 : vector<2x32xf32>
    %117 = arith.addf %115, %116 : vector<2x32xf32>
    %118 = math.tanh %117 : vector<2x32xf32>
    %119 = arith.mulf %112, %118 : vector<2x32xf32>
    %c8_i32_46 = arith.constant 8 : i32
    %120 = arith.muli %arg0, %c8_i32_46 : i32
    %c1_i32 = arith.constant 1 : i32
    %121 = arith.addi %120, %c1_i32 : i32
    %c20_i32_47 = arith.constant 20 : i32
    %122 = arith.cmpi slt, %121, %c20_i32_47 : i32
    %c2_i32_48 = arith.constant 2 : i32
    %123 = arith.subi %c2_i32_48, %arg0 : i32
    %c8_i32_49 = arith.constant 8 : i32
    %124 = arith.muli %123, %c8_i32_49 : i32
    %c6_i32 = arith.constant 6 : i32
    %125 = arith.addi %124, %c6_i32 : i32
    %c20_i32_50 = arith.constant 20 : i32
    %126 = arith.cmpi slt, %125, %c20_i32_50 : i32
    %127 = arith.select %122, %103, %76 : vector<2x32xf32>
    %128 = arith.select %122, %101, %77 : vector<2x32xf32>
    %129 = arith.select %126, %119, %78 : vector<2x32xf32>
    %130 = arith.select %126, %117, %79 : vector<2x32xf32>
    %131 = vector.extract_strided_slice %12 {offsets = [4, 0], sizes = [2, 128], strides = [1, 1]} : vector<16x128xf32> to vector<2x128xf32>
    %132 = arith.truncf %127 : vector<2x32xf32> to vector<2x32xbf16>
    %cst_51 = arith.constant dense<0.000000e+00> : vector<2x128xf32>
    %133 = tpu.matmul %132, %23, %cst_51 {dimension_numbers = #tpu.dot_dimension_numbers<[1], [0], [0], [1], [0, 0, 1, 1], [], []>} : vector<2x32xbf16>, vector<32x128xbf16>, vector<2x128xf32> -> vector<2x128xf32>
    %134 = arith.addf %131, %133 : vector<2x128xf32>
    %135 = vector.extract_strided_slice %22 {offsets = [10, 0], sizes = [2, 128], strides = [1, 1]} : vector<16x128xf32> to vector<2x128xf32>
    %136 = arith.truncf %129 : vector<2x32xf32> to vector<2x32xbf16>
    %cst_52 = arith.constant dense<0.000000e+00> : vector<2x128xf32>
    %137 = tpu.matmul %136, %24, %cst_52 {dimension_numbers = #tpu.dot_dimension_numbers<[1], [0], [0], [1], [0, 0, 1, 1], [], []>} : vector<2x32xbf16>, vector<32x128xbf16>, vector<2x128xf32> -> vector<2x128xf32>
    %138 = arith.addf %135, %137 : vector<2x128xf32>
    %139 = vector.extract_strided_slice %134 {offsets = [0, 0], sizes = [2, 96], strides = [1, 1]} : vector<2x128xf32> to vector<2x96xf32>
    %140 = arith.negf %139 : vector<2x96xf32>
    %141 = math.exp %140 : vector<2x96xf32>
    %cst_53 = arith.constant 1.000000e+00 : f32
    %142 = vector.broadcast %cst_53 : f32 to vector<2x96xf32>
    %143 = arith.addf %142, %141 : vector<2x96xf32>
    %144 = arith.divf %142, %143 : vector<2x96xf32>
    %145 = vector.extract_strided_slice %144 {offsets = [0, 0], sizes = [2, 32], strides = [1, 1]} : vector<2x96xf32> to vector<2x32xf32>
    %146 = vector.extract_strided_slice %144 {offsets = [0, 32], sizes = [2, 32], strides = [1, 1]} : vector<2x96xf32> to vector<2x32xf32>
    %147 = vector.extract_strided_slice %144 {offsets = [0, 64], sizes = [2, 32], strides = [1, 1]} : vector<2x96xf32> to vector<2x32xf32>
    %148 = vector.extract_strided_slice %134 {offsets = [0, 96], sizes = [2, 32], strides = [1, 1]} : vector<2x128xf32> to vector<2x32xf32>
    %149 = math.tanh %148 : vector<2x32xf32>
    %150 = arith.mulf %146, %128 : vector<2x32xf32>
    %151 = arith.mulf %145, %149 : vector<2x32xf32>
    %152 = arith.addf %150, %151 : vector<2x32xf32>
    %153 = math.tanh %152 : vector<2x32xf32>
    %154 = arith.mulf %147, %153 : vector<2x32xf32>
    %155 = vector.extract_strided_slice %138 {offsets = [0, 0], sizes = [2, 96], strides = [1, 1]} : vector<2x128xf32> to vector<2x96xf32>
    %156 = arith.negf %155 : vector<2x96xf32>
    %157 = math.exp %156 : vector<2x96xf32>
    %cst_54 = arith.constant 1.000000e+00 : f32
    %158 = vector.broadcast %cst_54 : f32 to vector<2x96xf32>
    %159 = arith.addf %158, %157 : vector<2x96xf32>
    %160 = arith.divf %158, %159 : vector<2x96xf32>
    %161 = vector.extract_strided_slice %160 {offsets = [0, 0], sizes = [2, 32], strides = [1, 1]} : vector<2x96xf32> to vector<2x32xf32>
    %162 = vector.extract_strided_slice %160 {offsets = [0, 32], sizes = [2, 32], strides = [1, 1]} : vector<2x96xf32> to vector<2x32xf32>
    %163 = vector.extract_strided_slice %160 {offsets = [0, 64], sizes = [2, 32], strides = [1, 1]} : vector<2x96xf32> to vector<2x32xf32>
    %164 = vector.extract_strided_slice %138 {offsets = [0, 96], sizes = [2, 32], strides = [1, 1]} : vector<2x128xf32> to vector<2x32xf32>
    %165 = math.tanh %164 : vector<2x32xf32>
    %166 = arith.mulf %162, %130 : vector<2x32xf32>
    %167 = arith.mulf %161, %165 : vector<2x32xf32>
    %168 = arith.addf %166, %167 : vector<2x32xf32>
    %169 = math.tanh %168 : vector<2x32xf32>
    %170 = arith.mulf %163, %169 : vector<2x32xf32>
    %c8_i32_55 = arith.constant 8 : i32
    %171 = arith.muli %arg0, %c8_i32_55 : i32
    %c2_i32_56 = arith.constant 2 : i32
    %172 = arith.addi %171, %c2_i32_56 : i32
    %c20_i32_57 = arith.constant 20 : i32
    %173 = arith.cmpi slt, %172, %c20_i32_57 : i32
    %c2_i32_58 = arith.constant 2 : i32
    %174 = arith.subi %c2_i32_58, %arg0 : i32
    %c8_i32_59 = arith.constant 8 : i32
    %175 = arith.muli %174, %c8_i32_59 : i32
    %c5_i32 = arith.constant 5 : i32
    %176 = arith.addi %175, %c5_i32 : i32
    %c20_i32_60 = arith.constant 20 : i32
    %177 = arith.cmpi slt, %176, %c20_i32_60 : i32
    %178 = arith.select %173, %154, %127 : vector<2x32xf32>
    %179 = arith.select %173, %152, %128 : vector<2x32xf32>
    %180 = arith.select %177, %170, %129 : vector<2x32xf32>
    %181 = arith.select %177, %168, %130 : vector<2x32xf32>
    %182 = vector.extract_strided_slice %12 {offsets = [6, 0], sizes = [2, 128], strides = [1, 1]} : vector<16x128xf32> to vector<2x128xf32>
    %183 = arith.truncf %178 : vector<2x32xf32> to vector<2x32xbf16>
    %cst_61 = arith.constant dense<0.000000e+00> : vector<2x128xf32>
    %184 = tpu.matmul %183, %23, %cst_61 {dimension_numbers = #tpu.dot_dimension_numbers<[1], [0], [0], [1], [0, 0, 1, 1], [], []>} : vector<2x32xbf16>, vector<32x128xbf16>, vector<2x128xf32> -> vector<2x128xf32>
    %185 = arith.addf %182, %184 : vector<2x128xf32>
    %186 = vector.extract_strided_slice %22 {offsets = [8, 0], sizes = [2, 128], strides = [1, 1]} : vector<16x128xf32> to vector<2x128xf32>
    %187 = arith.truncf %180 : vector<2x32xf32> to vector<2x32xbf16>
    %cst_62 = arith.constant dense<0.000000e+00> : vector<2x128xf32>
    %188 = tpu.matmul %187, %24, %cst_62 {dimension_numbers = #tpu.dot_dimension_numbers<[1], [0], [0], [1], [0, 0, 1, 1], [], []>} : vector<2x32xbf16>, vector<32x128xbf16>, vector<2x128xf32> -> vector<2x128xf32>
    %189 = arith.addf %186, %188 : vector<2x128xf32>
    %190 = vector.extract_strided_slice %185 {offsets = [0, 0], sizes = [2, 96], strides = [1, 1]} : vector<2x128xf32> to vector<2x96xf32>
    %191 = arith.negf %190 : vector<2x96xf32>
    %192 = math.exp %191 : vector<2x96xf32>
    %cst_63 = arith.constant 1.000000e+00 : f32
    %193 = vector.broadcast %cst_63 : f32 to vector<2x96xf32>
    %194 = arith.addf %193, %192 : vector<2x96xf32>
    %195 = arith.divf %193, %194 : vector<2x96xf32>
    %196 = vector.extract_strided_slice %195 {offsets = [0, 0], sizes = [2, 32], strides = [1, 1]} : vector<2x96xf32> to vector<2x32xf32>
    %197 = vector.extract_strided_slice %195 {offsets = [0, 32], sizes = [2, 32], strides = [1, 1]} : vector<2x96xf32> to vector<2x32xf32>
    %198 = vector.extract_strided_slice %195 {offsets = [0, 64], sizes = [2, 32], strides = [1, 1]} : vector<2x96xf32> to vector<2x32xf32>
    %199 = vector.extract_strided_slice %185 {offsets = [0, 96], sizes = [2, 32], strides = [1, 1]} : vector<2x128xf32> to vector<2x32xf32>
    %200 = math.tanh %199 : vector<2x32xf32>
    %201 = arith.mulf %197, %179 : vector<2x32xf32>
    %202 = arith.mulf %196, %200 : vector<2x32xf32>
    %203 = arith.addf %201, %202 : vector<2x32xf32>
    %204 = math.tanh %203 : vector<2x32xf32>
    %205 = arith.mulf %198, %204 : vector<2x32xf32>
    %206 = vector.extract_strided_slice %189 {offsets = [0, 0], sizes = [2, 96], strides = [1, 1]} : vector<2x128xf32> to vector<2x96xf32>
    %207 = arith.negf %206 : vector<2x96xf32>
    %208 = math.exp %207 : vector<2x96xf32>
    %cst_64 = arith.constant 1.000000e+00 : f32
    %209 = vector.broadcast %cst_64 : f32 to vector<2x96xf32>
    %210 = arith.addf %209, %208 : vector<2x96xf32>
    %211 = arith.divf %209, %210 : vector<2x96xf32>
    %212 = vector.extract_strided_slice %211 {offsets = [0, 0], sizes = [2, 32], strides = [1, 1]} : vector<2x96xf32> to vector<2x32xf32>
    %213 = vector.extract_strided_slice %211 {offsets = [0, 32], sizes = [2, 32], strides = [1, 1]} : vector<2x96xf32> to vector<2x32xf32>
    %214 = vector.extract_strided_slice %211 {offsets = [0, 64], sizes = [2, 32], strides = [1, 1]} : vector<2x96xf32> to vector<2x32xf32>
    %215 = vector.extract_strided_slice %189 {offsets = [0, 96], sizes = [2, 32], strides = [1, 1]} : vector<2x128xf32> to vector<2x32xf32>
    %216 = math.tanh %215 : vector<2x32xf32>
    %217 = arith.mulf %213, %181 : vector<2x32xf32>
    %218 = arith.mulf %212, %216 : vector<2x32xf32>
    %219 = arith.addf %217, %218 : vector<2x32xf32>
    %220 = math.tanh %219 : vector<2x32xf32>
    %221 = arith.mulf %214, %220 : vector<2x32xf32>
    %c8_i32_65 = arith.constant 8 : i32
    %222 = arith.muli %arg0, %c8_i32_65 : i32
    %c3_i32 = arith.constant 3 : i32
    %223 = arith.addi %222, %c3_i32 : i32
    %c20_i32_66 = arith.constant 20 : i32
    %224 = arith.cmpi slt, %223, %c20_i32_66 : i32
    %c2_i32_67 = arith.constant 2 : i32
    %225 = arith.subi %c2_i32_67, %arg0 : i32
    %c8_i32_68 = arith.constant 8 : i32
    %226 = arith.muli %225, %c8_i32_68 : i32
    %c4_i32 = arith.constant 4 : i32
    %227 = arith.addi %226, %c4_i32 : i32
    %c20_i32_69 = arith.constant 20 : i32
    %228 = arith.cmpi slt, %227, %c20_i32_69 : i32
    %229 = arith.select %224, %205, %178 : vector<2x32xf32>
    %230 = arith.select %224, %203, %179 : vector<2x32xf32>
    %231 = arith.select %228, %221, %180 : vector<2x32xf32>
    %232 = arith.select %228, %219, %181 : vector<2x32xf32>
    %233 = vector.extract_strided_slice %12 {offsets = [8, 0], sizes = [2, 128], strides = [1, 1]} : vector<16x128xf32> to vector<2x128xf32>
    %234 = arith.truncf %229 : vector<2x32xf32> to vector<2x32xbf16>
    %cst_70 = arith.constant dense<0.000000e+00> : vector<2x128xf32>
    %235 = tpu.matmul %234, %23, %cst_70 {dimension_numbers = #tpu.dot_dimension_numbers<[1], [0], [0], [1], [0, 0, 1, 1], [], []>} : vector<2x32xbf16>, vector<32x128xbf16>, vector<2x128xf32> -> vector<2x128xf32>
    %236 = arith.addf %233, %235 : vector<2x128xf32>
    %237 = vector.extract_strided_slice %22 {offsets = [6, 0], sizes = [2, 128], strides = [1, 1]} : vector<16x128xf32> to vector<2x128xf32>
    %238 = arith.truncf %231 : vector<2x32xf32> to vector<2x32xbf16>
    %cst_71 = arith.constant dense<0.000000e+00> : vector<2x128xf32>
    %239 = tpu.matmul %238, %24, %cst_71 {dimension_numbers = #tpu.dot_dimension_numbers<[1], [0], [0], [1], [0, 0, 1, 1], [], []>} : vector<2x32xbf16>, vector<32x128xbf16>, vector<2x128xf32> -> vector<2x128xf32>
    %240 = arith.addf %237, %239 : vector<2x128xf32>
    %241 = vector.extract_strided_slice %236 {offsets = [0, 0], sizes = [2, 96], strides = [1, 1]} : vector<2x128xf32> to vector<2x96xf32>
    %242 = arith.negf %241 : vector<2x96xf32>
    %243 = math.exp %242 : vector<2x96xf32>
    %cst_72 = arith.constant 1.000000e+00 : f32
    %244 = vector.broadcast %cst_72 : f32 to vector<2x96xf32>
    %245 = arith.addf %244, %243 : vector<2x96xf32>
    %246 = arith.divf %244, %245 : vector<2x96xf32>
    %247 = vector.extract_strided_slice %246 {offsets = [0, 0], sizes = [2, 32], strides = [1, 1]} : vector<2x96xf32> to vector<2x32xf32>
    %248 = vector.extract_strided_slice %246 {offsets = [0, 32], sizes = [2, 32], strides = [1, 1]} : vector<2x96xf32> to vector<2x32xf32>
    %249 = vector.extract_strided_slice %246 {offsets = [0, 64], sizes = [2, 32], strides = [1, 1]} : vector<2x96xf32> to vector<2x32xf32>
    %250 = vector.extract_strided_slice %236 {offsets = [0, 96], sizes = [2, 32], strides = [1, 1]} : vector<2x128xf32> to vector<2x32xf32>
    %251 = math.tanh %250 : vector<2x32xf32>
    %252 = arith.mulf %248, %230 : vector<2x32xf32>
    %253 = arith.mulf %247, %251 : vector<2x32xf32>
    %254 = arith.addf %252, %253 : vector<2x32xf32>
    %255 = math.tanh %254 : vector<2x32xf32>
    %256 = arith.mulf %249, %255 : vector<2x32xf32>
    %257 = vector.extract_strided_slice %240 {offsets = [0, 0], sizes = [2, 96], strides = [1, 1]} : vector<2x128xf32> to vector<2x96xf32>
    %258 = arith.negf %257 : vector<2x96xf32>
    %259 = math.exp %258 : vector<2x96xf32>
    %cst_73 = arith.constant 1.000000e+00 : f32
    %260 = vector.broadcast %cst_73 : f32 to vector<2x96xf32>
    %261 = arith.addf %260, %259 : vector<2x96xf32>
    %262 = arith.divf %260, %261 : vector<2x96xf32>
    %263 = vector.extract_strided_slice %262 {offsets = [0, 0], sizes = [2, 32], strides = [1, 1]} : vector<2x96xf32> to vector<2x32xf32>
    %264 = vector.extract_strided_slice %262 {offsets = [0, 32], sizes = [2, 32], strides = [1, 1]} : vector<2x96xf32> to vector<2x32xf32>
    %265 = vector.extract_strided_slice %262 {offsets = [0, 64], sizes = [2, 32], strides = [1, 1]} : vector<2x96xf32> to vector<2x32xf32>
    %266 = vector.extract_strided_slice %240 {offsets = [0, 96], sizes = [2, 32], strides = [1, 1]} : vector<2x128xf32> to vector<2x32xf32>
    %267 = math.tanh %266 : vector<2x32xf32>
    %268 = arith.mulf %264, %232 : vector<2x32xf32>
    %269 = arith.mulf %263, %267 : vector<2x32xf32>
    %270 = arith.addf %268, %269 : vector<2x32xf32>
    %271 = math.tanh %270 : vector<2x32xf32>
    %272 = arith.mulf %265, %271 : vector<2x32xf32>
    %c8_i32_74 = arith.constant 8 : i32
    %273 = arith.muli %arg0, %c8_i32_74 : i32
    %c4_i32_75 = arith.constant 4 : i32
    %274 = arith.addi %273, %c4_i32_75 : i32
    %c20_i32_76 = arith.constant 20 : i32
    %275 = arith.cmpi slt, %274, %c20_i32_76 : i32
    %c2_i32_77 = arith.constant 2 : i32
    %276 = arith.subi %c2_i32_77, %arg0 : i32
    %c8_i32_78 = arith.constant 8 : i32
    %277 = arith.muli %276, %c8_i32_78 : i32
    %c3_i32_79 = arith.constant 3 : i32
    %278 = arith.addi %277, %c3_i32_79 : i32
    %c20_i32_80 = arith.constant 20 : i32
    %279 = arith.cmpi slt, %278, %c20_i32_80 : i32
    %280 = arith.select %275, %256, %229 : vector<2x32xf32>
    %281 = arith.select %275, %254, %230 : vector<2x32xf32>
    %282 = arith.select %279, %272, %231 : vector<2x32xf32>
    %283 = arith.select %279, %270, %232 : vector<2x32xf32>
    %284 = vector.extract_strided_slice %12 {offsets = [10, 0], sizes = [2, 128], strides = [1, 1]} : vector<16x128xf32> to vector<2x128xf32>
    %285 = arith.truncf %280 : vector<2x32xf32> to vector<2x32xbf16>
    %cst_81 = arith.constant dense<0.000000e+00> : vector<2x128xf32>
    %286 = tpu.matmul %285, %23, %cst_81 {dimension_numbers = #tpu.dot_dimension_numbers<[1], [0], [0], [1], [0, 0, 1, 1], [], []>} : vector<2x32xbf16>, vector<32x128xbf16>, vector<2x128xf32> -> vector<2x128xf32>
    %287 = arith.addf %284, %286 : vector<2x128xf32>
    %288 = vector.extract_strided_slice %22 {offsets = [4, 0], sizes = [2, 128], strides = [1, 1]} : vector<16x128xf32> to vector<2x128xf32>
    %289 = arith.truncf %282 : vector<2x32xf32> to vector<2x32xbf16>
    %cst_82 = arith.constant dense<0.000000e+00> : vector<2x128xf32>
    %290 = tpu.matmul %289, %24, %cst_82 {dimension_numbers = #tpu.dot_dimension_numbers<[1], [0], [0], [1], [0, 0, 1, 1], [], []>} : vector<2x32xbf16>, vector<32x128xbf16>, vector<2x128xf32> -> vector<2x128xf32>
    %291 = arith.addf %288, %290 : vector<2x128xf32>
    %292 = vector.extract_strided_slice %287 {offsets = [0, 0], sizes = [2, 96], strides = [1, 1]} : vector<2x128xf32> to vector<2x96xf32>
    %293 = arith.negf %292 : vector<2x96xf32>
    %294 = math.exp %293 : vector<2x96xf32>
    %cst_83 = arith.constant 1.000000e+00 : f32
    %295 = vector.broadcast %cst_83 : f32 to vector<2x96xf32>
    %296 = arith.addf %295, %294 : vector<2x96xf32>
    %297 = arith.divf %295, %296 : vector<2x96xf32>
    %298 = vector.extract_strided_slice %297 {offsets = [0, 0], sizes = [2, 32], strides = [1, 1]} : vector<2x96xf32> to vector<2x32xf32>
    %299 = vector.extract_strided_slice %297 {offsets = [0, 32], sizes = [2, 32], strides = [1, 1]} : vector<2x96xf32> to vector<2x32xf32>
    %300 = vector.extract_strided_slice %297 {offsets = [0, 64], sizes = [2, 32], strides = [1, 1]} : vector<2x96xf32> to vector<2x32xf32>
    %301 = vector.extract_strided_slice %287 {offsets = [0, 96], sizes = [2, 32], strides = [1, 1]} : vector<2x128xf32> to vector<2x32xf32>
    %302 = math.tanh %301 : vector<2x32xf32>
    %303 = arith.mulf %299, %281 : vector<2x32xf32>
    %304 = arith.mulf %298, %302 : vector<2x32xf32>
    %305 = arith.addf %303, %304 : vector<2x32xf32>
    %306 = math.tanh %305 : vector<2x32xf32>
    %307 = arith.mulf %300, %306 : vector<2x32xf32>
    %308 = vector.extract_strided_slice %291 {offsets = [0, 0], sizes = [2, 96], strides = [1, 1]} : vector<2x128xf32> to vector<2x96xf32>
    %309 = arith.negf %308 : vector<2x96xf32>
    %310 = math.exp %309 : vector<2x96xf32>
    %cst_84 = arith.constant 1.000000e+00 : f32
    %311 = vector.broadcast %cst_84 : f32 to vector<2x96xf32>
    %312 = arith.addf %311, %310 : vector<2x96xf32>
    %313 = arith.divf %311, %312 : vector<2x96xf32>
    %314 = vector.extract_strided_slice %313 {offsets = [0, 0], sizes = [2, 32], strides = [1, 1]} : vector<2x96xf32> to vector<2x32xf32>
    %315 = vector.extract_strided_slice %313 {offsets = [0, 32], sizes = [2, 32], strides = [1, 1]} : vector<2x96xf32> to vector<2x32xf32>
    %316 = vector.extract_strided_slice %313 {offsets = [0, 64], sizes = [2, 32], strides = [1, 1]} : vector<2x96xf32> to vector<2x32xf32>
    %317 = vector.extract_strided_slice %291 {offsets = [0, 96], sizes = [2, 32], strides = [1, 1]} : vector<2x128xf32> to vector<2x32xf32>
    %318 = math.tanh %317 : vector<2x32xf32>
    %319 = arith.mulf %315, %283 : vector<2x32xf32>
    %320 = arith.mulf %314, %318 : vector<2x32xf32>
    %321 = arith.addf %319, %320 : vector<2x32xf32>
    %322 = math.tanh %321 : vector<2x32xf32>
    %323 = arith.mulf %316, %322 : vector<2x32xf32>
    %c8_i32_85 = arith.constant 8 : i32
    %324 = arith.muli %arg0, %c8_i32_85 : i32
    %c5_i32_86 = arith.constant 5 : i32
    %325 = arith.addi %324, %c5_i32_86 : i32
    %c20_i32_87 = arith.constant 20 : i32
    %326 = arith.cmpi slt, %325, %c20_i32_87 : i32
    %c2_i32_88 = arith.constant 2 : i32
    %327 = arith.subi %c2_i32_88, %arg0 : i32
    %c8_i32_89 = arith.constant 8 : i32
    %328 = arith.muli %327, %c8_i32_89 : i32
    %c2_i32_90 = arith.constant 2 : i32
    %329 = arith.addi %328, %c2_i32_90 : i32
    %c20_i32_91 = arith.constant 20 : i32
    %330 = arith.cmpi slt, %329, %c20_i32_91 : i32
    %331 = arith.select %326, %307, %280 : vector<2x32xf32>
    %332 = arith.select %326, %305, %281 : vector<2x32xf32>
    %333 = arith.select %330, %323, %282 : vector<2x32xf32>
    %334 = arith.select %330, %321, %283 : vector<2x32xf32>
    %335 = vector.extract_strided_slice %12 {offsets = [12, 0], sizes = [2, 128], strides = [1, 1]} : vector<16x128xf32> to vector<2x128xf32>
    %336 = arith.truncf %331 : vector<2x32xf32> to vector<2x32xbf16>
    %cst_92 = arith.constant dense<0.000000e+00> : vector<2x128xf32>
    %337 = tpu.matmul %336, %23, %cst_92 {dimension_numbers = #tpu.dot_dimension_numbers<[1], [0], [0], [1], [0, 0, 1, 1], [], []>} : vector<2x32xbf16>, vector<32x128xbf16>, vector<2x128xf32> -> vector<2x128xf32>
    %338 = arith.addf %335, %337 : vector<2x128xf32>
    %339 = vector.extract_strided_slice %22 {offsets = [2, 0], sizes = [2, 128], strides = [1, 1]} : vector<16x128xf32> to vector<2x128xf32>
    %340 = arith.truncf %333 : vector<2x32xf32> to vector<2x32xbf16>
    %cst_93 = arith.constant dense<0.000000e+00> : vector<2x128xf32>
    %341 = tpu.matmul %340, %24, %cst_93 {dimension_numbers = #tpu.dot_dimension_numbers<[1], [0], [0], [1], [0, 0, 1, 1], [], []>} : vector<2x32xbf16>, vector<32x128xbf16>, vector<2x128xf32> -> vector<2x128xf32>
    %342 = arith.addf %339, %341 : vector<2x128xf32>
    %343 = vector.extract_strided_slice %338 {offsets = [0, 0], sizes = [2, 96], strides = [1, 1]} : vector<2x128xf32> to vector<2x96xf32>
    %344 = arith.negf %343 : vector<2x96xf32>
    %345 = math.exp %344 : vector<2x96xf32>
    %cst_94 = arith.constant 1.000000e+00 : f32
    %346 = vector.broadcast %cst_94 : f32 to vector<2x96xf32>
    %347 = arith.addf %346, %345 : vector<2x96xf32>
    %348 = arith.divf %346, %347 : vector<2x96xf32>
    %349 = vector.extract_strided_slice %348 {offsets = [0, 0], sizes = [2, 32], strides = [1, 1]} : vector<2x96xf32> to vector<2x32xf32>
    %350 = vector.extract_strided_slice %348 {offsets = [0, 32], sizes = [2, 32], strides = [1, 1]} : vector<2x96xf32> to vector<2x32xf32>
    %351 = vector.extract_strided_slice %348 {offsets = [0, 64], sizes = [2, 32], strides = [1, 1]} : vector<2x96xf32> to vector<2x32xf32>
    %352 = vector.extract_strided_slice %338 {offsets = [0, 96], sizes = [2, 32], strides = [1, 1]} : vector<2x128xf32> to vector<2x32xf32>
    %353 = math.tanh %352 : vector<2x32xf32>
    %354 = arith.mulf %350, %332 : vector<2x32xf32>
    %355 = arith.mulf %349, %353 : vector<2x32xf32>
    %356 = arith.addf %354, %355 : vector<2x32xf32>
    %357 = math.tanh %356 : vector<2x32xf32>
    %358 = arith.mulf %351, %357 : vector<2x32xf32>
    %359 = vector.extract_strided_slice %342 {offsets = [0, 0], sizes = [2, 96], strides = [1, 1]} : vector<2x128xf32> to vector<2x96xf32>
    %360 = arith.negf %359 : vector<2x96xf32>
    %361 = math.exp %360 : vector<2x96xf32>
    %cst_95 = arith.constant 1.000000e+00 : f32
    %362 = vector.broadcast %cst_95 : f32 to vector<2x96xf32>
    %363 = arith.addf %362, %361 : vector<2x96xf32>
    %364 = arith.divf %362, %363 : vector<2x96xf32>
    %365 = vector.extract_strided_slice %364 {offsets = [0, 0], sizes = [2, 32], strides = [1, 1]} : vector<2x96xf32> to vector<2x32xf32>
    %366 = vector.extract_strided_slice %364 {offsets = [0, 32], sizes = [2, 32], strides = [1, 1]} : vector<2x96xf32> to vector<2x32xf32>
    %367 = vector.extract_strided_slice %364 {offsets = [0, 64], sizes = [2, 32], strides = [1, 1]} : vector<2x96xf32> to vector<2x32xf32>
    %368 = vector.extract_strided_slice %342 {offsets = [0, 96], sizes = [2, 32], strides = [1, 1]} : vector<2x128xf32> to vector<2x32xf32>
    %369 = math.tanh %368 : vector<2x32xf32>
    %370 = arith.mulf %366, %334 : vector<2x32xf32>
    %371 = arith.mulf %365, %369 : vector<2x32xf32>
    %372 = arith.addf %370, %371 : vector<2x32xf32>
    %373 = math.tanh %372 : vector<2x32xf32>
    %374 = arith.mulf %367, %373 : vector<2x32xf32>
    %c8_i32_96 = arith.constant 8 : i32
    %375 = arith.muli %arg0, %c8_i32_96 : i32
    %c6_i32_97 = arith.constant 6 : i32
    %376 = arith.addi %375, %c6_i32_97 : i32
    %c20_i32_98 = arith.constant 20 : i32
    %377 = arith.cmpi slt, %376, %c20_i32_98 : i32
    %c2_i32_99 = arith.constant 2 : i32
    %378 = arith.subi %c2_i32_99, %arg0 : i32
    %c8_i32_100 = arith.constant 8 : i32
    %379 = arith.muli %378, %c8_i32_100 : i32
    %c1_i32_101 = arith.constant 1 : i32
    %380 = arith.addi %379, %c1_i32_101 : i32
    %c20_i32_102 = arith.constant 20 : i32
    %381 = arith.cmpi slt, %380, %c20_i32_102 : i32
    %382 = arith.select %377, %358, %331 : vector<2x32xf32>
    %383 = arith.select %377, %356, %332 : vector<2x32xf32>
    %384 = arith.select %381, %374, %333 : vector<2x32xf32>
    %385 = arith.select %381, %372, %334 : vector<2x32xf32>
    %386 = vector.extract_strided_slice %12 {offsets = [14, 0], sizes = [2, 128], strides = [1, 1]} : vector<16x128xf32> to vector<2x128xf32>
    %387 = arith.truncf %382 : vector<2x32xf32> to vector<2x32xbf16>
    %cst_103 = arith.constant dense<0.000000e+00> : vector<2x128xf32>
    %388 = tpu.matmul %387, %23, %cst_103 {dimension_numbers = #tpu.dot_dimension_numbers<[1], [0], [0], [1], [0, 0, 1, 1], [], []>} : vector<2x32xbf16>, vector<32x128xbf16>, vector<2x128xf32> -> vector<2x128xf32>
    %389 = arith.addf %386, %388 : vector<2x128xf32>
    %390 = vector.extract_strided_slice %22 {offsets = [0, 0], sizes = [2, 128], strides = [1, 1]} : vector<16x128xf32> to vector<2x128xf32>
    %391 = arith.truncf %384 : vector<2x32xf32> to vector<2x32xbf16>
    %cst_104 = arith.constant dense<0.000000e+00> : vector<2x128xf32>
    %392 = tpu.matmul %391, %24, %cst_104 {dimension_numbers = #tpu.dot_dimension_numbers<[1], [0], [0], [1], [0, 0, 1, 1], [], []>} : vector<2x32xbf16>, vector<32x128xbf16>, vector<2x128xf32> -> vector<2x128xf32>
    %393 = arith.addf %390, %392 : vector<2x128xf32>
    %394 = vector.extract_strided_slice %389 {offsets = [0, 0], sizes = [2, 96], strides = [1, 1]} : vector<2x128xf32> to vector<2x96xf32>
    %395 = arith.negf %394 : vector<2x96xf32>
    %396 = math.exp %395 : vector<2x96xf32>
    %cst_105 = arith.constant 1.000000e+00 : f32
    %397 = vector.broadcast %cst_105 : f32 to vector<2x96xf32>
    %398 = arith.addf %397, %396 : vector<2x96xf32>
    %399 = arith.divf %397, %398 : vector<2x96xf32>
    %400 = vector.extract_strided_slice %399 {offsets = [0, 0], sizes = [2, 32], strides = [1, 1]} : vector<2x96xf32> to vector<2x32xf32>
    %401 = vector.extract_strided_slice %399 {offsets = [0, 32], sizes = [2, 32], strides = [1, 1]} : vector<2x96xf32> to vector<2x32xf32>
    %402 = vector.extract_strided_slice %399 {offsets = [0, 64], sizes = [2, 32], strides = [1, 1]} : vector<2x96xf32> to vector<2x32xf32>
    %403 = vector.extract_strided_slice %389 {offsets = [0, 96], sizes = [2, 32], strides = [1, 1]} : vector<2x128xf32> to vector<2x32xf32>
    %404 = math.tanh %403 : vector<2x32xf32>
    %405 = arith.mulf %401, %383 : vector<2x32xf32>
    %406 = arith.mulf %400, %404 : vector<2x32xf32>
    %407 = arith.addf %405, %406 : vector<2x32xf32>
    %408 = math.tanh %407 : vector<2x32xf32>
    %409 = arith.mulf %402, %408 : vector<2x32xf32>
    %410 = vector.extract_strided_slice %393 {offsets = [0, 0], sizes = [2, 96], strides = [1, 1]} : vector<2x128xf32> to vector<2x96xf32>
    %411 = arith.negf %410 : vector<2x96xf32>
    %412 = math.exp %411 : vector<2x96xf32>
    %cst_106 = arith.constant 1.000000e+00 : f32
    %413 = vector.broadcast %cst_106 : f32 to vector<2x96xf32>
    %414 = arith.addf %413, %412 : vector<2x96xf32>
    %415 = arith.divf %413, %414 : vector<2x96xf32>
    %416 = vector.extract_strided_slice %415 {offsets = [0, 0], sizes = [2, 32], strides = [1, 1]} : vector<2x96xf32> to vector<2x32xf32>
    %417 = vector.extract_strided_slice %415 {offsets = [0, 32], sizes = [2, 32], strides = [1, 1]} : vector<2x96xf32> to vector<2x32xf32>
    %418 = vector.extract_strided_slice %415 {offsets = [0, 64], sizes = [2, 32], strides = [1, 1]} : vector<2x96xf32> to vector<2x32xf32>
    %419 = vector.extract_strided_slice %393 {offsets = [0, 96], sizes = [2, 32], strides = [1, 1]} : vector<2x128xf32> to vector<2x32xf32>
    %420 = math.tanh %419 : vector<2x32xf32>
    %421 = arith.mulf %417, %385 : vector<2x32xf32>
    %422 = arith.mulf %416, %420 : vector<2x32xf32>
    %423 = arith.addf %421, %422 : vector<2x32xf32>
    %424 = math.tanh %423 : vector<2x32xf32>
    %425 = arith.mulf %418, %424 : vector<2x32xf32>
    %c8_i32_107 = arith.constant 8 : i32
    %426 = arith.muli %arg0, %c8_i32_107 : i32
    %c7_i32_108 = arith.constant 7 : i32
    %427 = arith.addi %426, %c7_i32_108 : i32
    %c20_i32_109 = arith.constant 20 : i32
    %428 = arith.cmpi slt, %427, %c20_i32_109 : i32
    %c2_i32_110 = arith.constant 2 : i32
    %429 = arith.subi %c2_i32_110, %arg0 : i32
    %c8_i32_111 = arith.constant 8 : i32
    %430 = arith.muli %429, %c8_i32_111 : i32
    %c0_i32_112 = arith.constant 0 : i32
    %431 = arith.addi %430, %c0_i32_112 : i32
    %c20_i32_113 = arith.constant 20 : i32
    %432 = arith.cmpi slt, %431, %c20_i32_113 : i32
    %433 = arith.select %428, %409, %382 : vector<2x32xf32>
    %434 = arith.select %428, %407, %383 : vector<2x32xf32>
    %435 = arith.select %432, %425, %384 : vector<2x32xf32>
    %436 = arith.select %432, %423, %385 : vector<2x32xf32>
    %c0_114 = arith.constant 0 : index
    %c0_115 = arith.constant 0 : index
    %437 = vector.load %arg13[%c0_114, %c0_115] : memref<2x32xf32, #tpu.memory_space<vmem>>, vector<2x32xf32>
    tpu.vector_store %arg13[%c0_114, %c0_115], %433 {strides = array<i32>} : memref<2x32xf32, #tpu.memory_space<vmem>>, vector<2x32xf32>,
    %c0_116 = arith.constant 0 : index
    %c0_117 = arith.constant 0 : index
    %438 = vector.load %arg14[%c0_116, %c0_117] : memref<2x32xf32, #tpu.memory_space<vmem>>, vector<2x32xf32>
    tpu.vector_store %arg14[%c0_116, %c0_117], %434 {strides = array<i32>} : memref<2x32xf32, #tpu.memory_space<vmem>>, vector<2x32xf32>,
    %c0_118 = arith.constant 0 : index
    %c0_119 = arith.constant 0 : index
    %439 = vector.load %arg15[%c0_118, %c0_119] : memref<2x32xf32, #tpu.memory_space<vmem>>, vector<2x32xf32>
    tpu.vector_store %arg15[%c0_118, %c0_119], %435 {strides = array<i32>} : memref<2x32xf32, #tpu.memory_space<vmem>>, vector<2x32xf32>,
    %c0_120 = arith.constant 0 : index
    %c0_121 = arith.constant 0 : index
    %440 = vector.load %arg16[%c0_120, %c0_121] : memref<2x32xf32, #tpu.memory_space<vmem>>, vector<2x32xf32>
    tpu.vector_store %arg16[%c0_120, %c0_121], %436 {strides = array<i32>} : memref<2x32xf32, #tpu.memory_space<vmem>>, vector<2x32xf32>,
    return
  }
  func.func @transform_0(%arg0: i32) -> (i32, i32) {
    %c0_i32 = arith.constant 0 : i32
    %c0_i32_0 = arith.constant 0 : i32
    return %arg0, %c0_i32 : i32, i32
  }
  func.func @transform_1(%arg0: i32) -> (i32, i32) {
    %c0_i32 = arith.constant 0 : i32
    %c0_i32_0 = arith.constant 0 : i32
    return %arg0, %c0_i32 : i32, i32
  }
  func.func @transform_2(%arg0: i32) -> (i32, i32) {
    %c2_i32 = arith.constant 2 : i32
    %0 = arith.subi %c2_i32, %arg0 : i32
    %c0_i32 = arith.constant 0 : i32
    %c0_i32_0 = arith.constant 0 : i32
    return %0, %c0_i32 : i32, i32
  }
  func.func @transform_3(%arg0: i32) -> (i32, i32) {
    %c2_i32 = arith.constant 2 : i32
    %0 = arith.subi %c2_i32, %arg0 : i32
    %c0_i32 = arith.constant 0 : i32
    %c0_i32_0 = arith.constant 0 : i32
    return %0, %c0_i32 : i32, i32
  }
  func.func @transform_4(%arg0: i32) -> (i32, i32) {
    %c0_i32 = arith.constant 0 : i32
    %c0_i32_0 = arith.constant 0 : i32
    %c0_i32_1 = arith.constant 0 : i32
    return %c0_i32, %c0_i32_0 : i32, i32
  }
  func.func @transform_5(%arg0: i32) -> (i32, i32) {
    %c0_i32 = arith.constant 0 : i32
    %c0_i32_0 = arith.constant 0 : i32
    %c0_i32_1 = arith.constant 0 : i32
    return %c0_i32, %c0_i32_0 : i32, i32
  }
  func.func @transform_6(%arg0: i32) -> (i32, i32) {
    %c0_i32 = arith.constant 0 : i32
    %c0_i32_0 = arith.constant 0 : i32
    %c0_i32_1 = arith.constant 0 : i32
    return %c0_i32, %c0_i32_0 : i32, i32
  }
  func.func @transform_7(%arg0: i32) -> (i32, i32) {
    %c0_i32 = arith.constant 0 : i32
    %c0_i32_0 = arith.constant 0 : i32
    %c0_i32_1 = arith.constant 0 : i32
    return %c0_i32, %c0_i32_0 : i32, i32
  }
  func.func @transform_8(%arg0: i32) -> (i32, i32) {
    %c0_i32 = arith.constant 0 : i32
    %c0_i32_0 = arith.constant 0 : i32
    %c0_i32_1 = arith.constant 0 : i32
    return %c0_i32, %c0_i32_0 : i32, i32
  }
  func.func @transform_9(%arg0: i32) -> (i32, i32) {
    %c0_i32 = arith.constant 0 : i32
    %c0_i32_0 = arith.constant 0 : i32
    %c0_i32_1 = arith.constant 0 : i32
    return %c0_i32, %c0_i32_0 : i32, i32
  }
  func.func @transform_10(%arg0: i32) -> (i32, i32) {
    %c0_i32 = arith.constant 0 : i32
    %c0_i32_0 = arith.constant 0 : i32
    %c0_i32_1 = arith.constant 0 : i32
    return %c0_i32, %c0_i32_0 : i32, i32
  }
  func.func @transform_11(%arg0: i32) -> (i32, i32) {
    %c0_i32 = arith.constant 0 : i32
    %c0_i32_0 = arith.constant 0 : i32
    %c0_i32_1 = arith.constant 0 : i32
    return %c0_i32, %c0_i32_0 : i32, i32
  }
  func.func @transform_12(%arg0: i32) -> (i32, i32) {
    %c0_i32 = arith.constant 0 : i32
    %c0_i32_0 = arith.constant 0 : i32
    %c0_i32_1 = arith.constant 0 : i32
    return %c0_i32, %c0_i32_0 : i32, i32
  }
  func.func @transform_13(%arg0: i32) -> (i32, i32) {
    %c0_i32 = arith.constant 0 : i32
    %c0_i32_0 = arith.constant 0 : i32
    %c0_i32_1 = arith.constant 0 : i32
    return %c0_i32, %c0_i32_0 : i32, i32
  }
  func.func @transform_14(%arg0: i32) -> (i32, i32) {
    %c0_i32 = arith.constant 0 : i32
    %c0_i32_0 = arith.constant 0 : i32
    %c0_i32_1 = arith.constant 0 : i32
    return %c0_i32, %c0_i32_0 : i32, i32
  }
  func.func @transform_15(%arg0: i32) -> (i32, i32) {
    %c0_i32 = arith.constant 0 : i32
    %c0_i32_0 = arith.constant 0 : i32
    %c0_i32_1 = arith.constant 0 : i32
    return %c0_i32, %c0_i32_0 : i32, i32
  }
}

</mosaic_0001>

<bundles_post_ra>
// kernel: encoder_forward.3
= control target key start
LH: loop header
LB: loop body
LE: loop exit
PB: predicated region body
PF: predicated region fallthrough
CT: control target
= control target key end

     0   :  { %s2946_s18 = smov 0   ;;  %s3637_s0 = inlined_call_operand.vmem [shape: bf16[48,32], index: 0, kind: input, shape index: {}, may-alias: {0,2}]   ;;  %s3638_s1 = inlined_call_operand.vmem [shape: bf16[48,32], index: 1, kind: input, shape index: {}, may-alias: {1,3}]   ;;  %s3639_s2 = inlined_call_operand.vmem [shape: bf16[48,32], index: 2, kind: input, shape index: {}, may-alias: {0,2}]   ;;  %s3640_s3 = inlined_call_operand.vmem [shape: bf16[48,32], index: 3, kind: input, shape index: {}, may-alias: {1,3}]   ;;  %s3641_s4 = inlined_call_operand.vmem [shape: bf16[32,128], index: 4, kind: input, shape index: {}]   ;;  %s3642_s5 = inlined_call_operand.vmem [shape: bf16[32,128], index: 5, kind: input, shape index: {}]   ;;  %s3643_s6 = inlined_call_operand.vmem [shape: bf16[32,128], index: 6, kind: input, shape index: {}]   ;;  %s3644_s7 = inlined_call_operand.vmem [shape: bf16[32,128], index: 7, kind: input, shape index: {}]   ;;  %s3645_s8 = inlined_call_operand.vmem [shape: bf16[32,128], index: 8, kind: input, shape index: {}]   ;;  %s3646_s9 = inlined_call_operand.vmem [shape: bf16[32,128], index: 9, kind: input, shape index: {}]   ;;  %s3647_s10 = inlined_call_operand.vmem [shape: f32[1,128], index: 10, kind: input, shape index: {}]   ;;  %s3648_s11 = inlined_call_operand.vmem [shape: f32[1,128], index: 11, kind: input, shape index: {}]   ;;  %s3649_s12 = inlined_call_operand.vmem [shape: f32[2,32], index: 12, kind: output, shape index: {0}]   ;;  %s3650_s13 = inlined_call_operand.vmem [shape: f32[2,32], index: 13, kind: output, shape index: {1}]   ;;  %s3651_s14 = inlined_call_operand.vmem [shape: f32[2,32], index: 14, kind: output, shape index: {2}]   ;;  %s3652_s15 = inlined_call_operand.vmem [shape: f32[2,32], index: 15, kind: output, shape index: {3}]  }
   0x1   :  { %3655 = sst [smem:[#allocation3_spill]] %s3647_s10 }
   0x2   :  { %3656 = sst [smem:[#allocation4_spill]] %s3648_s11 }
   0x3 LB: > { %3657 = sst [smem:[#allocation2_spill]] %s2858_s18  ;;  %s2952_s19 = sadd.s32 4294967295, %s2858_s18   ;;  %s2858_s18 = sphi %s2946_s18, %s26_s18  }
   0x4   : > { %p2402_p0 = scmp.ge.s32.totalorder %s2858_s18, 1  ;;  %p466_p1 = scmp.lt.s32.totalorder %s2858_s18, 4 }
   0x6   : > { %p467_p2 = pnand %p2402_p0, %p466_p1 }
   0x7   : > { %s2403_s20 = sshll.u32 (!%p467_p2), %s2952_s19, 1  ;;  %s3654_s21 = ssub.s32 (!%p467_p2), 2, %s2952_s19 }
   0x8   : > { %470 = sbr.rel (%p467_p2) target bundleno = 5718 (0x1656), region = 68  ;;  %p527_p3 = scmp.lt.s32.totalorder (!%p467_p2), %s2403_s20, 5 }
   0x9   : > { %s2407_s22 = sshll.u32 (!%p467_p2), %s3654_s21, 1  ;;  %p2411_p5 = scmp.ne.s32.totalorder (!%p467_p2), %s2952_s19, 0 }
   0xa   : > { %p540_p4 = scmp.lt.s32.totalorder (!%p467_p2), %s2407_s22, 5 }
   0xf   : > { %s3665_s20 = smov (!%p527_p3, %s2403_s20), 5  ;;  %s3667_s22 = smov (!%p540_p4, %s2407_s22), 5 }
  0x10   : > { %s2404_s23 = sshll.u32 %s3665_s20, 2  ;;  %s2408_s30 = sshll.u32 %s3667_s22, 2  ;;  %vm559_vm0 = vcmask (!%p2411_p5), 254976   ;;  %v2860_v0 = vmov (!%p2411_p5), 0.0  }
  0x11   : > { %s530_s26 = scalar_lea.vmem %s3637_s0, %s2404_s23  ;;  %s536_s29 = scalar_lea.vmem %s3638_s1, %s2404_s23  ;;  %560 = vst.msk [vmem:[%s3649_s12] sm:$0x3] (!%p2411_p5), %vm559_vm0, %v2860_v0  ;;  %561 = vst.msk [vmem:[%s3650_s13] sm:$0x3] (!%p2411_p5), %vm559_vm0, %v2860_v0 }
  0x12   : > { %s2969_s18 = scalar_lea.vmem %s3639_s2, %s2408_s30  ;;  %s2974_s10 = scalar_lea.vmem %s3640_s3, %s2408_s30  ;;  %562 = vst.msk [vmem:[%s3651_s14] sm:$0x3] (!%p2411_p5), %vm559_vm0, %v2860_v0  ;;  %563 = vst.msk [vmem:[%s3652_s15] sm:$0x3] (!%p2411_p5), %vm559_vm0, %v2860_v0 }
  0x13   : > { %558 = sbr.rel (%p2411_p5) target bundleno = 26 (0x1a), region = 72 }
  0x1a PF: > { %v2704_v1 = vld [vmem:[%s3642_s5] sm:$0xff]   ;;  %v2861_v2 = vmov 0.0   ;;  %v2706_v4 = vld [vmem:[%s3642_s5 + $0x8] sm:$0xff]   ;;  %vm2862_vm1 = vmmov 0   ;;  %vm593_vm2 = vcmask 261120   ;;  %s3658_s24 = sld [smem:[#allocation3_spill]] }
  0x1b   : > { %2530 = vmatprep.subr.bf16.mxu0 %v2861_v2  ;;  %2538 = vmatprep.subr.bf16.mxu1 %v2861_v2  ;;  %v2705_v3 = vld [vmem:[%s3641_s4] sm:$0xff]   ;;  %v2707_v5 = vld [vmem:[%s3641_s4 + $0x8] sm:$0xff]   ;;  %s3659_s23 = sld [smem:[#allocation4_spill]]  ;;  %s2864_s25 = smov 64  }
  0x1c   : > { %2531 = vmatpush3.bf16.msra.mxu0 %v2704_v1  ;;  %2534 = vmatprep.mubr.msk.bf16.mxu0 %vm2862_vm1, %v2861_v2  ;;  %v2708_v6 = vld [vmem:[%s536_s29] sm:$0xff]   ;;  %v2712_v10 = vld [vmem:[%s3644_s7 + $0x8] sm:$0xff]   ;;  %s3144_s27 = sshll.u32 %s2952_s19, 3  ;;  %s3660_s11 = ssub.s32 2, %s2952_s19 }
  0x1d   : > { %2539 = vmatpush3.bf16.msra.mxu1 %v2705_v3  ;;  %2532 = vmatprep.subr.bf16.mxu0 %v2861_v2  ;;  %v2709_v7 = vld [vmem:[%s530_s26] sm:$0xff]   ;;  %v2713_v11 = vld [vmem:[%s3643_s6 + $0x8] sm:$0xff]   ;;  %s3148_s21 = sshll.u32 %s3660_s11, 3  ;;  %p1038_p6 = scmp.lt.s32.totalorder %s3144_s27, 20 }
  0x1e   : > { %2540 = vmatprep.subr.bf16.mxu1 %v2861_v2  ;;  %2542 = vmatprep.mubr.msk.bf16.mxu1 %vm2862_vm1, %v2861_v2  ;;  %v2710_v8 = vld [vmem:[%s3644_s7] sm:$0xff]   ;;  %v3058_v18 = vld [vmem:[%s3645_s8 + $0x8] sm:$0xff]   ;;  %s1041_s26 = sadd.s32 7, %s3148_s21  ;;  %s1219_s19 = sadd.s32 1, %s3144_s27 }
  0x1f   : > { %v2711_v9 = vld [vmem:[%s3643_s6] sm:$0xff]   ;;  %v3070_v21 = vld [vmem:[%s3646_s9 + $0x8] sm:$0xff]   ;;  %s1043_s29 = scalar_select %p1038_p6, 1, 0 }
  0x20   : > { %2533 = vmatpush3.bf16.msra.mxu0 %v2706_v4  ;;  %v2714_v12 = vld [vmem:[%s2974_s10] sm:$0xff]   ;;  %p1042_p7 = scmp.lt.s32.totalorder %s1041_s26, 20  ;;  %p1220_p8 = scmp.lt.s32.totalorder %s1219_s19, 20 }
  0x21   : > { %2541 = vmatpush3.bf16.msra.mxu1 %v2707_v5  ;;  %2546 = vmatprep.subr.bf16.mxu0 %v2861_v2  ;;  %v2715_v13 = vld [vmem:[%s2969_s18] sm:$0xff]   ;;  %s2863_s18 = smov 32   ;;  %s1221_s30 = sadd.s32 6, %s3148_s21 }
  0x22   : > { %2554 = vmatprep.subr.bf16.mxu1 %v2861_v2  ;;  %v3036_v14 = vld [vmem:[%s3645_s8] sm:$0xff]   ;;  %s1052_s28 = scalar_select %p1042_p7, 1, 0 }
  0x23   : > { %2535 = vmatmul.mubr.msk.bf16.vlgmr.msra.gmra.mrb[0].mxu0 %vm593_vm2, %v2708_v6  ;;  %v3042_v15 = vld [vmem:[%s3646_s9] sm:$0xff]   ;;  %s1223_s16 = scalar_select %p1220_p8, 1, 0 }
  0x24   : > { %2543 = vmatmul.mubr.msk.bf16.vlgmr.msra.gmra.mrb[0].mxu1 %vm593_vm2, %v2709_v7  ;;  %2547 = vmatpush3.bf16.msra.mxu0 %v2710_v8  ;;  %v860_v16 = vld [vmem:[%s3650_s13] sm:$0x3]  ;;  %p1222_p9 = scmp.lt.s32.totalorder %s1221_s30, 20  ;;  %s1397_s20 = sadd.s32 2, %s3144_s27 }
  0x25   : > { %2555 = vmatpush3.bf16.msra.mxu1 %v2711_v9  ;;  %2548 = vmatprep.subr.bf16.mxu0 %v2861_v2  ;;  %v862_v17 = vld [vmem:[%s3652_s15] sm:$0x3]  ;;  %p1398_p10 = scmp.lt.s32.totalorder %s1397_s20, 20  ;;  %s1574_s11 = sadd.s32 4, %s3148_s21 }
  0x26   : > { %2556 = vmatprep.subr.bf16.mxu1 %v2861_v2  ;;  %2550 = vmatprep.mubr.msk.bf16.mxu0 %vm2862_vm1, %v2861_v2  ;;  %v3063_v19 = vld [vmem:[%s3649_s12] sm:$0x3]  ;;  %v1016_v20 = vrot.slane %v862_v17, 2  ;;  %s1231_s17 = scalar_select %p1222_p9, 1, 0 }
  0x27   : > { %2558 = vmatprep.mubr.msk.bf16.mxu1 %vm2862_vm1, %v2861_v2  ;;  %988 = vrot.lane.b32.xlu1 %v860_v16, %s2863_s18  ;;  %v3075_v22 = vld [vmem:[%s3651_s14] sm:$0x3]  ;;  %v863_v23 = vpack.c.bf16 %v3063_v19, %v3063_v19  ;;  %s1401_s10 = scalar_select %p1398_p10, 1, 0 }
  0x28   : > { %2549 = vmatpush3.bf16.msra.mxu0 %v2712_v10  ;;  %v920_v24 = vpack.c.bf16 %v3075_v22, %v3075_v22  ;;  %v2420_v35 = vld [vmem:[%s3658_s24] ss:$0 sm:$0xff]  ;;  %s1399_s24 = sadd.s32 5, %s3148_s21  ;;  %p1575_p13 = scmp.lt.s32.totalorder %s1574_s11, 20 }
  0x29   : > { %2557 = vmatpush3.bf16.msra.mxu1 %v2713_v11  ;;  %2562 = vmatprep.subr.bf16.mxu0 %v2861_v2  ;;  %v2429_v39 = vld [vmem:[%s3659_s23] ss:$0 sm:$0xff]  ;;  %p1400_p11 = scmp.lt.s32.totalorder %s1399_s24, 20  ;;  %s1572_s23 = sadd.s32 3, %s3144_s27 }
  0x2a   : > { %2570 = vmatprep.subr.bf16.mxu1 %v2861_v2  ;;  %p1573_p12 = scmp.lt.s32.totalorder %s1572_s23, 20  ;;  %s1748_s19 = sadd.s32 3, %s3148_s21 }
  0x2b   : > { %2551 = vmatmul.mubr.msk.bf16.vlgmr.msra.gmra.mrb[4].mxu0 %vm593_vm2, %v2714_v12  ;;  %1017 = vrot.lane.b32.xlu1 %v1016_v20, %s2863_s18  ;;  %s1409_s22 = scalar_select %p1400_p11, 1, 0 }
  0x2c   : > { %2559 = vmatmul.mubr.msk.bf16.vlgmr.msra.gmra.mrb[4].mxu1 %vm593_vm2, %v2715_v13  ;;  %2563 = vmatpush3.bf16.msra.mxu0 %v3036_v14  ;;  %s1576_s26 = scalar_select %p1573_p12, 1, 0 }
  0x2d   : > { %2571 = vmatpush3.bf16.msra.mxu1 %v3042_v15  ;;  %2564 = vmatprep.subr.bf16.mxu0 %v2861_v2  ;;  %p1749_p1 = scmp.lt.s32.totalorder %s1748_s19, 20  ;;  %s1925_s20 = sadd.s32 2, %s3148_s21 }
  0x2e   : > { %2572 = vmatprep.subr.bf16.mxu1 %v2861_v2  ;;  %2566 = vmatprep.mubr.msk.bf16.mxu0 %vm2862_vm1, %v2861_v2  ;;  %p1926_p3 = scmp.lt.s32.totalorder %s1925_s20, 20  ;;  %p2278_p7 = scmp.lt.s32.totalorder %s3148_s21, 20 }
  0x2f   : > { %2574 = vmatprep.mubr.msk.bf16.mxu1 %vm2862_vm1, %v2861_v2  ;;  %s2865_s11 = smov 96  }
  0x30   : > { %2565 = vmatpush3.bf16.msra.mxu0 %v3058_v18  ;;  %s2287_s23 = scalar_select %p2278_p7, 1, 0 }
  0x31   : > { %2573 = vmatpush3.bf16.msra.mxu1 %v3070_v21  ;;  %2578 = vmatprep.subr.bf16.mxu0 %v2861_v2 }
  0x32   : > { %2586 = vmatprep.subr.bf16.mxu1 %v2861_v2 }
  0x33   : > { %2567 = vmatmul.mubr.msk.bf16.vlgmr.msra.gmra.mrb[8].mxu0 %vm593_vm2, %v863_v23 }
  0x34   : > { %2575 = vmatmul.mubr.msk.bf16.vlgmr.msra.gmra.mrb[8].mxu1 %vm593_vm2, %v920_v24  ;;  %2579 = vmatpush3.bf16.msra.mxu0 %v3036_v14 }
  0x35   : > { %2580 = vmatprep.subr.bf16.mxu0 %v2861_v2  ;;  %2582 = vmatprep.mubr.msk.bf16.mxu0 %vm2862_vm1, %v2861_v2 }
  0x36   : > { %2587 = vmatpush3.bf16.msra.mxu1 %v3042_v15  ;;  %2590 = vmatprep.mubr.msk.bf16.mxu1 %vm2862_vm1, %v2861_v2 }
  0x37   : > { %2588 = vmatprep.subr.bf16.mxu1 %v2861_v2 }
  0x38   : > { %2581 = vmatpush3.bf16.msra.mxu0 %v3058_v18 }
  0x39   : > { %2594 = vmatprep.subr.bf16.mxu0 %v2861_v2 }
  0x3a   : > { %2589 = vmatpush3.bf16.msra.mxu1 %v3070_v21 }
  0x3b   : > { %2602 = vmatprep.subr.bf16.mxu1 %v2861_v2 }
  0x99   : > { %v3125_v13 = vpop.permute.xlu1 %988 }
  0x9d   : > { %v3128_v17 = vpop.permute.xlu1 %1017 }
  0xf6   : > { %v631_v25 = vpop.f32.mrb[0].mxu0 }
  0xf7   : > { %v692_v26 = vpop.f32.mrb[0].mxu1  ;;  %v2536_v27 = vpop.f32.mrb[1].mxu0 }
  0xf8   : > { %v693_v28 = vadd.f32 %v692_v26, %v631_v25  ;;  %v2544_v29 = vpop.f32.mrb[1].mxu1  ;;  %v634_v30 = vpop.f32.mrb[2].mxu0 }
  0xf9   : > { %v695_v31 = vpop.f32.mrb[2].mxu1  ;;  %v2537_v32 = vpop.f32.mrb[3].mxu0  ;;  %v1056_v29 = vrot.slane %v3075_v22, 2 }
  0xfa   : > { %v696_v33 = vadd.f32 %v695_v31, %v634_v30  ;;  %v2545_v34 = vpop.f32.mrb[3].mxu1  ;;  %v3115_v49 = vadd.f32 %v2420_v35, %v693_v28  ;;  %v1044_v31 = vstv %s1043_s29  ;;  %s1584_s29 = scalar_select %p1575_p13, 1, 0 }
  0xfb   : > { %vm3152_vm3 = vcmp.eq.s32.totalorder %v1044_v31, 1 }
  0xfc   : > { %v3108_v36 = vadd.f32 %v2420_v35, %v696_v33  ;;  %v3160_v35 = vstv %s1052_s28  ;;  %s1746_s28 = sadd.s32 4, %s3144_s27 }
  0xfd   : > { %vm1054_vm4 = vcmp.eq.s32.totalorder %v3160_v35, 1  ;;  %p1747_p0 = scmp.lt.s32.totalorder %s1746_s28, 20 }
  0xfe   : > { %v774_v37 = vpop.f32.mrb[4].mxu0 }
  0xff   : > { %v835_v38 = vpop.f32.mrb[4].mxu1  ;;  %v2552_v40 = vpop.f32.mrb[5].mxu0  ;;  %s1750_s30 = scalar_select %p1747_p0, 1, 0 }
 0x100   : > { %v836_v41 = vadd.f32 %v835_v38, %v774_v37  ;;  %v2560_v42 = vpop.f32.mrb[5].mxu1  ;;  %v777_v43 = vpop.f32.mrb[6].mxu0 }
 0x101   : > { %v838_v44 = vpop.f32.mrb[6].mxu1  ;;  %v2553_v45 = vpop.f32.mrb[7].mxu0 }
 0x102   : > { %v3113_v46 = vadd.f32 %v2429_v39, %v836_v41  ;;  %v839_v47 = vadd.f32 %v838_v44, %v777_v43  ;;  %v2561_v48 = vpop.f32.mrb[7].mxu1 }
 0x104   : > { %v3118_v54 = vadd.f32 %v2429_v39, %v839_v47 }
 0x106   : > { %v913_v50 = vpop.f32.mrb[8].mxu0 }
 0x107   : > { %v919_v51 = vadd.f32 %v913_v50, %v3115_v49  ;;  %v970_v52 = vpop.f32.mrb[8].mxu1  ;;  %v2568_v53 = vpop.f32.mrb[9].mxu0 }
 0x108   : > { %v977_v55 = vrot.slane %v970_v52, 2  ;;  %v2576_v56 = vpop.f32.mrb[9].mxu1  ;;  %v916_v57 = vpop.f32.mrb[10].mxu0 }
 0x109   : > { %2720 = vtanh.f32 %v919_v51  ;;  %v973_v58 = vpop.f32.mrb[10].mxu1  ;;  %v2569_v59 = vpop.f32.mrb[11].mxu0  ;;  %v2436_v0 = vmul.f32 -1.442695, %v919_v51 }
 0x10a   : > { %v979_v60 = vadd.f32 %v977_v55, %v3118_v54  ;;  %v2577_v61 = vpop.f32.mrb[11].mxu1 }
 0x10c   : > { %2722 = vtanh.f32 %v979_v60  ;;  %v2437_v1 = vmul.f32 -1.442695, %v979_v60 }
 0x10d   : > { %2724 = vpow2.f32 %v2436_v0 }
 0x10e   : > { %2726 = vpow2.f32 %v2437_v1 }
 0x113   : > { %v2721_v62 = vpop.eup %2720 }
 0x114   : > { %993 = vrot.lane.b32.xlu0 %v2721_v62, %s2863_s18 }
 0x116   : > { %v2723_v63 = vpop.eup %2722 }
 0x117   : > { %v2725_v3 = vpop.eup %2724 }
 0x118   : > { %1022 = vrot.lane.b32.xlu0 %v2723_v63, %s2863_s18  ;;  %v983_v4 = vadd.f32 1.0, %v2725_v3  ;;  %v2727_v5 = vpop.eup %2726 }
 0x119   : > { %v1011_v6 = vadd.f32 1.0, %v2727_v5 }
 0x11a   : > { %2728 = vrcp.f32 %v983_v4 }
 0x11b   : > { %2730 = vrcp.f32 %v1011_v6 }
 0x124   : > { %v2729_v7 = vpop.eup %2728 }
 0x125   : > { %v2731_v10 = vpop.eup %2730  ;;  %v991_v16 = vmul.f32 %v2729_v7, %v3125_v13 }
 0x126   : > { %v1020_v24 = vmul.f32 %v2731_v10, %v3128_v17 }
 0x186   : > { %v994_v8 = vpop.permute.xlu0 %993 }
 0x187   : > { %v996_v9 = vmul.f32 %v2729_v7, %v994_v8 }
 0x189   : > { %998 = vrot.lane.b32.xlu0 %v996_v9, %s2863_s18 }
 0x18a   : > { %v1023_v11 = vpop.permute.xlu0 %1022 }
 0x18b   : > { %v1025_v12 = vmul.f32 %v2731_v10, %v1023_v11 }
 0x18d   : > { %1027 = vrot.lane.b32.xlu1 %v1025_v12, %s2863_s18 }
 0x1fb   : > { %v999_v20 = vpop.permute.xlu0 %998 }
 0x1fc   : > { %v3130_v23 = vadd.f32 %v999_v20, %v991_v16 }
 0x1fe   : > { %2732 = vtanh.f32 %v3130_v23  ;;  %v1051_v11 = vsel %vm3152_vm3, %v3130_v23, %v3125_v13 }
 0x1ff   : > { %v1028_v25 = vpop.permute.xlu1 %1027  ;;  %v3197_v12 = vrot.slane %v1051_v11, 6 }
 0x200   : > { %v3134_v26 = vadd.f32 %v1028_v25, %v1020_v24 }
 0x202   : > { %2734 = vtanh.f32 %v3134_v26  ;;  %v3204_v24 = vsel %vm1054_vm4, %v3134_v26, %v3128_v17  ;;  %v3219_v17 = vstv %s1223_s16  ;;  %s1758_s16 = scalar_select %p1749_p1, 1, 0 }
 0x203   : > { %vm1225_vm5 = vcmp.eq.s32.totalorder %v3219_v17, 1 }
 0x208   : > { %v2733_v27 = vpop.eup %2732 }
 0x209   : > { %1004 = vrot.lane.b32.xlu0 %v2733_v27, %s2863_s18  ;;  %v1200_v27 = vrot.slane %v3204_v24, 2 }
 0x20c   : > { %v2735_v28 = vpop.eup %2734 }
 0x20d   : > { %1047 = vrot.lane.b32.xlu0 %v3063_v19, %s2864_s25  ;;  %1033 = vrot.lane.b32.xlu1 %v2735_v28, %s2863_s18 }
 0x211   : > { %1057 = vrot.lane.b32.xlu1 %v1056_v29, %s2864_s25 }
 0x27b   : > { %v1005_v30 = vpop.permute.xlu0 %1004 }
 0x27c   : > { %v1007_v19 = vmul.f32 %v2729_v7, %v1005_v30 }
 0x27f   : > { %v1048_v22 = vpop.permute.xlu0 %1047  ;;  %v1034_v33 = vpop.permute.xlu1 %1033 }
 0x280   : > { %v3158_v34 = vsel %vm3152_vm3, %v1007_v19, %v1048_v22  ;;  %v1036_v38 = vmul.f32 %v2731_v10, %v1034_v33  ;;  %v3229_v33 = vstv %s1231_s17  ;;  %s1923_s17 = sadd.s32 5, %s3144_s27  ;;  %vm2299_vm3 = vcmask 261126  }
 0x281   : > { %v1062_v37 = vpack.c.bf16 %v3158_v34, %v3158_v34  ;;  %v1227_v31 = vrot.slane %v3158_v34, 6  ;;  %vm1233_vm6 = vcmp.eq.s32.totalorder %v3229_v33, 1  ;;  %v3300_v33 = vstv %s1409_s22  ;;  %p1924_p2 = scmp.lt.s32.totalorder %s1923_s17, 20  ;;  %s2103_s17 = sadd.s32 1, %s3148_s21 }
 0x282   : > { %vm1411_vm8 = vcmp.eq.s32.totalorder %v3300_v33, 1  ;;  %p2104_p5 = scmp.lt.s32.totalorder %s2103_s17, 20 }
 0x283   : > { %1064 = vrot.lane.b32.xlu0 %v1062_v37, %s2864_s25  ;;  %v1058_v39 = vpop.permute.xlu1 %1057  ;;  %s1927_s24 = scalar_select %p1924_p2, 1, 0 }
 0x284   : > { %v3168_v40 = vsel %vm1054_vm4, %v1036_v38, %v1058_v39  ;;  %vm2310_vm4 = vcmask 254976  }
 0x285   : > { %v1113_v41 = vpack.c.bf16 %v3168_v40, %v3168_v40  ;;  %v1235_v38 = vrot.slane %v3168_v40, 2 }
 0x287   : > { %v1115_v42 = vrot.slane %v1113_v41, 3 }
 0x289   : > { %1116 = vrot.lane.b32.xlu1 %v1115_v42, %s2864_s25 }
 0x2f5   : > { %v1065_v43 = vpop.permute.xlu0 %1064 }
 0x2f6   : > { %2583 = vmatmul.mubr.msk.bf16.vlgmr.msra.gmra.mrb[12].mxu0 %vm593_vm2, %v1065_v43 }
 0x2f7   : > { %2595 = vmatpush3.bf16.msra.mxu0 %v3036_v14  ;;  %2598 = vmatprep.mubr.msk.bf16.mxu0 %vm2862_vm1, %v2861_v2 }
 0x2f8   : > { %2596 = vmatprep.subr.bf16.mxu0 %v2861_v2 }
 0x2fb   : > { %v1117_v44 = vpop.permute.xlu1 %1116  ;;  %2597 = vmatpush3.bf16.msra.mxu0 %v3058_v18 }
 0x2fc   : > { %2591 = vmatmul.mubr.msk.bf16.vlgmr.msra.gmra.mrb[12].mxu1 %vm593_vm2, %v1117_v44  ;;  %2610 = vmatprep.subr.bf16.mxu0 %v2861_v2 }
 0x2fd   : > { %2603 = vmatpush3.bf16.msra.mxu1 %v3042_v15  ;;  %2606 = vmatprep.mubr.msk.bf16.mxu1 %vm2862_vm1, %v2861_v2 }
 0x2fe   : > { %2604 = vmatprep.subr.bf16.mxu1 %v2861_v2 }
 0x301   : > { %2605 = vmatpush3.bf16.msra.mxu1 %v3070_v21 }
 0x302   : > { %2618 = vmatprep.subr.bf16.mxu1 %v2861_v2 }
 0x3c9   : > { %v1103_v45 = vpop.f32.mrb[12].mxu0 }
 0x3ca   : > { %v1110_v47 = vrot.slane %v1103_v45, 6  ;;  %v2584_v48 = vpop.f32.mrb[13].mxu0 }
 0x3cb   : > { %v1106_v50 = vpop.f32.mrb[14].mxu0 }
 0x3cc   : > { %v1112_v51 = vadd.f32 %v1110_v47, %v3115_v49  ;;  %v2585_v52 = vpop.f32.mrb[15].mxu0 }
 0x3ce   : > { %2736 = vtanh.f32 %v1112_v51  ;;  %v2442_v62 = vmul.f32 -1.442695, %v1112_v51 }
 0x3cf   : > { %v1155_v53 = vpop.f32.mrb[12].mxu1 }
 0x3d0   : > { %v1162_v55 = vrot.slane %v1155_v53, 4  ;;  %v2592_v56 = vpop.f32.mrb[13].mxu1 }
 0x3d1   : > { %v1158_v57 = vpop.f32.mrb[14].mxu1 }
 0x3d2   : > { %v1164_v58 = vadd.f32 %v1162_v55, %v3118_v54  ;;  %v2593_v59 = vpop.f32.mrb[15].mxu1 }
 0x3d4   : > { %2738 = vtanh.f32 %v1164_v58  ;;  %v2443_v63 = vmul.f32 -1.442695, %v1164_v58 }
 0x3d5   : > { %2740 = vpow2.f32 %v2442_v62 }
 0x3d6   : > { %2742 = vpow2.f32 %v2443_v63 }
 0x3d8   : > { %v2737_v60 = vpop.eup %2736 }
 0x3d9   : > { %1177 = vrot.lane.b32.xlu0 %v2737_v60, %s2863_s18 }
 0x3de   : > { %v2739_v61 = vpop.eup %2738 }
 0x3df   : > { %1204 = vrot.lane.b32.xlu1 %v2739_v61, %s2863_s18  ;;  %v2741_v0 = vpop.eup %2740 }
 0x3e0   : > { %v1168_v1 = vadd.f32 1.0, %v2741_v0  ;;  %v2743_v3 = vpop.eup %2742 }
 0x3e1   : > { %v1195_v4 = vadd.f32 1.0, %v2743_v3 }
 0x3e2   : > { %2744 = vrcp.f32 %v1168_v1 }
 0x3e3   : > { %2746 = vrcp.f32 %v1195_v4 }
 0x3ec   : > { %v2745_v5 = vpop.eup %2744 }
 0x3ed   : > { %v2747_v8 = vpop.eup %2746  ;;  %v1175_v16 = vmul.f32 %v2745_v5, %v3197_v12 }
 0x3ee   : > { %v1202_v13 = vmul.f32 %v2747_v8, %v1200_v27 }
 0x44b   : > { %v1178_v6 = vpop.permute.xlu0 %1177 }
 0x44c   : > { %v1180_v7 = vmul.f32 %v2745_v5, %v1178_v6 }
 0x44e   : > { %1182 = vrot.lane.b32.xlu0 %v1180_v7, %s2863_s18 }
 0x451   : > { %v1205_v9 = vpop.permute.xlu1 %1204 }
 0x452   : > { %v1207_v10 = vmul.f32 %v2747_v8, %v1205_v9 }
 0x454   : > { %1209 = vrot.lane.b32.xlu1 %v1207_v10, %s2863_s18 }
 0x4c0   : > { %v1183_v20 = vpop.permute.xlu0 %1182 }
 0x4c1   : > { %v3206_v25 = vadd.f32 %v1183_v20, %v1175_v16 }
 0x4c3   : > { %2748 = vtanh.f32 %v3206_v25  ;;  %v3265_v10 = vsel %vm1225_vm5, %v3206_v25, %v3197_v12 }
 0x4c4   : > { %v1351_v11 = vrot.slane %v3265_v10, 6 }
 0x4c6   : > { %v1210_v23 = vpop.permute.xlu1 %1209 }
 0x4c7   : > { %v3212_v28 = vadd.f32 %v1210_v23, %v1202_v13 }
 0x4c9   : > { %2750 = vtanh.f32 %v3212_v28  ;;  %v3275_v13 = vsel %vm1233_vm6, %v3212_v28, %v1200_v27  ;;  %v3290_v27 = vstv %s1401_s10  ;;  %s1935_s10 = scalar_select %p1926_p3, 1, 0 }
 0x4ca   : > { %v1378_v12 = vrot.slane %v3275_v13, 2  ;;  %vm1403_vm7 = vcmp.eq.s32.totalorder %v3290_v27, 1 }
 0x4cd   : > { %v2749_v29 = vpop.eup %2748 }
 0x4ce   : > { %1188 = vrot.lane.b32.xlu0 %v2749_v29, %s2863_s18 }
 0x4d3   : > { %v2751_v30 = vpop.eup %2750 }
 0x4d4   : > { %1215 = vrot.lane.b32.xlu1 %v2751_v30, %s2863_s18 }
 0x540   : > { %v1189_v26 = vpop.permute.xlu0 %1188 }
 0x541   : > { %v1191_v19 = vmul.f32 %v2745_v5, %v1189_v26 }
 0x543   : > { %v3225_v32 = vsel %vm1225_vm5, %v1191_v19, %v1227_v31 }
 0x544   : > { %v1239_v22 = vpack.c.bf16 %v3225_v32, %v3225_v32  ;;  %v1405_v26 = vrot.slane %v3225_v32, 6 }
 0x546   : > { %v1216_v35 = vpop.permute.xlu1 %1215  ;;  %v1241_v37 = vrot.slane %v1239_v22, 1 }
 0x547   : > { %v1218_v39 = vmul.f32 %v2747_v8, %v1216_v35 }
 0x548   : > { %1242 = vrot.lane.b32.xlu0 %v1241_v37, %s2864_s25 }
 0x549   : > { %v3236_v34 = vsel %vm1233_vm6, %v1218_v39, %v1235_v38 }
 0x54a   : > { %v1291_v41 = vpack.c.bf16 %v3236_v34, %v3236_v34  ;;  %v1413_v38 = vrot.slane %v3236_v34, 2 }
 0x54c   : > { %v1293_v42 = vrot.slane %v1291_v41, 2 }
 0x54e   : > { %1294 = vrot.lane.b32.xlu1 %v1293_v42, %s2864_s25 }
 0x5ba   : > { %v1243_v43 = vpop.permute.xlu0 %1242 }
 0x5bb   : > { %2599 = vmatmul.mubr.msk.bf16.vlgmr.msra.gmra.mrb[16].mxu0 %vm593_vm2, %v1243_v43 }
 0x5bc   : > { %2611 = vmatpush3.bf16.msra.mxu0 %v3036_v14  ;;  %2614 = vmatprep.mubr.msk.bf16.mxu0 %vm2862_vm1, %v2861_v2 }
 0x5bd   : > { %2612 = vmatprep.subr.bf16.mxu0 %v2861_v2 }
 0x5c0   : > { %v1295_v40 = vpop.permute.xlu1 %1294  ;;  %2613 = vmatpush3.bf16.msra.mxu0 %v3058_v18 }
 0x5c1   : > { %2607 = vmatmul.mubr.msk.bf16.vlgmr.msra.gmra.mrb[16].mxu1 %vm593_vm2, %v1295_v40  ;;  %2626 = vmatprep.subr.bf16.mxu0 %v2861_v2 }
 0x5c2   : > { %2619 = vmatpush3.bf16.msra.mxu1 %v3042_v15  ;;  %2622 = vmatprep.mubr.msk.bf16.mxu1 %vm2862_vm1, %v2861_v2 }
 0x5c3   : > { %2620 = vmatprep.subr.bf16.mxu1 %v2861_v2 }
 0x5c6   : > { %2621 = vmatpush3.bf16.msra.mxu1 %v3070_v21 }
 0x5c7   : > { %2634 = vmatprep.subr.bf16.mxu1 %v2861_v2 }
 0x68e   : > { %v1281_v44 = vpop.f32.mrb[16].mxu0 }
 0x68f   : > { %v1288_v45 = vrot.slane %v1281_v44, 4  ;;  %v2600_v47 = vpop.f32.mrb[17].mxu0 }
 0x690   : > { %v1284_v48 = vpop.f32.mrb[18].mxu0 }
 0x691   : > { %v1290_v50 = vadd.f32 %v1288_v45, %v3115_v49  ;;  %v2601_v51 = vpop.f32.mrb[19].mxu0 }
 0x693   : > { %2752 = vtanh.f32 %v1290_v50  ;;  %v2446_v61 = vmul.f32 -1.442695, %v1290_v50 }
 0x694   : > { %v1333_v52 = vpop.f32.mrb[16].mxu1 }
 0x695   : > { %v1340_v53 = vrot.slane %v1333_v52, 6  ;;  %v2608_v55 = vpop.f32.mrb[17].mxu1 }
 0x696   : > { %v1336_v56 = vpop.f32.mrb[18].mxu1 }
 0x697   : > { %v1342_v57 = vadd.f32 %v1340_v53, %v3118_v54  ;;  %v2609_v58 = vpop.f32.mrb[19].mxu1 }
 0x699   : > { %2754 = vtanh.f32 %v1342_v57  ;;  %v2447_v62 = vmul.f32 -1.442695, %v1342_v57 }
 0x69a   : > { %2756 = vpow2.f32 %v2446_v61 }
 0x69b   : > { %2758 = vpow2.f32 %v2447_v62 }
 0x69d   : > { %v2753_v59 = vpop.eup %2752 }
 0x69e   : > { %1355 = vrot.lane.b32.xlu0 %v2753_v59, %s2863_s18 }
 0x6a3   : > { %v2755_v60 = vpop.eup %2754 }
 0x6a4   : > { %1382 = vrot.lane.b32.xlu1 %v2755_v60, %s2863_s18  ;;  %v2757_v63 = vpop.eup %2756 }
 0x6a5   : > { %v1346_v0 = vadd.f32 1.0, %v2757_v63  ;;  %v2759_v1 = vpop.eup %2758 }
 0x6a6   : > { %v1373_v3 = vadd.f32 1.0, %v2759_v1 }
 0x6a7   : > { %2760 = vrcp.f32 %v1346_v0 }
 0x6a8   : > { %2762 = vrcp.f32 %v1373_v3 }
 0x6b1   : > { %v2761_v4 = vpop.eup %2760 }
 0x6b2   : > { %v2763_v7 = vpop.eup %2762  ;;  %v1353_v16 = vmul.f32 %v2761_v4, %v1351_v11 }
 0x6b3   : > { %v1380_v25 = vmul.f32 %v2763_v7, %v1378_v12 }
 0x710   : > { %v1356_v5 = vpop.permute.xlu0 %1355 }
 0x711   : > { %v1358_v6 = vmul.f32 %v2761_v4, %v1356_v5 }
 0x713   : > { %1360 = vrot.lane.b32.xlu0 %v1358_v6, %s2863_s18 }
 0x716   : > { %v1383_v8 = vpop.permute.xlu1 %1382 }
 0x717   : > { %v1385_v9 = vmul.f32 %v2763_v7, %v1383_v8 }
 0x719   : > { %1387 = vrot.lane.b32.xlu1 %v1385_v9, %s2863_s18 }
 0x785   : > { %v1361_v20 = vpop.permute.xlu0 %1360 }
 0x786   : > { %v3277_v23 = vadd.f32 %v1361_v20, %v1353_v16 }
 0x788   : > { %2764 = vtanh.f32 %v3277_v23  ;;  %v3337_v6 = vsel %vm1403_vm7, %v3277_v23, %v1351_v11 }
 0x78b   : > { %v1388_v29 = vpop.permute.xlu1 %1387 }
 0x78c   : > { %v3283_v30 = vadd.f32 %v1388_v29, %v1380_v25  ;;  %v3362_v29 = vstv %s1576_s26 }
 0x78d   : > { %vm1578_vm9 = vcmp.eq.s32.totalorder %v3362_v29, 1 }
 0x78e   : > { %2766 = vtanh.f32 %v3283_v30  ;;  %v3345_v8 = vsel %vm1411_vm8, %v3283_v30, %v1378_v12 }
 0x78f   : > { %v1553_v11 = vrot.slane %v3345_v8, 2 }
 0x792   : > { %v2765_v24 = vpop.eup %2764 }
 0x793   : > { %1366 = vrot.lane.b32.xlu0 %v2765_v24, %s2863_s18 }
 0x798   : > { %v2767_v17 = vpop.eup %2766 }
 0x799   : > { %1393 = vrot.lane.b32.xlu1 %v2767_v17, %s2863_s18 }
 0x805   : > { %v1367_v28 = vpop.permute.xlu0 %1366 }
 0x806   : > { %v1369_v31 = vmul.f32 %v2761_v4, %v1367_v28  ;;  %v3370_v28 = vstv %s1584_s29 }
 0x807   : > { %vm1586_vm10 = vcmp.eq.s32.totalorder %v3370_v28, 1 }
 0x808   : > { %v3296_v19 = vsel %vm1403_vm7, %v1369_v31, %v1405_v26 }
 0x809   : > { %v1417_v22 = vpack.c.bf16 %v3296_v19, %v3296_v19  ;;  %v1580_v24 = vrot.slane %v3296_v19, 6 }
 0x80b   : > { %v1394_v35 = vpop.permute.xlu1 %1393  ;;  %v1419_v37 = vrot.slane %v1417_v22, 2 }
 0x80c   : > { %v1396_v39 = vmul.f32 %v2763_v7, %v1394_v35  ;;  %v1526_v7 = vrot.slane %v3337_v6, 6 }
 0x80d   : > { %1420 = vrot.lane.b32.xlu0 %v1419_v37, %s2864_s25 }
 0x80e   : > { %v3307_v32 = vsel %vm1411_vm8, %v1396_v39, %v1413_v38 }
 0x80f   : > { %v1469_v41 = vpack.c.bf16 %v3307_v32, %v3307_v32  ;;  %v1588_v22 = vrot.slane %v3307_v32, 2 }
 0x811   : > { %v1471_v42 = vrot.slane %v1469_v41, 1 }
 0x813   : > { %1472 = vrot.lane.b32.xlu1 %v1471_v42, %s2864_s25 }
 0x87f   : > { %v1421_v43 = vpop.permute.xlu0 %1420 }
 0x880   : > { %2615 = vmatmul.mubr.msk.bf16.vlgmr.msra.gmra.mrb[20].mxu0 %vm593_vm2, %v1421_v43 }
 0x881   : > { %2627 = vmatpush3.bf16.msra.mxu0 %v3036_v14  ;;  %2630 = vmatprep.mubr.msk.bf16.mxu0 %vm2862_vm1, %v2861_v2 }
 0x882   : > { %2628 = vmatprep.subr.bf16.mxu0 %v2861_v2 }
 0x885   : > { %v1473_v34 = vpop.permute.xlu1 %1472  ;;  %2629 = vmatpush3.bf16.msra.mxu0 %v3058_v18 }
 0x886   : > { %2623 = vmatmul.mubr.msk.bf16.vlgmr.msra.gmra.mrb[20].mxu1 %vm593_vm2, %v1473_v34  ;;  %2642 = vmatprep.subr.bf16.mxu0 %v2861_v2 }
 0x887   : > { %2635 = vmatpush3.bf16.msra.mxu1 %v3042_v15  ;;  %2638 = vmatprep.mubr.msk.bf16.mxu1 %vm2862_vm1, %v2861_v2 }
 0x888   : > { %2636 = vmatprep.subr.bf16.mxu1 %v2861_v2 }
 0x88b   : > { %2637 = vmatpush3.bf16.msra.mxu1 %v3070_v21 }
 0x88c   : > { %2650 = vmatprep.subr.bf16.mxu1 %v2861_v2 }
 0x953   : > { %v1459_v40 = vpop.f32.mrb[20].mxu0 }
 0x954   : > { %v1466_v44 = vrot.slane %v1459_v40, 2  ;;  %v2616_v45 = vpop.f32.mrb[21].mxu0 }
 0x955   : > { %v1462_v47 = vpop.f32.mrb[22].mxu0 }
 0x956   : > { %v1468_v48 = vadd.f32 %v1466_v44, %v3115_v49  ;;  %v2617_v50 = vpop.f32.mrb[23].mxu0 }
 0x958   : > { %2768 = vtanh.f32 %v1468_v48  ;;  %v2450_v59 = vmul.f32 -1.442695, %v1468_v48 }
 0x959   : > { %v1511_v51 = vpop.f32.mrb[20].mxu1 }
 0x95a   : > { %v1517_v52 = vadd.f32 %v1511_v51, %v3118_v54  ;;  %v2624_v53 = vpop.f32.mrb[21].mxu1 }
 0x95b   : > { %v1514_v55 = vpop.f32.mrb[22].mxu1 }
 0x95c   : > { %2770 = vtanh.f32 %v1517_v52  ;;  %v2625_v56 = vpop.f32.mrb[23].mxu1  ;;  %v2451_v60 = vmul.f32 -1.442695, %v1517_v52 }
 0x95d   : > { %2772 = vpow2.f32 %v2450_v59 }
 0x95e   : > { %2774 = vpow2.f32 %v2451_v60 }
 0x962   : > { %v2769_v57 = vpop.eup %2768 }
 0x963   : > { %1530 = vrot.lane.b32.xlu0 %v2769_v57, %s2863_s18 }
 0x966   : > { %v2771_v58 = vpop.eup %2770 }
 0x967   : > { %1557 = vrot.lane.b32.xlu1 %v2771_v58, %s2863_s18  ;;  %v2773_v49 = vpop.eup %2772 }
 0x968   : > { %v1521_v61 = vadd.f32 1.0, %v2773_v49  ;;  %v2775_v62 = vpop.eup %2774 }
 0x969   : > { %v1548_v63 = vadd.f32 1.0, %v2775_v62 }
 0x96a   : > { %2776 = vrcp.f32 %v1521_v61 }
 0x96b   : > { %2778 = vrcp.f32 %v1548_v63 }
 0x974   : > { %v2777_v54 = vpop.eup %2776 }
 0x975   : > { %v2779_v3 = vpop.eup %2778  ;;  %v1528_v9 = vmul.f32 %v2777_v54, %v1526_v7 }
 0x976   : > { %v1555_v20 = vmul.f32 %v2779_v3, %v1553_v11 }
 0x9d5   : > { %v1531_v0 = vpop.permute.xlu0 %1530 }
 0x9d6   : > { %v1533_v1 = vmul.f32 %v2777_v54, %v1531_v0 }
 0x9d8   : > { %1535 = vrot.lane.b32.xlu0 %v1533_v1, %s2863_s18 }
 0x9d9   : > { %v1558_v4 = vpop.permute.xlu1 %1557 }
 0x9da   : > { %v1560_v5 = vmul.f32 %v2779_v3, %v1558_v4 }
 0x9dc   : > { %1562 = vrot.lane.b32.xlu1 %v1560_v5, %s2863_s18 }
 0xa4a   : > { %v1536_v10 = vpop.permute.xlu0 %1535 }
 0xa4b   : > { %v3349_v16 = vadd.f32 %v1536_v10, %v1528_v9 }
 0xa4d   : > { %2780 = vtanh.f32 %v3349_v16  ;;  %v3409_v0 = vsel %vm1578_vm9, %v3349_v16, %v1526_v7 }
 0xa4e   : > { %v1563_v13 = vpop.permute.xlu1 %1562  ;;  %v1700_v1 = vrot.slane %v3409_v0, 6 }
 0xa4f   : > { %v3355_v23 = vadd.f32 %v1563_v13, %v1555_v20  ;;  %v3434_v20 = vstv %s1750_s30 }
 0xa50   : > { %vm1752_vm11 = vcmp.eq.s32.totalorder %v3434_v20, 1 }
 0xa51   : > { %2782 = vtanh.f32 %v3355_v23 }
 0xa57   : > { %v2781_v12 = vpop.eup %2780 }
 0xa58   : > { %1541 = vrot.lane.b32.xlu0 %v2781_v12, %s2863_s18 }
 0xa5b   : > { %v2783_v25 = vpop.eup %2782 }
 0xa5c   : > { %1568 = vrot.lane.b32.xlu1 %v2783_v25, %s2863_s18  ;;  %v3438_v25 = vstv %s1758_s16  ;;  %s2101_s16 = sadd.s32 6, %s3144_s27 }
 0xa5d   : > { %vm1760_vm12 = vcmp.eq.s32.totalorder %v3438_v25, 1  ;;  %p2102_p4 = scmp.lt.s32.totalorder %s2101_s16, 20 }
 0xa5f   : > { %s2105_s20 = scalar_select %p2102_p4, 1, 0 }
 0xaca   : > { %v1542_v30 = vpop.permute.xlu0 %1541 }
 0xacb   : > { %v1544_v17 = vmul.f32 %v2777_v54, %v1542_v30 }
 0xacd   : > { %v3368_v27 = vsel %vm1578_vm9, %v1544_v17, %v1580_v24 }
 0xace   : > { %v1569_v26 = vpop.permute.xlu1 %1568  ;;  %v1592_v31 = vpack.c.bf16 %v3368_v27, %v3368_v27 }
 0xacf   : > { %v1571_v33 = vmul.f32 %v2779_v3, %v1569_v26  ;;  %v3417_v3 = vsel %vm1586_vm10, %v3355_v23, %v1553_v11  ;;  %v1754_v23 = vrot.slane %v3368_v27, 6 }
 0xad0   : > { %v1594_v35 = vrot.slane %v1592_v31, 3  ;;  %v1727_v7 = vrot.slane %v3417_v3, 2 }
 0xad1   : > { %v3378_v19 = vsel %vm1586_vm10, %v1571_v33, %v1588_v22 }
 0xad2   : > { %1595 = vrot.lane.b32.xlu1 %v1594_v35, %s2864_s25  ;;  %v1641_v37 = vpack.c.bf16 %v3378_v19, %v3378_v19  ;;  %v1762_v17 = vrot.slane %v3378_v19, 2 }
 0xad4   : > { %1643 = vrot.lane.b32.xlu0 %v1641_v37, %s2864_s25 }
 0xb44   : > { %v1596_v38 = vpop.permute.xlu1 %1595 }
 0xb45   : > { %2631 = vmatmul.mubr.msk.bf16.vlgmr.msra.gmra.mrb[24].mxu0 %vm593_vm2, %v1596_v38 }
 0xb46   : > { %v1644_v39 = vpop.permute.xlu0 %1643  ;;  %2643 = vmatpush3.bf16.msra.mxu0 %v3036_v14  ;;  %2646 = vmatprep.mubr.msk.bf16.mxu0 %vm2862_vm1, %v2861_v2 }
 0xb47   : > { %2639 = vmatmul.mubr.msk.bf16.vlgmr.msra.gmra.mrb[24].mxu1 %vm593_vm2, %v1644_v39  ;;  %2644 = vmatprep.subr.bf16.mxu0 %v2861_v2 }
 0xb48   : > { %2651 = vmatpush3.bf16.msra.mxu1 %v3042_v15  ;;  %2654 = vmatprep.mubr.msk.bf16.mxu1 %vm2862_vm1, %v2861_v2 }
 0xb49   : > { %2652 = vmatprep.subr.bf16.mxu1 %v2861_v2 }
 0xb4a   : > { %2645 = vmatpush3.bf16.msra.mxu0 %v3058_v18 }
 0xb4b   : > { %2658 = vmatprep.subr.bf16.mxu0 %v2861_v2 }
 0xb4c   : > { %2653 = vmatpush3.bf16.msra.mxu1 %v3070_v21 }
 0xb4d   : > { %2666 = vmatprep.subr.bf16.mxu1 %v2861_v2 }
 0xc18   : > { %v1634_v32 = vpop.f32.mrb[24].mxu0 }
 0xc19   : > { %v1640_v41 = vadd.f32 %v1634_v32, %v3108_v36  ;;  %v2632_v42 = vpop.f32.mrb[25].mxu0 }
 0xc1a   : > { %v1637_v43 = vpop.f32.mrb[26].mxu0  ;;  %v1682_v34 = vpop.f32.mrb[24].mxu1 }
 0xc1b   : > { %2784 = vtanh.f32 %v1640_v41  ;;  %v1689_v40 = vrot.slane %v1682_v34, 2  ;;  %v2633_v44 = vpop.f32.mrb[27].mxu0  ;;  %v2640_v45 = vpop.f32.mrb[25].mxu1  ;;  %v2454_v53 = vmul.f32 -1.442695, %v1640_v41 }
 0xc1c   : > { %v1685_v47 = vpop.f32.mrb[26].mxu1 }
 0xc1d   : > { %v1691_v48 = vadd.f32 %v1689_v40, %v3113_v46  ;;  %v2641_v50 = vpop.f32.mrb[27].mxu1 }
 0xc1f   : > { %2786 = vtanh.f32 %v1691_v48  ;;  %v2455_v55 = vmul.f32 -1.442695, %v1691_v48 }
 0xc20   : > { %2788 = vpow2.f32 %v2454_v53 }
 0xc21   : > { %2790 = vpow2.f32 %v2455_v55 }
 0xc25   : > { %v2785_v51 = vpop.eup %2784 }
 0xc26   : > { %1704 = vrot.lane.b32.xlu0 %v2785_v51, %s2863_s18 }
 0xc29   : > { %v2787_v52 = vpop.eup %2786 }
 0xc2a   : > { %1731 = vrot.lane.b32.xlu1 %v2787_v52, %s2863_s18  ;;  %v2789_v56 = vpop.eup %2788 }
 0xc2b   : > { %v1695_v57 = vadd.f32 1.0, %v2789_v56  ;;  %v2791_v58 = vpop.eup %2790 }
 0xc2c   : > { %v1722_v59 = vadd.f32 1.0, %v2791_v58 }
 0xc2d   : > { %2792 = vrcp.f32 %v1695_v57 }
 0xc2e   : > { %2794 = vrcp.f32 %v1722_v59 }
 0xc37   : > { %v2793_v60 = vpop.eup %2792 }
 0xc38   : > { %v2795_v62 = vpop.eup %2794  ;;  %v1702_v4 = vmul.f32 %v2793_v60, %v1700_v1 }
 0xc39   : > { %v1729_v9 = vmul.f32 %v2795_v62, %v1727_v7 }
 0xc98   : > { %v1705_v49 = vpop.permute.xlu0 %1704 }
 0xc99   : > { %v1707_v61 = vmul.f32 %v2793_v60, %v1705_v49 }
 0xc9b   : > { %1709 = vrot.lane.b32.xlu0 %v1707_v61, %s2863_s18 }
 0xc9c   : > { %v1732_v63 = vpop.permute.xlu1 %1731 }
 0xc9d   : > { %v1734_v54 = vmul.f32 %v2795_v62, %v1732_v63 }
 0xc9f   : > { %1736 = vrot.lane.b32.xlu1 %v1734_v54, %s2863_s18 }
 0xd0d   : > { %v1710_v5 = vpop.permute.xlu0 %1709 }
 0xd0e   : > { %v3421_v6 = vadd.f32 %v1710_v5, %v1702_v4  ;;  %v3506_v5 = vstv %s1927_s24  ;;  %s2113_s24 = scalar_select %p2104_p5, 1, 0 }
 0xd0f   : > { %vm1929_vm13 = vcmp.eq.s32.totalorder %v3506_v5, 1 }
 0xd10   : > { %2796 = vtanh.f32 %v3421_v6  ;;  %v3481_v58 = vsel %vm1752_vm11, %v3421_v6, %v1700_v1 }
 0xd11   : > { %v1737_v8 = vpop.permute.xlu1 %1736  ;;  %v1877_v59 = vrot.slane %v3481_v58, 6 }
 0xd12   : > { %v3427_v10 = vadd.f32 %v1737_v8, %v1729_v9 }
 0xd14   : > { %2798 = vtanh.f32 %v3427_v10  ;;  %v3491_v61 = vsel %vm1760_vm12, %v3427_v10, %v1727_v7 }
 0xd15   : > { %v1904_v63 = vrot.slane %v3491_v61, 2 }
 0xd1a   : > { %v2797_v16 = vpop.eup %2796 }
 0xd1b   : > { %1715 = vrot.lane.b32.xlu0 %v2797_v16, %s2863_s18  ;;  %v3516_v16 = vstv %s1935_s10  ;;  %s2276_s10 = sadd.s32 7, %s3144_s27 }
 0xd1c   : > { %vm1937_vm14 = vcmp.eq.s32.totalorder %v3516_v16, 1  ;;  %p2277_p6 = scmp.lt.s32.totalorder %s2276_s10, 20 }
 0xd1e   : > { %v2799_v11 = vpop.eup %2798  ;;  %s2279_s22 = scalar_select %p2277_p6, 1, 0 }
 0xd1f   : > { %1742 = vrot.lane.b32.xlu1 %v2799_v11, %s2863_s18 }
 0xd8d   : > { %v1716_v13 = vpop.permute.xlu0 %1715 }
 0xd8e   : > { %v1718_v12 = vmul.f32 %v2793_v60, %v1716_v13 }
 0xd90   : > { %v3442_v29 = vsel %vm1752_vm11, %v1718_v12, %v1754_v23 }
 0xd91   : > { %v1743_v30 = vpop.permute.xlu1 %1742  ;;  %v1766_v24 = vpack.c.bf16 %v3442_v29, %v3442_v29  ;;  %v1931_v7 = vrot.slane %v3442_v29, 6 }
 0xd92   : > { %v1745_v28 = vmul.f32 %v2795_v62, %v1743_v30 }
 0xd93   : > { %1768 = vrot.lane.b32.xlu0 %v1766_v24, %s2864_s25  ;;  %v2848_v24 = vld [vmem:[%s3645_s8] sm:$0xff]  }
 0xd94   : > { %v3451_v27 = vsel %vm1760_vm12, %v1745_v28, %v1762_v17  ;;  %v2849_v28 = vld [vmem:[%s3645_s8 + $0x8] sm:$0xff]  }
 0xd95   : > { %v1817_v26 = vpack.c.bf16 %v3451_v27, %v3451_v27  ;;  %v1939_v13 = vrot.slane %v3451_v27, 2  ;;  %v2850_v27 = vld [vmem:[%s3646_s9] sm:$0xff]  }
 0xd97   : > { %v1819_v31 = vrot.slane %v1817_v26, 3  ;;  %v2851_v26 = vld [vmem:[%s3646_s9 + $0x8] sm:$0xff]  }
 0xd99   : > { %1820 = vrot.lane.b32.xlu1 %v1819_v31, %s2864_s25 }
 0xe05   : > { %v1769_v22 = vpop.permute.xlu0 %1768 }
 0xe06   : > { %2647 = vmatmul.mubr.msk.bf16.vlgmr.msra.gmra.mrb[28].mxu0 %vm593_vm2, %v1769_v22 }
 0xe07   : > { %2659 = vmatpush3.bf16.msra.mxu0 %v3036_v14  ;;  %2662 = vmatprep.mubr.msk.bf16.mxu0 %vm2862_vm1, %v2861_v2 }
 0xe08   : > { %2660 = vmatprep.subr.bf16.mxu0 %v2861_v2 }
 0xe0b   : > { %v1821_v33 = vpop.permute.xlu1 %1820  ;;  %2661 = vmatpush3.bf16.msra.mxu0 %v3058_v18 }
 0xe0c   : > { %2655 = vmatmul.mubr.msk.bf16.vlgmr.msra.gmra.mrb[28].mxu1 %vm593_vm2, %v1821_v33  ;;  %2674 = vmatprep.subr.bf16.mxu0 %v2861_v2 }
 0xe0d   : > { %2667 = vmatpush3.bf16.msra.mxu1 %v3042_v15  ;;  %2670 = vmatprep.mubr.msk.bf16.mxu1 %vm2862_vm1, %v2861_v2 }
 0xe0e   : > { %2668 = vmatprep.subr.bf16.mxu1 %v2861_v2 }
 0xe11   : > { %2669 = vmatpush3.bf16.msra.mxu1 %v3070_v21 }
 0xe12   : > { %2682 = vmatprep.subr.bf16.mxu1 %v2861_v2 }
 0xed9   : > { %v1807_v14 = vpop.f32.mrb[28].mxu0 }
 0xeda   : > { %v1814_v35 = vrot.slane %v1807_v14, 6  ;;  %v2648_v19 = vpop.f32.mrb[29].mxu0 }
 0xedb   : > { %v1810_v37 = vpop.f32.mrb[30].mxu0 }
 0xedc   : > { %v1816_v18 = vadd.f32 %v1814_v35, %v3108_v36  ;;  %v2649_v38 = vpop.f32.mrb[31].mxu0 }
 0xede   : > { %2800 = vtanh.f32 %v1816_v18  ;;  %v2458_v40 = vmul.f32 -1.442695, %v1816_v18 }
 0xedf   : > { %v1859_v39 = vpop.f32.mrb[28].mxu1 }
 0xee0   : > { %v1866_v32 = vrot.slane %v1859_v39, 4  ;;  %v2656_v15 = vpop.f32.mrb[29].mxu1 }
 0xee1   : > { %v1862_v41 = vpop.f32.mrb[30].mxu1 }
 0xee2   : > { %v1868_v42 = vadd.f32 %v1866_v32, %v3113_v46  ;;  %v2657_v43 = vpop.f32.mrb[31].mxu1 }
 0xee4   : > { %2802 = vtanh.f32 %v1868_v42  ;;  %v2459_v44 = vmul.f32 -1.442695, %v1868_v42 }
 0xee5   : > { %2804 = vpow2.f32 %v2458_v40 }
 0xee6   : > { %2806 = vpow2.f32 %v2459_v44 }
 0xee8   : > { %v2801_v34 = vpop.eup %2800 }
 0xee9   : > { %1881 = vrot.lane.b32.xlu0 %v2801_v34, %s2863_s18 }
 0xeee   : > { %v2803_v21 = vpop.eup %2802 }
 0xeef   : > { %1908 = vrot.lane.b32.xlu1 %v2803_v21, %s2863_s18  ;;  %v2805_v45 = vpop.eup %2804 }
 0xef0   : > { %v1872_v47 = vadd.f32 1.0, %v2805_v45  ;;  %v2807_v48 = vpop.eup %2806 }
 0xef1   : > { %v1899_v50 = vadd.f32 1.0, %v2807_v48 }
 0xef2   : > { %2808 = vrcp.f32 %v1872_v47 }
 0xef3   : > { %2810 = vrcp.f32 %v1899_v50 }
 0xefc   : > { %v2809_v51 = vpop.eup %2808 }
 0xefd   : > { %v2811_v55 = vpop.eup %2810  ;;  %v1879_v60 = vmul.f32 %v2809_v51, %v1877_v59 }
 0xefe   : > { %v1906_v54 = vmul.f32 %v2811_v55, %v1904_v63 }
 0xf5b   : > { %v1882_v52 = vpop.permute.xlu0 %1881 }
 0xf5c   : > { %v1884_v53 = vmul.f32 %v2809_v51, %v1882_v52 }
 0xf5e   : > { %1886 = vrot.lane.b32.xlu0 %v1884_v53, %s2863_s18 }
 0xf61   : > { %v1909_v56 = vpop.permute.xlu1 %1908 }
 0xf62   : > { %v1911_v57 = vmul.f32 %v2811_v55, %v1909_v56 }
 0xf64   : > { %1913 = vrot.lane.b32.xlu1 %v1911_v57, %s2863_s18 }
 0xfd0   : > { %v1887_v49 = vpop.permute.xlu0 %1886 }
 0xfd1   : > { %v3493_v62 = vadd.f32 %v1887_v49, %v1879_v60 }
 0xfd3   : > { %2812 = vtanh.f32 %v3493_v62  ;;  %v3559_v53 = vsel %vm1929_vm13, %v3493_v62, %v1877_v59 }
 0xfd6   : > { %v1914_v0 = vpop.permute.xlu1 %1913 }
 0xfd7   : > { %v3499_v1 = vadd.f32 %v1914_v0, %v1906_v54 }
 0xfd9   : > { %2814 = vtanh.f32 %v3499_v1  ;;  %v3569_v60 = vsel %vm1937_vm14, %v3499_v1, %v1904_v63  ;;  %v2106_v63 = vstv %s2105_s20 }
 0xfda   : > { %v2082_v59 = vrot.slane %v3569_v60, 2  ;;  %vm2107_vm15 = vcmp.eq.s32.totalorder %v2106_v63, 1 }
 0xfdd   : > { %v2813_v3 = vpop.eup %2812 }
 0xfde   : > { %1892 = vrot.lane.b32.xlu0 %v2813_v3, %s2863_s18 }
 0xfe3   : > { %v2815_v4 = vpop.eup %2814 }
 0xfe4   : > { %1919 = vrot.lane.b32.xlu1 %v2815_v4, %s2863_s18 }
0x1050   : > { %v1893_v6 = vpop.permute.xlu0 %1892 }
0x1051   : > { %v1895_v9 = vmul.f32 %v2809_v51, %v1893_v6 }
0x1053   : > { %v3512_v8 = vsel %vm1929_vm13, %v1895_v9, %v1931_v7  ;;  %v2114_v7 = vstv %s2113_s24 }
0x1054   : > { %v1943_v10 = vpack.c.bf16 %v3512_v8, %v3512_v8  ;;  %v2109_v3 = vrot.slane %v3512_v8, 6  ;;  %vm2115_vm0 = vcmp.eq.s32.totalorder %v2114_v7, 1 }
0x1056   : > { %v1920_v11 = vpop.permute.xlu1 %1919  ;;  %v1945_v20 = vrot.slane %v1943_v10, 1 }
0x1057   : > { %v1922_v23 = vmul.f32 %v2811_v55, %v1920_v11  ;;  %v2055_v55 = vrot.slane %v3559_v53, 6  ;;  %v2280_v53 = vstv %s2279_s22 }
0x1058   : > { %1946 = vrot.lane.b32.xlu0 %v1945_v20, %s2864_s25 }
0x1059   : > { %v3523_v12 = vsel %vm1937_vm14, %v1922_v23, %v1939_v13 }
0x105a   : > { %v1995_v25 = vpack.c.bf16 %v3523_v12, %v3523_v12  ;;  %v2117_v16 = vrot.slane %v3523_v12, 2 }
0x105c   : > { %v1997_v29 = vrot.slane %v1995_v25, 2 }
0x105e   : > { %1998 = vrot.lane.b32.xlu1 %v1997_v29, %s2864_s25 }
0x10ca   : > { %v1947_v30 = vpop.permute.xlu0 %1946 }
0x10cb   : > { %2663 = vmatmul.mubr.msk.bf16.vlgmr.msra.gmra.mrb[32].mxu0 %vm593_vm2, %v1947_v30 }
0x10cc   : > { %2675 = vmatpush3.bf16.msra.mxu0 %v2848_v24  ;;  %2678 = vmatprep.mubr.msk.bf16.mxu0 %vm2862_vm1, %v2861_v2 }
0x10cd   : > { %2676 = vmatprep.subr.bf16.mxu0 %v2861_v2 }
0x10d0   : > { %v1999_v17 = vpop.permute.xlu1 %1998  ;;  %2677 = vmatpush3.bf16.msra.mxu0 %v2849_v28 }
0x10d1   : > { %2671 = vmatmul.mubr.msk.bf16.vlgmr.msra.gmra.mrb[32].mxu1 %vm593_vm2, %v1999_v17 }
0x10d2   : > { %2683 = vmatpush3.bf16.msra.mxu1 %v2850_v27  ;;  %2686 = vmatprep.mubr.msk.bf16.mxu1 %vm2862_vm1, %v2861_v2  ;;  %vm2281_vm1 = vcmp.eq.s32.totalorder %v2280_v53, 1 }
0x10d3   : > { %2684 = vmatprep.subr.bf16.mxu1 %v2861_v2 }
0x10d6   : > { %2685 = vmatpush3.bf16.msra.mxu1 %v2851_v26 }
0x119e   : > { %v1985_v31 = vpop.f32.mrb[32].mxu0 }
0x119f   : > { %v1992_v22 = vrot.slane %v1985_v31, 4  ;;  %v2664_v33 = vpop.f32.mrb[33].mxu0 }
0x11a0   : > { %v1988_v14 = vpop.f32.mrb[34].mxu0 }
0x11a1   : > { %v1994_v35 = vadd.f32 %v1992_v22, %v3108_v36  ;;  %v2665_v19 = vpop.f32.mrb[35].mxu0 }
0x11a3   : > { %2816 = vtanh.f32 %v1994_v35  ;;  %v2462_v42 = vmul.f32 -1.442695, %v1994_v35 }
0x11a4   : > { %v2037_v37 = vpop.f32.mrb[32].mxu1 }
0x11a5   : > { %v2044_v18 = vrot.slane %v2037_v37, 6  ;;  %v2672_v38 = vpop.f32.mrb[33].mxu1 }
0x11a6   : > { %v2040_v39 = vpop.f32.mrb[34].mxu1 }
0x11a7   : > { %v2046_v32 = vadd.f32 %v2044_v18, %v3113_v46  ;;  %v2673_v2 = vpop.f32.mrb[35].mxu1 }
0x11a9   : > { %2818 = vtanh.f32 %v2046_v32  ;;  %v2463_v43 = vmul.f32 -1.442695, %v2046_v32 }
0x11aa   : > { %2820 = vpow2.f32 %v2462_v42 }
0x11ab   : > { %2822 = vpow2.f32 %v2463_v43 }
0x11ad   : > { %v2817_v15 = vpop.eup %2816 }
0x11ae   : > { %2059 = vrot.lane.b32.xlu0 %v2817_v15, %s2863_s18 }
0x11b3   : > { %v2819_v41 = vpop.eup %2818 }
0x11b4   : > { %2086 = vrot.lane.b32.xlu1 %v2819_v41, %s2863_s18  ;;  %v2821_v34 = vpop.eup %2820 }
0x11b5   : > { %v2050_v21 = vadd.f32 1.0, %v2821_v34  ;;  %v2823_v40 = vpop.eup %2822 }
0x11b6   : > { %v2077_v44 = vadd.f32 1.0, %v2823_v40 }
0x11b7   : > { %2824 = vrcp.f32 %v2050_v21 }
0x11b8   : > { %2826 = vrcp.f32 %v2077_v44 }
0x11c1   : > { %v2825_v45 = vpop.eup %2824 }
0x11c2   : > { %v2827_v50 = vpop.eup %2826  ;;  %v2057_v56 = vmul.f32 %v2825_v45, %v2055_v55 }
0x11c3   : > { %v2084_v49 = vmul.f32 %v2827_v50, %v2082_v59 }
0x1220   : > { %v2060_v47 = vpop.permute.xlu0 %2059 }
0x1221   : > { %v2062_v48 = vmul.f32 %v2825_v45, %v2060_v47 }
0x1223   : > { %2064 = vrot.lane.b32.xlu0 %v2062_v48, %s2863_s18 }
0x1226   : > { %v2087_v51 = vpop.permute.xlu1 %2086 }
0x1227   : > { %v2089_v52 = vmul.f32 %v2827_v50, %v2087_v51 }
0x1229   : > { %2091 = vrot.lane.b32.xlu1 %v2089_v52, %s2863_s18 }
0x1295   : > { %v2065_v57 = vpop.permute.xlu0 %2064 }
0x1296   : > { %v3571_v58 = vadd.f32 %v2065_v57, %v2057_v56  ;;  %v2288_v56 = vstv %s2287_s23 }
0x1298   : > { %2828 = vtanh.f32 %v3571_v58  ;;  %v2112_v43 = vsel %vm2107_vm15, %v3571_v58, %v2055_v55 }
0x1299   : > { %v2230_v34 = vrot.slane %v2112_v43, 6 }
0x129b   : > { %v2092_v62 = vpop.permute.xlu1 %2091 }
0x129c   : > { %v3577_v54 = vadd.f32 %v2092_v62, %v2084_v49 }
0x129e   : > { %2830 = vtanh.f32 %v3577_v54  ;;  %v2120_v21 = vsel %vm2115_vm0, %v3577_v54, %v2082_v59 }
0x129f   : > { %v2257_v47 = vrot.slane %v2120_v21, 2 }
0x12a2   : > { %v2829_v61 = vpop.eup %2828 }
0x12a3   : > { %2070 = vrot.lane.b32.xlu0 %v2829_v61, %s2863_s18 }
0x12a8   : > { %v2831_v0 = vpop.eup %2830 }
0x12a9   : > { %2097 = vrot.lane.b32.xlu1 %v2831_v0, %s2863_s18 }
0x1315   : > { %v2071_v1 = vpop.permute.xlu0 %2070 }
0x1316   : > { %v2073_v4 = vmul.f32 %v2825_v45, %v2071_v1 }
0x1318   : > { %v3586_v5 = vsel %vm2107_vm15, %v2073_v4, %v2109_v3 }
0x1319   : > { %v2121_v6 = vpack.c.bf16 %v3586_v5, %v3586_v5  ;;  %v2283_v59 = vrot.slane %v3586_v5, 6 }
0x131b   : > { %v2098_v9 = vpop.permute.xlu1 %2097  ;;  %v2123_v10 = vrot.slane %v2121_v6, 2 }
0x131c   : > { %v2100_v11 = vmul.f32 %v2827_v50, %v2098_v9 }
0x131d   : > { %2124 = vrot.lane.b32.xlu0 %v2123_v10, %s2864_s25 }
0x131e   : > { %v3593_v8 = vsel %vm2115_vm0, %v2100_v11, %v2117_v16 }
0x131f   : > { %v2173_v20 = vpack.c.bf16 %v3593_v8, %v3593_v8  ;;  %v2291_v61 = vrot.slane %v3593_v8, 2 }
0x1321   : > { %v2175_v13 = vrot.slane %v2173_v20, 1 }
0x1323   : > { %2176 = vrot.lane.b32.xlu1 %v2175_v13, %s2864_s25 }
0x138f   : > { %v2125_v23 = vpop.permute.xlu0 %2124 }
0x1390   : > { %2679 = vmatmul.mubr.msk.bf16.vlgmr.msra.gmra.mrb[36].mxu0 %vm593_vm2, %v2125_v23 }
0x1395   : > { %v2177_v25 = vpop.permute.xlu1 %2176 }
0x1396   : > { %2687 = vmatmul.mubr.msk.bf16.vlgmr.msra.gmra.mrb[36].mxu1 %vm593_vm2, %v2177_v25  ;;  %vm2289_vm2 = vcmp.eq.s32.totalorder %v2288_v56, 1 }
0x1463   : > { %v2163_v12 = vpop.f32.mrb[36].mxu0 }
0x1464   : > { %v2170_v29 = vrot.slane %v2163_v12, 2  ;;  %v2680_v30 = vpop.f32.mrb[37].mxu0 }
0x1465   : > { %v2166_v24 = vpop.f32.mrb[38].mxu0 }
0x1466   : > { %v2172_v17 = vadd.f32 %v2170_v29, %v3108_v36  ;;  %v2681_v28 = vpop.f32.mrb[39].mxu0 }
0x1468   : > { %2832 = vtanh.f32 %v2172_v17  ;;  %v2466_v19 = vmul.f32 -1.442695, %v2172_v17 }
0x1469   : > { %v2215_v27 = vpop.f32.mrb[36].mxu1 }
0x146a   : > { %v2221_v26 = vadd.f32 %v2215_v27, %v3113_v46  ;;  %v2688_v31 = vpop.f32.mrb[37].mxu1 }
0x146b   : > { %v2218_v22 = vpop.f32.mrb[38].mxu1 }
0x146c   : > { %2834 = vtanh.f32 %v2221_v26  ;;  %v2689_v33 = vpop.f32.mrb[39].mxu1  ;;  %v2467_v37 = vmul.f32 -1.442695, %v2221_v26 }
0x146d   : > { %2836 = vpow2.f32 %v2466_v19 }
0x146e   : > { %2838 = vpow2.f32 %v2467_v37 }
0x1472   : > { %v2833_v14 = vpop.eup %2832 }
0x1473   : > { %2234 = vrot.lane.b32.xlu0 %v2833_v14, %s2863_s18 }
0x1476   : > { %v2835_v35 = vpop.eup %2834 }
0x1477   : > { %2261 = vrot.lane.b32.xlu1 %v2835_v35, %s2863_s18  ;;  %v2837_v36 = vpop.eup %2836 }
0x1478   : > { %v2225_v18 = vadd.f32 1.0, %v2837_v36  ;;  %v2839_v38 = vpop.eup %2838 }
0x1479   : > { %v2252_v39 = vadd.f32 1.0, %v2839_v38 }
0x147a   : > { %2840 = vrcp.f32 %v2225_v18 }
0x147b   : > { %2842 = vrcp.f32 %v2252_v39 }
0x1484   : > { %v2841_v46 = vpop.eup %2840 }
0x1485   : > { %v2843_v15 = vpop.eup %2842  ;;  %v2232_v40 = vmul.f32 %v2841_v46, %v2230_v34 }
0x1486   : > { %v2259_v48 = vmul.f32 %v2843_v15, %v2257_v47 }
0x14e5   : > { %v2235_v32 = vpop.permute.xlu0 %2234 }
0x14e6   : > { %v2237_v2 = vmul.f32 %v2841_v46, %v2235_v32 }
0x14e8   : > { %2239 = vrot.lane.b32.xlu0 %v2237_v2, %s2863_s18 }
0x14e9   : > { %v2262_v41 = vpop.permute.xlu1 %2261 }
0x14ea   : > { %v2264_v42 = vmul.f32 %v2843_v15, %v2262_v41 }
0x14ec   : > { %2266 = vrot.lane.b32.xlu1 %v2264_v42, %s2863_s18 }
0x155a   : > { %v2240_v44 = vpop.permute.xlu0 %2239 }
0x155b   : > { %v2242_v45 = vadd.f32 %v2240_v44, %v2232_v40 }
0x155d   : > { %2844 = vtanh.f32 %v2242_v45  ;;  %v2286_v57 = vsel %vm2281_vm1, %v2242_v45, %v2230_v34 }
0x155e   : > { %v2267_v50 = vpop.permute.xlu1 %2266 }
0x155f   : > { %v2269_v51 = vadd.f32 %v2267_v50, %v2259_v48 }
0x1561   : > { %2846 = vtanh.f32 %v2269_v51  ;;  %v2294_v60 = vsel %vm2289_vm2, %v2269_v51, %v2257_v47 }
0x1567   : > { %v2845_v52 = vpop.eup %2844 }
0x1568   : > { %2245 = vrot.lane.b32.xlu0 %v2845_v52, %s2863_s18 }
0x156b   : > { %v2847_v55 = vpop.eup %2846 }
0x156c   : > { %2272 = vrot.lane.b32.xlu1 %v2847_v55, %s2863_s18 }
0x1570   : > { %2302 = vrot.lane.b32.xlu1 %v2286_v57, %s2865_s11 }
0x1574   : > { %2313 = vrot.lane.b32.xlu1 %v2294_v60, %s2865_s11 }
0x15da   : > { %v2246_v58 = vpop.permute.xlu0 %2245 }
0x15db   : > { %v2248_v49 = vmul.f32 %v2841_v46, %v2246_v58 }
0x15dd   : > { %v2285_v62 = vsel %vm2281_vm1, %v2248_v49, %v2283_v59 }
0x15de   : > { %2296 = vrot.lane.b32.xlu0 %v2285_v62, %s2864_s25  ;;  %v2273_v54 = vpop.permute.xlu1 %2272 }
0x15df   : > { %v2275_v0 = vmul.f32 %v2843_v15, %v2273_v54 }
0x15e1   : > { %v2293_v63 = vsel %vm2289_vm2, %v2275_v0, %v2291_v61 }
0x15e2   : > { %2307 = vrot.lane.b32.xlu0 %v2293_v63, %s2864_s25  ;;  %v2303_v1 = vpop.permute.xlu1 %2302 }
0x15e3   : > { %2305 = vst.msk [vmem:[%s3650_s13 - $0x6] sm:$0xc0] %vm2299_vm3, %v2303_v1 }
0x15e6   : > { %v2314_v3 = vpop.permute.xlu1 %2313 }
0x15e7   : > { %2316 = vst.msk [vmem:[%s3652_s15] sm:$0x3] %vm2310_vm4, %v2314_v3 }
0x1650   : > { %v2297_v4 = vpop.permute.xlu0 %2296 }
0x1651   : > { %2300 = vst.msk [vmem:[%s3649_s12 - $0x6] sm:$0xc0] %vm2299_vm3, %v2297_v4 }
0x1654   : > { %v2308_v5 = vpop.permute.xlu0 %2307 }
0x1655   : > { %2311 = vst.msk [vmem:[%s3651_s14] sm:$0x3] %vm2310_vm4, %v2308_v5 }
0x1656 PF: > { %s3663_s25 = sld [smem:[#allocation2_spill]] }
0x165c   : > { %s26_s18 = sadd.s32 1, %s3663_s25  }
0x165d   : > { %p23_p8 = scmp.ge.s32.totalorder %s26_s18, 5  }
0x165f   :  { %25 = sbr.rel (!%p23_p8) target bundleno = 3 (0x3), region = 131 }

// kernel: encoder_forward.2
= control target key start
LH: loop header
LB: loop body
LE: loop exit
PB: predicated region body
PF: predicated region fallthrough
CT: control target
= control target key end

     0   :  { %s2829_s25 = smov 0   ;;  %s3569_s0 = inlined_call_operand.vmem [shape: bf16[48,32], index: 0, kind: input, shape index: {}, may-alias: {0,1}]   ;;  %s3570_s1 = inlined_call_operand.vmem [shape: bf16[48,32], index: 1, kind: input, shape index: {}, may-alias: {0,1}]   ;;  %s3571_s2 = inlined_call_operand.vmem [shape: bf16[32,128], index: 2, kind: input, shape index: {}]   ;;  %s3572_s3 = inlined_call_operand.vmem [shape: bf16[32,128], index: 3, kind: input, shape index: {}]   ;;  %s3573_s4 = inlined_call_operand.vmem [shape: bf16[32,128], index: 4, kind: input, shape index: {}]   ;;  %s3574_s5 = inlined_call_operand.vmem [shape: bf16[32,128], index: 5, kind: input, shape index: {}]   ;;  %s3575_s6 = inlined_call_operand.vmem [shape: f32[1,128], index: 6, kind: input, shape index: {}]   ;;  %s3576_s7 = inlined_call_operand.vmem [shape: f32[1,128], index: 7, kind: input, shape index: {}]   ;;  %s3577_s8 = inlined_call_operand.vmem [shape: bf16[48,32], index: 8, kind: output, shape index: {0}]   ;;  %s3578_s9 = inlined_call_operand.vmem [shape: bf16[48,32], index: 9, kind: output, shape index: {1}]   ;;  %s3579_s10 = inlined_call_operand.vmem [shape: f32[2,32], index: 10, kind: output, shape index: {2}]   ;;  %s3580_s11 = inlined_call_operand.vmem [shape: f32[2,32], index: 11, kind: output, shape index: {3}]   ;;  %s3581_s12 = inlined_call_operand.vmem [shape: f32[2,32], index: 12, kind: output, shape index: {4}]   ;;  %s3582_s13 = inlined_call_operand.vmem [shape: f32[2,32], index: 13, kind: output, shape index: {5}]  }
   0x1 LB: > { %3585 = sst [smem:[#allocation4_spill]] %s2751_s25  ;;  %s2835_s26 = sadd.s32 4294967295, %s2751_s25   ;;  %s2751_s25 = sphi %s2829_s25, %s24_s25  }
   0x2   : > { %p2323_p0 = scmp.ge.s32.totalorder %s2751_s25, 1  ;;  %p396_p1 = scmp.lt.s32.totalorder %s2751_s25, 4 }
   0x4   : > { %p397_p2 = pnand %p2323_p0, %p396_p1 }
   0x5   : > { %s2324_s27 = sshll.u32 (!%p397_p2), %s2835_s26, 1  ;;  %s3583_s28 = ssub.s32 (!%p397_p2), 2, %s2835_s26 }
   0x6   : > { %400 = sbr.rel (%p397_p2) target bundleno = 5720 (0x1658), region = 52  ;;  %p453_p3 = scmp.lt.s32.totalorder (!%p397_p2), %s2324_s27, 5 }
   0x7   : > { %s2326_s29 = sshll.u32 (!%p397_p2), %s3583_s28, 1  ;;  %p2332_p5 = scmp.ne.s32.totalorder (!%p397_p2), %s2835_s26, 0 }
   0x8   : > { %p460_p4 = scmp.lt.s32.totalorder (!%p397_p2), %s2326_s29, 5 }
   0xd   : > { %s3593_s27 = smov (!%p453_p3, %s2324_s27), 5  ;;  %s3595_s29 = smov (!%p460_p4, %s2326_s29), 5 }
   0xe   : > { %s2325_s30 = sshll.u32 %s3593_s27, 2  ;;  %s2327_s17 = sshll.u32 %s3595_s29, 2  ;;  %vm485_vm0 = vcmask (!%p2332_p5), 254976   ;;  %v2753_v0 = vmov (!%p2332_p5), 0.0  }
   0xf   : > { %s456_s16 = scalar_lea.vmem %s3569_s0, %s2325_s30  ;;  %s463_s20 = scalar_lea.vmem %s3570_s1, %s2327_s17  ;;  %486 = vst.msk [vmem:[%s3579_s10] sm:$0x3] (!%p2332_p5), %vm485_vm0, %v2753_v0  ;;  %487 = vst.msk [vmem:[%s3580_s11] sm:$0x3] (!%p2332_p5), %vm485_vm0, %v2753_v0 }
  0x10   : > { %s2852_s23 = scalar_lea.vmem %s3577_s8, %s2325_s30  ;;  %s2857_s25 = scalar_lea.vmem %s3578_s9, %s2327_s17  ;;  %488 = vst.msk [vmem:[%s3581_s12] sm:$0x3] (!%p2332_p5), %vm485_vm0, %v2753_v0  ;;  %489 = vst.msk [vmem:[%s3582_s13] sm:$0x3] (!%p2332_p5), %vm485_vm0, %v2753_v0 }
  0x11   : > { %484 = sbr.rel (%p2332_p5) target bundleno = 24 (0x18), region = 56 }
  0x18 PF: > { %v2603_v1 = vld [vmem:[%s3572_s3] sm:$0xff]   ;;  %v2754_v2 = vmov 0.0   ;;  %v2605_v4 = vld [vmem:[%s3572_s3 + $0x8] sm:$0xff]   ;;  %vm2755_vm1 = vmmov 0   ;;  %vm520_vm2 = vcmask 261120   ;;  %s2756_s30 = smov 32  }
  0x19   : > { %2453 = vmatprep.subr.bf16.mxu1 %v2754_v2  ;;  %2445 = vmatprep.subr.bf16.mxu0 %v2754_v2  ;;  %v2604_v3 = vld [vmem:[%s3571_s2] sm:$0xff]   ;;  %v2606_v5 = vld [vmem:[%s3571_s2 + $0x8] sm:$0xff]   ;;  %s2757_s21 = smov 64   ;;  %s3586_s22 = ssub.s32 2, %s2835_s26 }
  0x1a   : > { %2454 = vmatpush3.bf16.msra.mxu1 %v2603_v1  ;;  %2457 = vmatprep.mubr.msk.bf16.mxu1 %vm2755_vm1, %v2754_v2  ;;  %v2607_v6 = vld [vmem:[%s463_s20] sm:$0xff]   ;;  %v2910_v10 = vld [vmem:[%s3574_s5 + $0x8] sm:$0xff]   ;;  %s3004_s24 = sshll.u32 %s3586_s22, 3  ;;  %s3008_s29 = sshll.u32 %s2835_s26, 3 }
  0x1b   : > { %2446 = vmatpush3.bf16.msra.mxu0 %v2604_v3  ;;  %2455 = vmatprep.subr.bf16.mxu1 %v2754_v2  ;;  %v2608_v7 = vld [vmem:[%s456_s16] sm:$0xff]   ;;  %v2925_v13 = vld [vmem:[%s3573_s4 + $0x8] sm:$0xff]   ;;  %s829_s27 = sadd.s32 7, %s3004_s24  ;;  %p826_p7 = scmp.lt.s32.totalorder %s3008_s29, 20 }
  0x1c   : > { %2447 = vmatprep.subr.bf16.mxu0 %v2754_v2  ;;  %2449 = vmatprep.mubr.msk.bf16.mxu0 %vm2755_vm1, %v2754_v2  ;;  %v2895_v8 = vld [vmem:[%s3574_s5] sm:$0xff]   ;;  %p830_p6 = scmp.lt.s32.totalorder %s829_s27, 20  ;;  %s1021_s26 = sadd.s32 6, %s3004_s24 }
  0x1d   : > { %v2901_v9 = vld [vmem:[%s3573_s4] sm:$0xff]   ;;  %s831_s15 = scalar_select %p826_p7, 1, 0 }
  0x1e   : > { %2456 = vmatpush3.bf16.msra.mxu1 %v2605_v4  ;;  %v2915_v11 = vld [vmem:[%s3581_s12] sm:$0x3]  ;;  %s840_s14 = scalar_select %p830_p6, 1, 0 }
  0x1f   : > { %2448 = vmatpush3.bf16.msra.mxu0 %v2606_v5  ;;  %2469 = vmatprep.subr.bf16.mxu1 %v2754_v2  ;;  %v650_v12 = vld [vmem:[%s3582_s13] sm:$0x3]  ;;  %v708_v16 = vpack.c.bf16 %v2915_v11, %v2915_v11  ;;  %v844_v4 = vrot.slane %v2915_v11, 2  ;;  %p1022_p8 = scmp.lt.s32.totalorder %s1021_s26, 20  ;;  %s1019_s18 = sadd.s32 1, %s3008_s29 }
  0x20   : > { %2461 = vmatprep.subr.bf16.mxu0 %v2754_v2  ;;  %v2930_v14 = vld [vmem:[%s3579_s10] sm:$0x3]  ;;  %v804_v15 = vrot.slane %v650_v12, 2  ;;  %p1020_p9 = scmp.lt.s32.totalorder %s1019_s18, 20  ;;  %s1209_s16 = sadd.s32 5, %s3004_s24 }
  0x21   : > { %2458 = vmatmul.mubr.msk.bf16.vlgmr.msra.gmra.mrb[0].mxu1 %vm520_vm2, %v2607_v6  ;;  %v651_v17 = vpack.c.bf16 %v2930_v14, %v2930_v14  ;;  %v648_v18 = vld [vmem:[%s3580_s11] sm:$0x3]  ;;  %s1030_s28 = scalar_select %p1022_p8, 1, 0 }
  0x22   : > { %2450 = vmatmul.mubr.msk.bf16.vlgmr.msra.gmra.mrb[0].mxu0 %vm520_vm2, %v2608_v7  ;;  %2470 = vmatpush3.bf16.msra.mxu1 %v2895_v8  ;;  %v2338_v19 = vld [vmem:[%s3576_s7] ss:$0 sm:$0xff]  ;;  %v3011_v7 = vstv %s840_s14  ;;  %s1023_s17 = scalar_select %p1020_p9, 1, 0 }
  0x23   : > { %2462 = vmatpush3.bf16.msra.mxu0 %v2901_v9  ;;  %2471 = vmatprep.subr.bf16.mxu1 %v2754_v2  ;;  %v2333_v23 = vld [vmem:[%s3575_s6] ss:$0 sm:$0xff]  ;;  %vm842_vm3 = vcmp.eq.s32.totalorder %v3011_v7, 1  ;;  %p1210_p10 = scmp.lt.s32.totalorder %s1209_s16, 20  ;;  %s1207_s20 = sadd.s32 2, %s3008_s29 }
  0x24   : > { %2463 = vmatprep.subr.bf16.mxu0 %v2754_v2  ;;  %2473 = vmatprep.mubr.msk.bf16.mxu1 %vm2755_vm1, %v2754_v2  ;;  %p1208_p11 = scmp.lt.s32.totalorder %s1207_s20, 20  ;;  %s1392_s27 = sadd.s32 4, %s3004_s24 }
  0x25   : > { %2465 = vmatprep.mubr.msk.bf16.mxu0 %vm2755_vm1, %v2754_v2  ;;  %805 = vrot.lane.b32.xlu1 %v804_v15, %s2756_s30  ;;  %s1218_s19 = scalar_select %p1210_p10, 1, 0 }
  0x26   : > { %2472 = vmatpush3.bf16.msra.mxu1 %v2910_v10  ;;  %s1211_s22 = scalar_select %p1208_p11, 1, 0 }
  0x27   : > { %2464 = vmatpush3.bf16.msra.mxu0 %v2925_v13  ;;  %2485 = vmatprep.subr.bf16.mxu1 %v2754_v2  ;;  %p1393_p12 = scmp.lt.s32.totalorder %s1392_s27, 20  ;;  %s1390_s14 = sadd.s32 3, %s3008_s29 }
  0x28   : > { %2477 = vmatprep.subr.bf16.mxu0 %v2754_v2  ;;  %p1391_p13 = scmp.lt.s32.totalorder %s1390_s14, 20  ;;  %s1574_s18 = sadd.s32 3, %s3004_s24 }
  0x29   : > { %2474 = vmatmul.mubr.msk.bf16.vlgmr.msra.gmra.mrb[4].mxu1 %vm520_vm2, %v708_v16  ;;  %776 = vrot.lane.b32.xlu1 %v648_v18, %s2756_s30  ;;  %v832_v16 = vstv %s831_s15  ;;  %s1401_s15 = scalar_select %p1393_p12, 1, 0 }
  0x2a   : > { %2466 = vmatmul.mubr.msk.bf16.vlgmr.msra.gmra.mrb[4].mxu0 %vm520_vm2, %v651_v17  ;;  %2486 = vmatpush3.bf16.msra.mxu1 %v2895_v8  ;;  %vm3020_vm4 = vcmp.eq.s32.totalorder %v832_v16, 1  ;;  %s1394_s26 = scalar_select %p1391_p13, 1, 0 }
  0x2b   : > { %2478 = vmatpush3.bf16.msra.mxu0 %v2901_v9  ;;  %2487 = vmatprep.subr.bf16.mxu1 %v2754_v2  ;;  %p1575_p0 = scmp.lt.s32.totalorder %s1574_s18, 20  ;;  %s1759_s20 = sadd.s32 2, %s3004_s24 }
  0x2c   : > { %2479 = vmatprep.subr.bf16.mxu0 %v2754_v2  ;;  %2489 = vmatprep.mubr.msk.bf16.mxu1 %vm2755_vm1, %v2754_v2  ;;  %p1760_p2 = scmp.lt.s32.totalorder %s1759_s20, 20  ;;  %p2128_p7 = scmp.lt.s32.totalorder %s3004_s24, 20 }
  0x2d   : > { %2481 = vmatprep.mubr.msk.bf16.mxu0 %vm2755_vm1, %v2754_v2 }
  0x2e   : > { %2488 = vmatpush3.bf16.msra.mxu1 %v2910_v10 }
  0x2f   : > { %2480 = vmatpush3.bf16.msra.mxu0 %v2925_v13  ;;  %2501 = vmatprep.subr.bf16.mxu1 %v2754_v2 }
  0x30   : > { %2493 = vmatprep.subr.bf16.mxu0 %v2754_v2 }
  0x97   : > { %v2984_v58 = vpop.permute.xlu1 %805 }
  0x9b   : > { %v2987_v60 = vpop.permute.xlu1 %776 }
  0xf4   : > { %v632_v20 = vpop.f32.mrb[0].mxu1 }
  0xf5   : > { %v2967_v21 = vadd.f32 %v2338_v19, %v632_v20  ;;  %v2459_v22 = vpop.f32.mrb[1].mxu1  ;;  %v558_v24 = vpop.f32.mrb[0].mxu0 }
  0xf6   : > { %v635_v25 = vpop.f32.mrb[2].mxu1  ;;  %v2451_v26 = vpop.f32.mrb[1].mxu0  ;;  %v2976_v33 = vadd.f32 %v2333_v23, %v558_v24 }
  0xf7   : > { %v2460_v27 = vpop.f32.mrb[3].mxu1  ;;  %v561_v28 = vpop.f32.mrb[2].mxu0  ;;  %v2974_v32 = vadd.f32 %v2338_v19, %v635_v25 }
  0xf8   : > { %v2972_v29 = vadd.f32 %v2333_v23, %v561_v28  ;;  %v2452_v30 = vpop.f32.mrb[3].mxu0 }
  0xfc   : > { %v758_v31 = vpop.f32.mrb[4].mxu1 }
  0xfd   : > { %v765_v34 = vrot.slane %v758_v31, 2  ;;  %v701_v35 = vpop.f32.mrb[4].mxu0  ;;  %v2475_v36 = vpop.f32.mrb[5].mxu1 }
  0xfe   : > { %v761_v37 = vpop.f32.mrb[6].mxu1  ;;  %v2467_v38 = vpop.f32.mrb[5].mxu0  ;;  %v707_v43 = vadd.f32 %v701_v35, %v2976_v33 }
  0xff   : > { %v767_v39 = vadd.f32 %v765_v34, %v2974_v32  ;;  %v2476_v40 = vpop.f32.mrb[7].mxu1  ;;  %v704_v41 = vpop.f32.mrb[6].mxu0 }
 0x100   : > { %v2468_v42 = vpop.f32.mrb[7].mxu0  ;;  %v2349_v47 = vmul.f32 -1.442695, %v707_v43 }
 0x101   : > { %2613 = vtanh.f32 %v767_v39  ;;  %v2350_v46 = vmul.f32 -1.442695, %v767_v39 }
 0x102   : > { %2615 = vtanh.f32 %v707_v43 }
 0x103   : > { %2617 = vpow2.f32 %v2350_v46 }
 0x104   : > { %2619 = vpow2.f32 %v2349_v47 }
 0x10b   : > { %v2614_v44 = vpop.eup %2613 }
 0x10c   : > { %810 = vrot.lane.b32.xlu0 %v2614_v44, %s2756_s30  ;;  %v2616_v45 = vpop.eup %2615 }
 0x10d   : > { %v2618_v48 = vpop.eup %2617 }
 0x10e   : > { %v799_v49 = vadd.f32 1.0, %v2618_v48  ;;  %v2620_v50 = vpop.eup %2619 }
 0x10f   : > { %v771_v51 = vadd.f32 1.0, %v2620_v50 }
 0x110   : > { %781 = vrot.lane.b32.xlu0 %v2616_v45, %s2756_s30  ;;  %2621 = vrcp.f32 %v799_v49 }
 0x111   : > { %2623 = vrcp.f32 %v771_v51 }
 0x11a   : > { %v2622_v52 = vpop.eup %2621 }
 0x11b   : > { %v2624_v55 = vpop.eup %2623  ;;  %v808_v59 = vmul.f32 %v2622_v52, %v2984_v58 }
 0x11c   : > { %v779_v63 = vmul.f32 %v2624_v55, %v2987_v60 }
 0x17e   : > { %v811_v53 = vpop.permute.xlu0 %810 }
 0x17f   : > { %v813_v54 = vmul.f32 %v2622_v52, %v811_v53 }
 0x181   : > { %815 = vrot.lane.b32.xlu0 %v813_v54, %s2756_s30 }
 0x182   : > { %v782_v56 = vpop.permute.xlu0 %781 }
 0x183   : > { %v784_v57 = vmul.f32 %v2624_v55, %v782_v56 }
 0x185   : > { %786 = vrot.lane.b32.xlu1 %v784_v57, %s2756_s30 }
 0x1f3   : > { %v816_v61 = vpop.permute.xlu0 %815 }
 0x1f4   : > { %v2989_v62 = vadd.f32 %v816_v61, %v808_v59 }
 0x1f6   : > { %2625 = vtanh.f32 %v2989_v62  ;;  %v3056_v56 = vsel %vm842_vm3, %v2989_v62, %v2984_v58 }
 0x1f7   : > { %v787_v0 = vpop.permute.xlu1 %786  ;;  %v1000_v57 = vrot.slane %v3056_v56, 2 }
 0x1f8   : > { %v2993_v1 = vadd.f32 %v787_v0, %v779_v63 }
 0x1fa   : > { %2627 = vtanh.f32 %v2993_v1  ;;  %v839_v59 = vsel %vm3020_vm4, %v2993_v1, %v2987_v60  ;;  %v3078_v1 = vstv %s1030_s28  ;;  %s1572_s28 = sadd.s32 4, %s3008_s29 }
 0x1fb   : > { %v3065_v0 = vrot.slane %v839_v59, 6  ;;  %vm1032_vm5 = vcmp.eq.s32.totalorder %v3078_v1, 1  ;;  %p1573_p1 = scmp.lt.s32.totalorder %s1572_s28, 20 }
 0x1fd   : > { %s1576_s16 = scalar_select %p1573_p1, 1, 0 }
 0x200   : > { %v2626_v3 = vpop.eup %2625 }
 0x201   : > { %821 = vrot.lane.b32.xlu0 %v2626_v3, %s2756_s30 }
 0x204   : > { %v2628_v5 = vpop.eup %2627 }
 0x205   : > { %845 = vrot.lane.b32.xlu0 %v844_v4, %s2757_s21  ;;  %792 = vrot.lane.b32.xlu1 %v2628_v5, %s2756_s30 }
 0x209   : > { %835 = vrot.lane.b32.xlu1 %v2930_v14, %s2757_s21 }
 0x273   : > { %v822_v6 = vpop.permute.xlu0 %821 }
 0x274   : > { %v824_v11 = vmul.f32 %v2622_v52, %v822_v6 }
 0x277   : > { %v846_v12 = vpop.permute.xlu0 %845  ;;  %v793_v14 = vpop.permute.xlu1 %792 }
 0x278   : > { %v3016_v15 = vsel %vm842_vm3, %v824_v11, %v846_v12  ;;  %v795_v18 = vmul.f32 %v2624_v55, %v793_v14  ;;  %v3082_v12 = vstv %s1023_s17  ;;  %s1583_s17 = scalar_select %p1575_p0, 1, 0 }
 0x279   : > { %v913_v17 = vpack.c.bf16 %v3016_v15, %v3016_v15  ;;  %v1033_v7 = vrot.slane %v3016_v15, 2  ;;  %vm1025_vm6 = vcmp.eq.s32.totalorder %v3082_v12, 1 }
 0x27b   : > { %v836_v20 = vpop.permute.xlu1 %835  ;;  %v915_v22 = vrot.slane %v913_v17, 3 }
 0x27c   : > { %v3026_v23 = vsel %vm3020_vm4, %v795_v18, %v836_v20  ;;  %vm1047_vm4 = vcmask 259076  }
 0x27d   : > { %916 = vrot.lane.b32.xlu1 %v915_v22, %s2757_s21  ;;  %v862_v24 = vpack.c.bf16 %v3026_v23, %v3026_v23  ;;  %v1026_v17 = vrot.slane %v3026_v23, 6 }
 0x27f   : > { %864 = vrot.lane.b32.xlu0 %v862_v24, %s2757_s21 }
 0x2ef   : > { %v917_v25 = vpop.permute.xlu1 %916 }
 0x2f0   : > { %2490 = vmatmul.mubr.msk.bf16.vlgmr.msra.gmra.mrb[8].mxu1 %vm520_vm2, %v917_v25 }
 0x2f1   : > { %v865_v26 = vpop.permute.xlu0 %864  ;;  %2502 = vmatpush3.bf16.msra.mxu1 %v2895_v8  ;;  %2505 = vmatprep.mubr.msk.bf16.mxu1 %vm2755_vm1, %v2754_v2 }
 0x2f2   : > { %2482 = vmatmul.mubr.msk.bf16.vlgmr.msra.gmra.mrb[8].mxu0 %vm520_vm2, %v865_v26  ;;  %2503 = vmatprep.subr.bf16.mxu1 %v2754_v2 }
 0x2f3   : > { %2494 = vmatpush3.bf16.msra.mxu0 %v2901_v9  ;;  %2497 = vmatprep.mubr.msk.bf16.mxu0 %vm2755_vm1, %v2754_v2 }
 0x2f4   : > { %2495 = vmatprep.subr.bf16.mxu0 %v2754_v2 }
 0x2f5   : > { %2504 = vmatpush3.bf16.msra.mxu1 %v2910_v10 }
 0x2f6   : > { %2517 = vmatprep.subr.bf16.mxu1 %v2754_v2 }
 0x2f7   : > { %2496 = vmatpush3.bf16.msra.mxu0 %v2925_v13 }
 0x2f8   : > { %2509 = vmatprep.subr.bf16.mxu0 %v2754_v2 }
 0x3c3   : > { %v955_v27 = vpop.f32.mrb[8].mxu1 }
 0x3c4   : > { %v962_v28 = vrot.slane %v955_v27, 4  ;;  %v2491_v30 = vpop.f32.mrb[9].mxu1 }
 0x3c5   : > { %v903_v31 = vpop.f32.mrb[8].mxu0  ;;  %v958_v34 = vpop.f32.mrb[10].mxu1 }
 0x3c6   : > { %v964_v35 = vadd.f32 %v962_v28, %v2974_v32  ;;  %v910_v36 = vrot.slane %v903_v31, 6  ;;  %v2483_v37 = vpop.f32.mrb[9].mxu0  ;;  %v2492_v38 = vpop.f32.mrb[11].mxu1 }
 0x3c7   : > { %v906_v39 = vpop.f32.mrb[10].mxu0 }
 0x3c8   : > { %2629 = vtanh.f32 %v964_v35  ;;  %v912_v40 = vadd.f32 %v910_v36, %v2976_v33  ;;  %v2484_v41 = vpop.f32.mrb[11].mxu0  ;;  %v2356_v44 = vmul.f32 -1.442695, %v964_v35 }
 0x3ca   : > { %2631 = vtanh.f32 %v912_v40  ;;  %v2355_v45 = vmul.f32 -1.442695, %v912_v40 }
 0x3cb   : > { %2633 = vpow2.f32 %v2356_v44 }
 0x3cc   : > { %2635 = vpow2.f32 %v2355_v45 }
 0x3d2   : > { %v2630_v42 = vpop.eup %2629 }
 0x3d3   : > { %1004 = vrot.lane.b32.xlu1 %v2630_v42, %s2756_s30 }
 0x3d4   : > { %v2632_v43 = vpop.eup %2631 }
 0x3d5   : > { %977 = vrot.lane.b32.xlu0 %v2632_v43, %s2756_s30  ;;  %v2634_v46 = vpop.eup %2633 }
 0x3d6   : > { %v2636_v47 = vpop.eup %2635  ;;  %v995_v48 = vadd.f32 1.0, %v2634_v46 }
 0x3d7   : > { %v968_v49 = vadd.f32 1.0, %v2636_v47 }
 0x3d8   : > { %2637 = vrcp.f32 %v995_v48 }
 0x3d9   : > { %2639 = vrcp.f32 %v968_v49 }
 0x3e2   : > { %v2638_v50 = vpop.eup %2637 }
 0x3e3   : > { %v2640_v53 = vpop.eup %2639  ;;  %v1002_v61 = vmul.f32 %v2638_v50, %v1000_v57 }
 0x3e4   : > { %v975_v58 = vmul.f32 %v2640_v53, %v3065_v0 }
 0x445   : > { %v1005_v51 = vpop.permute.xlu1 %1004 }
 0x446   : > { %v1007_v52 = vmul.f32 %v2638_v50, %v1005_v51 }
 0x447   : > { %v978_v54 = vpop.permute.xlu0 %977 }
 0x448   : > { %1009 = vrot.lane.b32.xlu1 %v1007_v52, %s2756_s30  ;;  %v980_v55 = vmul.f32 %v2640_v53, %v978_v54 }
 0x44a   : > { %982 = vrot.lane.b32.xlu0 %v980_v55, %s2756_s30 }
 0x4ba   : > { %v1010_v63 = vpop.permute.xlu1 %1009 }
 0x4bb   : > { %v3067_v3 = vadd.f32 %v1010_v63, %v1002_v61 }
 0x4bc   : > { %v983_v62 = vpop.permute.xlu0 %982 }
 0x4bd   : > { %2641 = vtanh.f32 %v3067_v3  ;;  %v3071_v4 = vadd.f32 %v983_v62, %v975_v58  ;;  %v3125_v61 = vsel %vm1032_vm5, %v3067_v3, %v1000_v57 }
 0x4be   : > { %v1188_v63 = vrot.slane %v3125_v61, 2 }
 0x4bf   : > { %2643 = vtanh.f32 %v3071_v4  ;;  %v3132_v58 = vsel %vm1025_vm6, %v3071_v4, %v3065_v0 }
 0x4c0   : > { %v1161_v56 = vrot.slane %v3132_v58, 6 }
 0x4c7   : > { %v2642_v5 = vpop.eup %2641 }
 0x4c8   : > { %1015 = vrot.lane.b32.xlu1 %v2642_v5, %s2756_s30 }
 0x4c9   : > { %v2644_v60 = vpop.eup %2643 }
 0x4ca   : > { %988 = vrot.lane.b32.xlu0 %v2644_v60, %s2756_s30 }
 0x53a   : > { %v1016_v6 = vpop.permute.xlu1 %1015 }
 0x53b   : > { %v1018_v11 = vmul.f32 %v2638_v50, %v1016_v6  ;;  %v3149_v6 = vstv %s1218_s19  ;;  %s1757_s19 = sadd.s32 5, %s3008_s29 }
 0x53c   : > { %v989_v16 = vpop.permute.xlu0 %988  ;;  %vm1220_vm7 = vcmp.eq.s32.totalorder %v3149_v6, 1  ;;  %p1758_p3 = scmp.lt.s32.totalorder %s1757_s19, 20  ;;  %s1945_s19 = sadd.s32 1, %s3004_s24 }
 0x53d   : > { %v3086_v14 = vsel %vm1032_vm5, %v1018_v11, %v1033_v7  ;;  %v991_v18 = vmul.f32 %v2640_v53, %v989_v16  ;;  %v3153_v16 = vstv %s1211_s22  ;;  %s1768_s22 = scalar_select %p1760_p2, 1, 0  ;;  %vm1041_vm5 = vcmask 257026  }
 0x53e   : > { %v1101_v19 = vpack.c.bf16 %v3086_v14, %v3086_v14  ;;  %v1221_v11 = vrot.slane %v3086_v14, 2  ;;  %vm1213_vm8 = vcmp.eq.s32.totalorder %v3153_v16, 1  ;;  %s1761_s27 = scalar_select %p1758_p3, 1, 0 }
 0x53f   : > { %v3094_v20 = vsel %vm1025_vm6, %v991_v18, %v1026_v17  ;;  %p1946_p4 = scmp.lt.s32.totalorder %s1945_s19, 20  ;;  %vm860_vm6 = vcmask 261126  }
 0x540   : > { %v1103_v22 = vrot.slane %v1101_v19, 2  ;;  %v1049_v24 = vpack.c.bf16 %v3094_v20, %v3094_v20  ;;  %v1214_v19 = vrot.slane %v3094_v20, 6 }
 0x542   : > { %1104 = vrot.lane.b32.xlu1 %v1103_v22, %s2757_s21  ;;  %v1051_v25 = vrot.slane %v1049_v24, 1 }
 0x544   : > { %1052 = vrot.lane.b32.xlu0 %v1051_v25, %s2757_s21 }
 0x5b4   : > { %v1105_v26 = vpop.permute.xlu1 %1104 }
 0x5b5   : > { %2506 = vmatmul.mubr.msk.bf16.vlgmr.msra.gmra.mrb[12].mxu1 %vm520_vm2, %v1105_v26 }
 0x5b6   : > { %2518 = vmatpush3.bf16.msra.mxu1 %v2895_v8  ;;  %2521 = vmatprep.mubr.msk.bf16.mxu1 %vm2755_vm1, %v2754_v2  ;;  %v1053_v27 = vpop.permute.xlu0 %1052 }
 0x5b7   : > { %2519 = vmatprep.subr.bf16.mxu1 %v2754_v2  ;;  %2498 = vmatmul.mubr.msk.bf16.vlgmr.msra.gmra.mrb[12].mxu0 %vm520_vm2, %v1053_v27 }
 0x5b8   : > { %2510 = vmatpush3.bf16.msra.mxu0 %v2901_v9  ;;  %2513 = vmatprep.mubr.msk.bf16.mxu0 %vm2755_vm1, %v2754_v2 }
 0x5b9   : > { %2511 = vmatprep.subr.bf16.mxu0 %v2754_v2 }
 0x5ba   : > { %2520 = vmatpush3.bf16.msra.mxu1 %v2910_v10 }
 0x5bb   : > { %2533 = vmatprep.subr.bf16.mxu1 %v2754_v2 }
 0x5bc   : > { %2512 = vmatpush3.bf16.msra.mxu0 %v2925_v13 }
 0x5bd   : > { %2525 = vmatprep.subr.bf16.mxu0 %v2754_v2 }
 0x688   : > { %v1143_v28 = vpop.f32.mrb[12].mxu1 }
 0x689   : > { %v1150_v30 = vrot.slane %v1143_v28, 6  ;;  %v2507_v31 = vpop.f32.mrb[13].mxu1 }
 0x68a   : > { %v1146_v34 = vpop.f32.mrb[14].mxu1  ;;  %v1091_v36 = vpop.f32.mrb[12].mxu0 }
 0x68b   : > { %v1152_v35 = vadd.f32 %v1150_v30, %v2974_v32  ;;  %v2508_v37 = vpop.f32.mrb[15].mxu1  ;;  %v1098_v38 = vrot.slane %v1091_v36, 4  ;;  %v2499_v39 = vpop.f32.mrb[13].mxu0 }
 0x68c   : > { %v1094_v40 = vpop.f32.mrb[14].mxu0 }
 0x68d   : > { %2645 = vtanh.f32 %v1152_v35  ;;  %v1100_v41 = vadd.f32 %v1098_v38, %v2976_v33  ;;  %v2500_v42 = vpop.f32.mrb[15].mxu0  ;;  %v2360_v45 = vmul.f32 -1.442695, %v1152_v35 }
 0x68f   : > { %2647 = vtanh.f32 %v1100_v41  ;;  %v2359_v46 = vmul.f32 -1.442695, %v1100_v41 }
 0x690   : > { %2649 = vpow2.f32 %v2360_v45 }
 0x691   : > { %2651 = vpow2.f32 %v2359_v46 }
 0x697   : > { %v2646_v43 = vpop.eup %2645 }
 0x698   : > { %1192 = vrot.lane.b32.xlu1 %v2646_v43, %s2756_s30 }
 0x699   : > { %v2648_v44 = vpop.eup %2647 }
 0x69a   : > { %1165 = vrot.lane.b32.xlu0 %v2648_v44, %s2756_s30  ;;  %v2650_v47 = vpop.eup %2649 }
 0x69b   : > { %v2652_v48 = vpop.eup %2651  ;;  %v1183_v49 = vadd.f32 1.0, %v2650_v47 }
 0x69c   : > { %v1156_v50 = vadd.f32 1.0, %v2652_v48 }
 0x69d   : > { %2653 = vrcp.f32 %v1183_v49 }
 0x69e   : > { %2655 = vrcp.f32 %v1156_v50 }
 0x6a7   : > { %v2654_v51 = vpop.eup %2653 }
 0x6a8   : > { %v2656_v54 = vpop.eup %2655  ;;  %v1190_v62 = vmul.f32 %v2654_v51, %v1188_v63 }
 0x6a9   : > { %v1163_v57 = vmul.f32 %v2656_v54, %v1161_v56 }
 0x70a   : > { %v1193_v52 = vpop.permute.xlu1 %1192 }
 0x70b   : > { %v1195_v53 = vmul.f32 %v2654_v51, %v1193_v52 }
 0x70c   : > { %v1166_v55 = vpop.permute.xlu0 %1165 }
 0x70d   : > { %1197 = vrot.lane.b32.xlu1 %v1195_v53, %s2756_s30  ;;  %v1168_v59 = vmul.f32 %v2656_v54, %v1166_v55 }
 0x70f   : > { %1170 = vrot.lane.b32.xlu0 %v1168_v59, %s2756_s30 }
 0x77f   : > { %v1198_v5 = vpop.permute.xlu1 %1197 }
 0x780   : > { %v3137_v60 = vadd.f32 %v1198_v5, %v1190_v62 }
 0x781   : > { %v1171_v3 = vpop.permute.xlu0 %1170 }
 0x782   : > { %2657 = vtanh.f32 %v3137_v60  ;;  %v3142_v1 = vadd.f32 %v1171_v3, %v1163_v57  ;;  %v3196_v62 = vsel %vm1220_vm7, %v3137_v60, %v1188_v63 }
 0x783   : > { %v1371_v5 = vrot.slane %v3196_v62, 2 }
 0x784   : > { %2659 = vtanh.f32 %v3142_v1  ;;  %v3206_v3 = vsel %vm1213_vm8, %v3142_v1, %v1161_v56  ;;  %v3221_v1 = vstv %s1401_s15 }
 0x785   : > { %v1344_v63 = vrot.slane %v3206_v3, 6  ;;  %vm1403_vm9 = vcmp.eq.s32.totalorder %v3221_v1, 1 }
 0x78c   : > { %v2658_v0 = vpop.eup %2657 }
 0x78d   : > { %1203 = vrot.lane.b32.xlu1 %v2658_v0, %s2756_s30 }
 0x78e   : > { %v2660_v4 = vpop.eup %2659 }
 0x78f   : > { %1176 = vrot.lane.b32.xlu0 %v2660_v4, %s2756_s30 }
 0x7ff   : > { %v1204_v7 = vpop.permute.xlu1 %1203 }
 0x800   : > { %v1206_v12 = vmul.f32 %v2654_v51, %v1204_v7 }
 0x801   : > { %v1177_v18 = vpop.permute.xlu0 %1176 }
 0x802   : > { %v3157_v17 = vsel %vm1220_vm7, %v1206_v12, %v1221_v11  ;;  %v1179_v22 = vmul.f32 %v2656_v54, %v1177_v18  ;;  %v3229_v18 = vstv %s1394_s26  ;;  %s2136_s26 = scalar_select %p2128_p7, 1, 0  ;;  %vm2175_vm7 = vcmask 257024  }
 0x803   : > { %v1287_v24 = vpack.c.bf16 %v3157_v17, %v3157_v17  ;;  %v1404_v11 = vrot.slane %v3157_v17, 2  ;;  %vm1396_vm10 = vcmp.eq.s32.totalorder %v3229_v18, 1 }
 0x804   : > { %v3165_v25 = vsel %vm1213_vm8, %v1179_v22, %v1214_v19 }
 0x805   : > { %v1289_v26 = vrot.slane %v1287_v24, 1  ;;  %v1235_v27 = vpack.c.bf16 %v3165_v25, %v3165_v25  ;;  %v1397_v24 = vrot.slane %v3165_v25, 6 }
 0x807   : > { %1290 = vrot.lane.b32.xlu1 %v1289_v26, %s2757_s21  ;;  %v1237_v28 = vrot.slane %v1235_v27, 2 }
 0x809   : > { %1238 = vrot.lane.b32.xlu0 %v1237_v28, %s2757_s21 }
 0x879   : > { %v1291_v30 = vpop.permute.xlu1 %1290 }
 0x87a   : > { %2522 = vmatmul.mubr.msk.bf16.vlgmr.msra.gmra.mrb[16].mxu1 %vm520_vm2, %v1291_v30 }
 0x87b   : > { %2534 = vmatpush3.bf16.msra.mxu1 %v2895_v8  ;;  %2537 = vmatprep.mubr.msk.bf16.mxu1 %vm2755_vm1, %v2754_v2  ;;  %v1239_v31 = vpop.permute.xlu0 %1238 }
 0x87c   : > { %2535 = vmatprep.subr.bf16.mxu1 %v2754_v2  ;;  %2514 = vmatmul.mubr.msk.bf16.vlgmr.msra.gmra.mrb[16].mxu0 %vm520_vm2, %v1239_v31 }
 0x87d   : > { %2526 = vmatpush3.bf16.msra.mxu0 %v2901_v9  ;;  %2529 = vmatprep.mubr.msk.bf16.mxu0 %vm2755_vm1, %v2754_v2 }
 0x87e   : > { %2527 = vmatprep.subr.bf16.mxu0 %v2754_v2 }
 0x87f   : > { %2536 = vmatpush3.bf16.msra.mxu1 %v2910_v10 }
 0x880   : > { %2549 = vmatprep.subr.bf16.mxu1 %v2754_v2 }
 0x881   : > { %2528 = vmatpush3.bf16.msra.mxu0 %v2925_v13 }
 0x882   : > { %2541 = vmatprep.subr.bf16.mxu0 %v2754_v2 }
 0x94d   : > { %v1329_v34 = vpop.f32.mrb[16].mxu1 }
 0x94e   : > { %v1335_v35 = vadd.f32 %v1329_v34, %v2974_v32  ;;  %v2523_v36 = vpop.f32.mrb[17].mxu1 }
 0x94f   : > { %v1332_v37 = vpop.f32.mrb[18].mxu1  ;;  %v1277_v38 = vpop.f32.mrb[16].mxu0 }
 0x950   : > { %2661 = vtanh.f32 %v1335_v35  ;;  %v2524_v39 = vpop.f32.mrb[19].mxu1  ;;  %v1284_v40 = vrot.slane %v1277_v38, 2  ;;  %v2515_v41 = vpop.f32.mrb[17].mxu0  ;;  %v2364_v47 = vmul.f32 -1.442695, %v1335_v35 }
 0x951   : > { %v1280_v42 = vpop.f32.mrb[18].mxu0 }
 0x952   : > { %v1286_v43 = vadd.f32 %v1284_v40, %v2976_v33  ;;  %v2516_v44 = vpop.f32.mrb[19].mxu0 }
 0x954   : > { %2663 = vtanh.f32 %v1286_v43  ;;  %v2363_v32 = vmul.f32 -1.442695, %v1286_v43 }
 0x955   : > { %2665 = vpow2.f32 %v2364_v47 }
 0x956   : > { %2667 = vpow2.f32 %v2363_v32 }
 0x95a   : > { %v2662_v45 = vpop.eup %2661 }
 0x95b   : > { %1375 = vrot.lane.b32.xlu0 %v2662_v45, %s2756_s30 }
 0x95e   : > { %v2664_v46 = vpop.eup %2663 }
 0x95f   : > { %1348 = vrot.lane.b32.xlu1 %v2664_v46, %s2756_s30  ;;  %v2666_v48 = vpop.eup %2665 }
 0x960   : > { %v1366_v49 = vadd.f32 1.0, %v2666_v48  ;;  %v2668_v50 = vpop.eup %2667 }
 0x961   : > { %v1339_v51 = vadd.f32 1.0, %v2668_v50 }
 0x962   : > { %2669 = vrcp.f32 %v1366_v49 }
 0x963   : > { %2671 = vrcp.f32 %v1339_v51 }
 0x96c   : > { %v2670_v52 = vpop.eup %2669 }
 0x96d   : > { %v2672_v54 = vpop.eup %2671  ;;  %v1373_v57 = vmul.f32 %v2670_v52, %v1371_v5 }
 0x96e   : > { %v1346_v60 = vmul.f32 %v2672_v54, %v1344_v63 }
 0x9cd   : > { %v1376_v33 = vpop.permute.xlu0 %1375 }
 0x9ce   : > { %v1378_v53 = vmul.f32 %v2670_v52, %v1376_v33 }
 0x9d0   : > { %1380 = vrot.lane.b32.xlu0 %v1378_v53, %s2756_s30 }
 0x9d1   : > { %v1349_v55 = vpop.permute.xlu1 %1348 }
 0x9d2   : > { %v1351_v59 = vmul.f32 %v2672_v54, %v1349_v55 }
 0x9d4   : > { %1353 = vrot.lane.b32.xlu1 %v1351_v59, %s2756_s30 }
 0xa42   : > { %v1381_v61 = vpop.permute.xlu0 %1380 }
 0xa43   : > { %v3208_v0 = vadd.f32 %v1381_v61, %v1373_v57 }
 0xa45   : > { %2673 = vtanh.f32 %v3208_v0  ;;  %v3268_v61 = vsel %vm1403_vm9, %v3208_v0, %v1371_v5 }
 0xa46   : > { %v1354_v4 = vpop.permute.xlu1 %1353 }
 0xa47   : > { %v3214_v6 = vadd.f32 %v1354_v4, %v1346_v60  ;;  %v1553_v60 = vrot.slane %v3268_v61, 2 }
 0xa49   : > { %2675 = vtanh.f32 %v3214_v6 }
 0xa4f   : > { %v2674_v58 = vpop.eup %2673 }
 0xa50   : > { %1386 = vrot.lane.b32.xlu0 %v2674_v58, %s2756_s30  ;;  %v3278_v58 = vsel %vm1396_vm10, %v3214_v6, %v1344_v63  ;;  %v3293_v6 = vstv %s1583_s17 }
 0xa51   : > { %v1526_v5 = vrot.slane %v3278_v58, 6  ;;  %vm1585_vm11 = vcmp.eq.s32.totalorder %v3293_v6, 1  ;;  %v3365_v6 = vstv %s1768_s22  ;;  %s1943_s22 = sadd.s32 6, %s3008_s29 }
 0xa52   : > { %vm1770_vm13 = vcmp.eq.s32.totalorder %v3365_v6, 1  ;;  %p1944_p5 = scmp.lt.s32.totalorder %s1943_s22, 20 }
 0xa53   : > { %v2676_v56 = vpop.eup %2675 }
 0xa54   : > { %1359 = vrot.lane.b32.xlu1 %v2676_v56, %s2756_s30  ;;  %s1947_s14 = scalar_select %p1944_p5, 1, 0 }
 0xac2   : > { %v1387_v7 = vpop.permute.xlu0 %1386 }
 0xac3   : > { %v1389_v12 = vmul.f32 %v2670_v52, %v1387_v7 }
 0xac5   : > { %v3227_v16 = vsel %vm1403_vm9, %v1389_v12, %v1404_v11 }
 0xac6   : > { %v1467_v19 = vpack.c.bf16 %v3227_v16, %v3227_v16  ;;  %v1360_v22 = vpop.permute.xlu1 %1359  ;;  %v1586_v12 = vrot.slane %v3227_v16, 2 }
 0xac7   : > { %v1362_v26 = vmul.f32 %v2672_v54, %v1360_v22  ;;  %v3301_v22 = vstv %s1576_s16 }
 0xac8   : > { %1469 = vrot.lane.b32.xlu0 %v1467_v19, %s2757_s21  ;;  %vm1578_vm12 = vcmp.eq.s32.totalorder %v3301_v22, 1  ;;  %v3369_v22 = vstv %s1761_s27  ;;  %s1954_s27 = scalar_select %p1946_p4, 1, 0 }
 0xac9   : > { %v3238_v27 = vsel %vm1396_vm10, %v1362_v26, %v1397_v24  ;;  %vm1763_vm14 = vcmp.eq.s32.totalorder %v3369_v22, 1 }
 0xaca   : > { %v1418_v28 = vpack.c.bf16 %v3238_v27, %v3238_v27  ;;  %v1955_v22 = vstv %s1954_s27 }
 0xacb   : > { %vm1956_vm15 = vcmp.eq.s32.totalorder %v1955_v22, 1 }
 0xacc   : > { %v1420_v30 = vrot.slane %v1418_v28, 3  ;;  %v1579_v28 = vrot.slane %v3238_v27, 6 }
 0xace   : > { %1421 = vrot.lane.b32.xlu1 %v1420_v30, %s2757_s21 }
 0xb3a   : > { %v1470_v31 = vpop.permute.xlu0 %1469 }
 0xb3b   : > { %2538 = vmatmul.mubr.msk.bf16.vlgmr.msra.gmra.mrb[20].mxu1 %vm520_vm2, %v1470_v31 }
 0xb3c   : > { %2550 = vmatpush3.bf16.msra.mxu1 %v2895_v8  ;;  %2553 = vmatprep.mubr.msk.bf16.mxu1 %vm2755_vm1, %v2754_v2 }
 0xb3d   : > { %2551 = vmatprep.subr.bf16.mxu1 %v2754_v2 }
 0xb40   : > { %2552 = vmatpush3.bf16.msra.mxu1 %v2910_v10  ;;  %v1422_v34 = vpop.permute.xlu1 %1421 }
 0xb41   : > { %2565 = vmatprep.subr.bf16.mxu1 %v2754_v2  ;;  %2530 = vmatmul.mubr.msk.bf16.vlgmr.msra.gmra.mrb[20].mxu0 %vm520_vm2, %v1422_v34 }
 0xb42   : > { %2542 = vmatpush3.bf16.msra.mxu0 %v2901_v9  ;;  %2545 = vmatprep.mubr.msk.bf16.mxu0 %vm2755_vm1, %v2754_v2 }
 0xb43   : > { %2543 = vmatprep.subr.bf16.mxu0 %v2754_v2 }
 0xb46   : > { %2544 = vmatpush3.bf16.msra.mxu0 %v2925_v13 }
 0xb47   : > { %2557 = vmatprep.subr.bf16.mxu0 %v2754_v2 }
 0xc0e   : > { %v1508_v35 = vpop.f32.mrb[20].mxu1 }
 0xc0f   : > { %v1515_v36 = vrot.slane %v1508_v35, 2  ;;  %v2539_v37 = vpop.f32.mrb[21].mxu1 }
 0xc10   : > { %v1511_v38 = vpop.f32.mrb[22].mxu1 }
 0xc11   : > { %v1517_v39 = vadd.f32 %v1515_v36, %v2967_v21  ;;  %v2540_v40 = vpop.f32.mrb[23].mxu1 }
 0xc13   : > { %2677 = vtanh.f32 %v1517_v39  ;;  %v2368_v32 = vmul.f32 -1.442695, %v1517_v39 }
 0xc14   : > { %v1460_v41 = vpop.f32.mrb[20].mxu0 }
 0xc15   : > { %v1466_v42 = vadd.f32 %v1460_v41, %v2972_v29  ;;  %v2531_v43 = vpop.f32.mrb[21].mxu0 }
 0xc16   : > { %v1463_v44 = vpop.f32.mrb[22].mxu0 }
 0xc17   : > { %2679 = vtanh.f32 %v1466_v42  ;;  %v2532_v45 = vpop.f32.mrb[23].mxu0  ;;  %v2367_v48 = vmul.f32 -1.442695, %v1466_v42 }
 0xc18   : > { %2681 = vpow2.f32 %v2368_v32 }
 0xc19   : > { %2683 = vpow2.f32 %v2367_v48 }
 0xc1d   : > { %v2678_v46 = vpop.eup %2677 }
 0xc1e   : > { %1557 = vrot.lane.b32.xlu0 %v2678_v46, %s2756_s30 }
 0xc21   : > { %v2680_v47 = vpop.eup %2679 }
 0xc22   : > { %1530 = vrot.lane.b32.xlu1 %v2680_v47, %s2756_s30  ;;  %v2682_v49 = vpop.eup %2681 }
 0xc23   : > { %v1548_v50 = vadd.f32 1.0, %v2682_v49  ;;  %v2684_v51 = vpop.eup %2683 }
 0xc24   : > { %v1521_v52 = vadd.f32 1.0, %v2684_v51 }
 0xc25   : > { %2685 = vrcp.f32 %v1548_v50 }
 0xc26   : > { %2687 = vrcp.f32 %v1521_v52 }
 0xc2f   : > { %v2686_v33 = vpop.eup %2685 }
 0xc30   : > { %v2688_v55 = vpop.eup %2687  ;;  %v1555_v4 = vmul.f32 %v2686_v33, %v1553_v60 }
 0xc31   : > { %v1528_v0 = vmul.f32 %v2688_v55, %v1526_v5 }
 0xc90   : > { %v1558_v53 = vpop.permute.xlu0 %1557 }
 0xc91   : > { %v1560_v54 = vmul.f32 %v2686_v33, %v1558_v53 }
 0xc93   : > { %1562 = vrot.lane.b32.xlu0 %v1560_v54, %s2756_s30 }
 0xc94   : > { %v1531_v59 = vpop.permute.xlu1 %1530 }
 0xc95   : > { %v1533_v57 = vmul.f32 %v2688_v55, %v1531_v59 }
 0xc97   : > { %1535 = vrot.lane.b32.xlu1 %v1533_v57, %s2756_s30 }
 0xd05   : > { %v1563_v62 = vpop.permute.xlu0 %1562 }
 0xd06   : > { %v3280_v56 = vadd.f32 %v1563_v62, %v1555_v4 }
 0xd08   : > { %2689 = vtanh.f32 %v3280_v56  ;;  %v3340_v4 = vsel %vm1585_vm11, %v3280_v56, %v1553_v60 }
 0xd09   : > { %v1536_v1 = vpop.permute.xlu1 %1535  ;;  %v1738_v62 = vrot.slane %v3340_v4, 2 }
 0xd0a   : > { %v3286_v7 = vadd.f32 %v1536_v1, %v1528_v0 }
 0xd0c   : > { %2691 = vtanh.f32 %v3286_v7  ;;  %v3348_v0 = vsel %vm1578_vm12, %v3286_v7, %v1526_v5 }
 0xd12   : > { %v2690_v3 = vpop.eup %2689 }
 0xd13   : > { %1568 = vrot.lane.b32.xlu0 %v2690_v3, %s2756_s30  ;;  %v1711_v3 = vrot.slane %v3348_v0, 6 }
 0xd16   : > { %v2692_v63 = vpop.eup %2691 }
 0xd17   : > { %1541 = vrot.lane.b32.xlu1 %v2692_v63, %s2756_s30 }
 0xd85   : > { %v1569_v11 = vpop.permute.xlu0 %1568 }
 0xd86   : > { %v1571_v18 = vmul.f32 %v2686_v33, %v1569_v11 }
 0xd88   : > { %v3299_v19 = vsel %vm1585_vm11, %v1571_v18, %v1586_v12 }
 0xd89   : > { %v1651_v24 = vpack.c.bf16 %v3299_v19, %v3299_v19  ;;  %v1542_v26 = vpop.permute.xlu1 %1541  ;;  %v1771_v12 = vrot.slane %v3299_v19, 2 }
 0xd8a   : > { %v1544_v30 = vmul.f32 %v2688_v55, %v1542_v26 }
 0xd8b   : > { %v1653_v31 = vrot.slane %v1651_v24, 3 }
 0xd8c   : > { %v3309_v34 = vsel %vm1578_vm12, %v1544_v30, %v1579_v28 }
 0xd8d   : > { %1654 = vrot.lane.b32.xlu1 %v1653_v31, %s2757_s21  ;;  %v1600_v35 = vpack.c.bf16 %v3309_v34, %v3309_v34  ;;  %v1764_v28 = vrot.slane %v3309_v34, 6 }
 0xd8f   : > { %1602 = vrot.lane.b32.xlu0 %v1600_v35, %s2757_s21 }
 0xdff   : > { %v1655_v36 = vpop.permute.xlu1 %1654 }
 0xe00   : > { %2554 = vmatmul.mubr.msk.bf16.vlgmr.msra.gmra.mrb[24].mxu1 %vm520_vm2, %v1655_v36 }
 0xe01   : > { %2566 = vmatpush3.bf16.msra.mxu1 %v2895_v8  ;;  %2569 = vmatprep.mubr.msk.bf16.mxu1 %vm2755_vm1, %v2754_v2  ;;  %v1603_v37 = vpop.permute.xlu0 %1602 }
 0xe02   : > { %2567 = vmatprep.subr.bf16.mxu1 %v2754_v2  ;;  %2546 = vmatmul.mubr.msk.bf16.vlgmr.msra.gmra.mrb[24].mxu0 %vm520_vm2, %v1603_v37 }
 0xe03   : > { %2558 = vmatpush3.bf16.msra.mxu0 %v2901_v9  ;;  %2561 = vmatprep.mubr.msk.bf16.mxu0 %vm2755_vm1, %v2754_v2 }
 0xe04   : > { %2559 = vmatprep.subr.bf16.mxu0 %v2754_v2 }
 0xe05   : > { %2568 = vmatpush3.bf16.msra.mxu1 %v2910_v10 }
 0xe06   : > { %2581 = vmatprep.subr.bf16.mxu1 %v2754_v2 }
 0xe07   : > { %2560 = vmatpush3.bf16.msra.mxu0 %v2925_v13 }
 0xe08   : > { %2573 = vmatprep.subr.bf16.mxu0 %v2754_v2 }
 0xed3   : > { %v1693_v8 = vpop.f32.mrb[24].mxu1 }
 0xed4   : > { %v1700_v38 = vrot.slane %v1693_v8, 4  ;;  %v2555_v39 = vpop.f32.mrb[25].mxu1 }
 0xed5   : > { %v1696_v40 = vpop.f32.mrb[26].mxu1  ;;  %v1641_v9 = vpop.f32.mrb[24].mxu0  ;;  %v2741_v39 = vld [vmem:[%s3574_s5] sm:$0xff]  }
 0xed6   : > { %v1702_v41 = vadd.f32 %v1700_v38, %v2967_v21  ;;  %v2556_v42 = vpop.f32.mrb[27].mxu1  ;;  %v1648_v43 = vrot.slane %v1641_v9, 6  ;;  %v2547_v44 = vpop.f32.mrb[25].mxu0  ;;  %v2743_v9 = vld [vmem:[%s3574_s5 + $0x8] sm:$0xff]  }
 0xed7   : > { %v1644_v10 = vpop.f32.mrb[26].mxu0  ;;  %v2744_v42 = vld [vmem:[%s3573_s4 + $0x8] sm:$0xff]  }
 0xed8   : > { %2693 = vtanh.f32 %v1702_v41  ;;  %v1650_v45 = vadd.f32 %v1648_v43, %v2972_v29  ;;  %v2548_v46 = vpop.f32.mrb[27].mxu0  ;;  %v2372_v32 = vmul.f32 -1.442695, %v1702_v41  ;;  %v2742_v41 = vld [vmem:[%s3573_s4] sm:$0xff]  }
 0xeda   : > { %2695 = vtanh.f32 %v1650_v45  ;;  %v2371_v48 = vmul.f32 -1.442695, %v1650_v45 }
 0xedb   : > { %2697 = vpow2.f32 %v2372_v32 }
 0xedc   : > { %2699 = vpow2.f32 %v2371_v48 }
 0xee2   : > { %v2694_v47 = vpop.eup %2693 }
 0xee3   : > { %1742 = vrot.lane.b32.xlu1 %v2694_v47, %s2756_s30 }
 0xee4   : > { %v2696_v13 = vpop.eup %2695 }
 0xee5   : > { %1715 = vrot.lane.b32.xlu0 %v2696_v13, %s2756_s30  ;;  %v2698_v49 = vpop.eup %2697 }
 0xee6   : > { %v2700_v50 = vpop.eup %2699  ;;  %v1733_v51 = vadd.f32 1.0, %v2698_v49 }
 0xee7   : > { %v1706_v52 = vadd.f32 1.0, %v2700_v50 }
 0xee8   : > { %2701 = vrcp.f32 %v1733_v51 }
 0xee9   : > { %2703 = vrcp.f32 %v1706_v52 }
 0xef2   : > { %v2702_v33 = vpop.eup %2701 }
 0xef3   : > { %v2704_v55 = vpop.eup %2703  ;;  %v1740_v1 = vmul.f32 %v2702_v33, %v1738_v62 }
 0xef4   : > { %v1713_v60 = vmul.f32 %v2704_v55, %v1711_v3 }
 0xf55   : > { %v1743_v53 = vpop.permute.xlu1 %1742 }
 0xf56   : > { %v1745_v54 = vmul.f32 %v2702_v33, %v1743_v53 }
 0xf57   : > { %v1716_v59 = vpop.permute.xlu0 %1715 }
 0xf58   : > { %1747 = vrot.lane.b32.xlu1 %v1745_v54, %s2756_s30  ;;  %v1718_v57 = vmul.f32 %v2704_v55, %v1716_v59 }
 0xf5a   : > { %1720 = vrot.lane.b32.xlu0 %v1718_v57, %s2756_s30 }
 0xfca   : > { %v1748_v61 = vpop.permute.xlu1 %1747 }
 0xfcb   : > { %v3353_v63 = vadd.f32 %v1748_v61, %v1740_v1 }
 0xfcc   : > { %v1721_v58 = vpop.permute.xlu0 %1720 }
 0xfcd   : > { %2705 = vtanh.f32 %v3353_v63  ;;  %v3358_v56 = vadd.f32 %v1721_v58, %v1713_v60 }
 0xfcf   : > { %2707 = vtanh.f32 %v3358_v56 }
 0xfd7   : > { %v2706_v5 = vpop.eup %2705 }
 0xfd8   : > { %1753 = vrot.lane.b32.xlu1 %v2706_v5, %s2756_s30 }
 0xfd9   : > { %v2708_v7 = vpop.eup %2707 }
 0xfda   : > { %1726 = vrot.lane.b32.xlu0 %v2708_v7, %s2756_s30 }
0x104a   : > { %v1754_v11 = vpop.permute.xlu1 %1753 }
0x104b   : > { %v1756_v18 = vmul.f32 %v2702_v33, %v1754_v11  ;;  %v3418_v11 = vsel %vm1770_vm13, %v3353_v63, %v1738_v62 }
0x104c   : > { %v1727_v26 = vpop.permute.xlu0 %1726 }
0x104d   : > { %v3373_v24 = vsel %vm1770_vm13, %v1756_v18, %v1771_v12  ;;  %v1729_v30 = vmul.f32 %v2704_v55, %v1727_v26  ;;  %v1924_v12 = vrot.slane %v3418_v11, 2  ;;  %v3426_v18 = vsel %vm1763_vm14, %v3358_v56, %v1711_v3 }
0x104e   : > { %v1837_v31 = vpack.c.bf16 %v3373_v24, %v3373_v24 }
0x104f   : > { %v3381_v35 = vsel %vm1763_vm14, %v1729_v30, %v1764_v28  ;;  %v1897_v28 = vrot.slane %v3426_v18, 6 }
0x1050   : > { %v1839_v36 = vrot.slane %v1837_v31, 2  ;;  %v1785_v37 = vpack.c.bf16 %v3381_v35, %v3381_v35  ;;  %v1957_v31 = vrot.slane %v3373_v24, 2 }
0x1052   : > { %1840 = vrot.lane.b32.xlu1 %v1839_v36, %s2757_s21  ;;  %v1787_v8 = vrot.slane %v1785_v37, 1  ;;  %v1948_v37 = vstv %s1947_s14 }
0x1053   : > { %vm1949_vm0 = vcmp.eq.s32.totalorder %v1948_v37, 1 }
0x1054   : > { %1788 = vrot.lane.b32.xlu0 %v1787_v8, %s2757_s21 }
0x10c4   : > { %v1841_v38 = vpop.permute.xlu1 %1840 }
0x10c5   : > { %2570 = vmatmul.mubr.msk.bf16.vlgmr.msra.gmra.mrb[28].mxu1 %vm520_vm2, %v1841_v38 }
0x10c6   : > { %2582 = vmatpush3.bf16.msra.mxu1 %v2741_v39  ;;  %2585 = vmatprep.mubr.msk.bf16.mxu1 %vm2755_vm1, %v2754_v2  ;;  %v1789_v40 = vpop.permute.xlu0 %1788  ;;  %v1950_v39 = vrot.slane %v3381_v35, 6 }
0x10c7   : > { %2583 = vmatprep.subr.bf16.mxu1 %v2754_v2  ;;  %2562 = vmatmul.mubr.msk.bf16.vlgmr.msra.gmra.mrb[28].mxu0 %vm520_vm2, %v1789_v40 }
0x10c8   : > { %2574 = vmatpush3.bf16.msra.mxu0 %v2742_v41  ;;  %2577 = vmatprep.mubr.msk.bf16.mxu0 %vm2755_vm1, %v2754_v2 }
0x10c9   : > { %2575 = vmatprep.subr.bf16.mxu0 %v2754_v2 }
0x10ca   : > { %2584 = vmatpush3.bf16.msra.mxu1 %v2743_v9 }
0x10cc   : > { %2576 = vmatpush3.bf16.msra.mxu0 %v2744_v42 }
0x1198   : > { %v1879_v43 = vpop.f32.mrb[28].mxu1 }
0x1199   : > { %v1886_v44 = vrot.slane %v1879_v43, 6  ;;  %v2571_v10 = vpop.f32.mrb[29].mxu1 }
0x119a   : > { %v1882_v45 = vpop.f32.mrb[30].mxu1  ;;  %v1827_v47 = vpop.f32.mrb[28].mxu0 }
0x119b   : > { %v1888_v46 = vadd.f32 %v1886_v44, %v2967_v21  ;;  %v2572_v13 = vpop.f32.mrb[31].mxu1  ;;  %v1834_v32 = vrot.slane %v1827_v47, 4  ;;  %v2563_v48 = vpop.f32.mrb[29].mxu0 }
0x119c   : > { %v1830_v49 = vpop.f32.mrb[30].mxu0 }
0x119d   : > { %2709 = vtanh.f32 %v1888_v46  ;;  %v1836_v50 = vadd.f32 %v1834_v32, %v2972_v29  ;;  %v2564_v2 = vpop.f32.mrb[31].mxu0  ;;  %v2376_v33 = vmul.f32 -1.442695, %v1888_v46 }
0x119f   : > { %2711 = vtanh.f32 %v1836_v50  ;;  %v2375_v53 = vmul.f32 -1.442695, %v1836_v50 }
0x11a0   : > { %2713 = vpow2.f32 %v2376_v33 }
0x11a1   : > { %2715 = vpow2.f32 %v2375_v53 }
0x11a7   : > { %v2710_v51 = vpop.eup %2709 }
0x11a8   : > { %1928 = vrot.lane.b32.xlu1 %v2710_v51, %s2756_s30 }
0x11a9   : > { %v2712_v52 = vpop.eup %2711 }
0x11aa   : > { %1901 = vrot.lane.b32.xlu0 %v2712_v52, %s2756_s30  ;;  %v2714_v54 = vpop.eup %2713 }
0x11ab   : > { %v2716_v55 = vpop.eup %2715  ;;  %v1919_v59 = vadd.f32 1.0, %v2714_v54 }
0x11ac   : > { %v1892_v57 = vadd.f32 1.0, %v2716_v55 }
0x11ad   : > { %2717 = vrcp.f32 %v1919_v59 }
0x11ae   : > { %2719 = vrcp.f32 %v1892_v57 }
0x11b7   : > { %v2718_v1 = vpop.eup %2717 }
0x11b8   : > { %v2720_v58 = vpop.eup %2719  ;;  %v1926_v26 = vmul.f32 %v2718_v1, %v1924_v12 }
0x11b9   : > { %v1899_v62 = vmul.f32 %v2720_v58, %v1897_v28 }
0x121a   : > { %v1929_v61 = vpop.permute.xlu1 %1928 }
0x121b   : > { %v1931_v60 = vmul.f32 %v2718_v1, %v1929_v61 }
0x121c   : > { %v1902_v5 = vpop.permute.xlu0 %1901 }
0x121d   : > { %1933 = vrot.lane.b32.xlu1 %v1931_v60, %s2756_s30  ;;  %v1904_v7 = vmul.f32 %v2720_v58, %v1902_v5 }
0x121f   : > { %1906 = vrot.lane.b32.xlu0 %v1904_v7, %s2756_s30 }
0x128f   : > { %v1934_v4 = vpop.permute.xlu1 %1933 }
0x1290   : > { %v3431_v6 = vadd.f32 %v1934_v4, %v1926_v26 }
0x1291   : > { %v1907_v0 = vpop.permute.xlu0 %1906 }
0x1292   : > { %2721 = vtanh.f32 %v3431_v6  ;;  %v3436_v63 = vadd.f32 %v1907_v0, %v1899_v62  ;;  %v3469_v4 = vsel %vm1956_vm15, %v3431_v6, %v1924_v12 }
0x1293   : > { %v2107_v62 = vrot.slane %v3469_v4, 2 }
0x1294   : > { %2723 = vtanh.f32 %v3436_v63 }
0x129c   : > { %v2722_v3 = vpop.eup %2721 }
0x129d   : > { %1939 = vrot.lane.b32.xlu1 %v2722_v3, %s2756_s30  ;;  %v1953_v3 = vsel %vm1949_vm0, %v3436_v63, %v1897_v28 }
0x129e   : > { %v2724_v56 = vpop.eup %2723 }
0x129f   : > { %1912 = vrot.lane.b32.xlu0 %v2724_v56, %s2756_s30 }
0x130f   : > { %v1940_v30 = vpop.permute.xlu1 %1939 }
0x1310   : > { %v1942_v36 = vmul.f32 %v2718_v1, %v1940_v30 }
0x1311   : > { %v1913_v38 = vpop.permute.xlu0 %1912 }
0x1312   : > { %v3445_v8 = vsel %vm1956_vm15, %v1942_v36, %v1957_v31  ;;  %v1915_v40 = vmul.f32 %v2720_v58, %v1913_v38  ;;  %v2080_v31 = vrot.slane %v1953_v3, 6 }
0x1313   : > { %v2023_v41 = vpack.c.bf16 %v3445_v8, %v3445_v8 }
0x1314   : > { %v3451_v9 = vsel %vm1949_vm0, %v1915_v40, %v1950_v39 }
0x1315   : > { %v2025_v42 = vrot.slane %v2023_v41, 1  ;;  %v1971_v43 = vpack.c.bf16 %v3451_v9, %v3451_v9 }
0x1317   : > { %2026 = vrot.lane.b32.xlu1 %v2025_v42, %s2757_s21  ;;  %v1973_v44 = vrot.slane %v1971_v43, 2 }
0x1319   : > { %1974 = vrot.lane.b32.xlu0 %v1973_v44, %s2757_s21 }
0x1389   : > { %v2027_v10 = vpop.permute.xlu1 %2026 }
0x138a   : > { %2586 = vmatmul.mubr.msk.bf16.vlgmr.msra.gmra.mrb[32].mxu1 %vm520_vm2, %v2027_v10 }
0x138b   : > { %v1975_v45 = vpop.permute.xlu0 %1974 }
0x138c   : > { %2578 = vmatmul.mubr.msk.bf16.vlgmr.msra.gmra.mrb[32].mxu0 %vm520_vm2, %v1975_v45  ;;  %vm854_vm2 = vcmask 254976  }
0x145d   : > { %v2065_v46 = vpop.f32.mrb[32].mxu1 }
0x145e   : > { %v2071_v47 = vadd.f32 %v2065_v46, %v2967_v21  ;;  %v2587_v13 = vpop.f32.mrb[33].mxu1 }
0x145f   : > { %v2068_v32 = vpop.f32.mrb[34].mxu1  ;;  %v2013_v48 = vpop.f32.mrb[32].mxu0 }
0x1460   : > { %2725 = vtanh.f32 %v2071_v47  ;;  %v2588_v49 = vpop.f32.mrb[35].mxu1  ;;  %v2020_v50 = vrot.slane %v2013_v48, 2  ;;  %v2579_v2 = vpop.f32.mrb[33].mxu0  ;;  %v2380_v55 = vmul.f32 -1.442695, %v2071_v47 }
0x1461   : > { %v2016_v51 = vpop.f32.mrb[34].mxu0 }
0x1462   : > { %v2022_v52 = vadd.f32 %v2020_v50, %v2972_v29  ;;  %v2580_v33 = vpop.f32.mrb[35].mxu0 }
0x1464   : > { %2727 = vtanh.f32 %v2022_v52  ;;  %v2379_v21 = vmul.f32 -1.442695, %v2022_v52 }
0x1465   : > { %2729 = vpow2.f32 %v2380_v55 }
0x1466   : > { %2731 = vpow2.f32 %v2379_v21 }
0x146a   : > { %v2726_v53 = vpop.eup %2725 }
0x146b   : > { %2111 = vrot.lane.b32.xlu0 %v2726_v53, %s2756_s30 }
0x146e   : > { %v2728_v54 = vpop.eup %2727 }
0x146f   : > { %2084 = vrot.lane.b32.xlu1 %v2728_v54, %s2756_s30  ;;  %v2730_v59 = vpop.eup %2729 }
0x1470   : > { %v2102_v57 = vadd.f32 1.0, %v2730_v59  ;;  %v2732_v1 = vpop.eup %2731 }
0x1471   : > { %v2075_v61 = vadd.f32 1.0, %v2732_v1 }
0x1472   : > { %2733 = vrcp.f32 %v2102_v57 }
0x1473   : > { %2735 = vrcp.f32 %v2075_v61 }
0x147c   : > { %v2734_v60 = vpop.eup %2733 }
0x147d   : > { %v2736_v5 = vpop.eup %2735  ;;  %v2109_v0 = vmul.f32 %v2734_v60, %v2107_v62 }
0x147e   : > { %v2082_v11 = vmul.f32 %v2736_v5, %v2080_v31 }
0x14dd   : > { %v2112_v29 = vpop.permute.xlu0 %2111 }
0x14de   : > { %v2114_v58 = vmul.f32 %v2734_v60, %v2112_v29 }
0x14e0   : > { %2116 = vrot.lane.b32.xlu0 %v2114_v58, %s2756_s30 }
0x14e1   : > { %v2085_v7 = vpop.permute.xlu1 %2084 }
0x14e2   : > { %v2087_v26 = vmul.f32 %v2736_v5, %v2085_v7 }
0x14e4   : > { %2089 = vrot.lane.b32.xlu1 %v2087_v26, %s2756_s30 }
0x1552   : > { %v2117_v56 = vpop.permute.xlu0 %2116 }
0x1553   : > { %v2119_v30 = vadd.f32 %v2117_v56, %v2109_v0 }
0x1555   : > { %2737 = vtanh.f32 %v2119_v30 }
0x1556   : > { %v2090_v36 = vpop.permute.xlu1 %2089 }
0x1557   : > { %v2092_v22 = vadd.f32 %v2090_v36, %v2082_v11 }
0x1559   : > { %2739 = vtanh.f32 %v2092_v22 }
0x155f   : > { %v2738_v12 = vpop.eup %2737 }
0x1560   : > { %2122 = vrot.lane.b32.xlu0 %v2738_v12, %s2756_s30 }
0x1563   : > { %v2740_v6 = vpop.eup %2739 }
0x1564   : > { %851 = vrot.lane.b32.xlu0 %v3026_v23, %s2757_s21  ;;  %2095 = vrot.lane.b32.xlu1 %v2740_v6, %s2756_s30  ;;  %s2126_s30 = sadd.s32 7, %s3008_s29  ;;  %s2758_s29 = smov 96  }
0x1565   : > { %p2127_p6 = scmp.lt.s32.totalorder %s2126_s30, 20 }
0x1567   : > { %s2129_s15 = scalar_select %p2127_p6, 1, 0 }
0x1568   : > { %1226 = vrot.lane.b32.xlu0 %v3165_v25, %s2757_s21  ;;  %1038 = vrot.lane.b32.xlu1 %v3094_v20, %s2757_s21  ;;  %v2139_v25 = vrot.slane %v3445_v8, 2 }
0x1569   : > { %v2130_v23 = vstv %s2129_s15 }
0x156a   : > { %vm2131_vm1 = vcmp.eq.s32.totalorder %v2130_v23, 1 }
0x156c   : > { %1596 = vrot.lane.b32.xlu0 %v3299_v19, %s2757_s21  ;;  %1409 = vrot.lane.b32.xlu1 %v3238_v27, %s2757_s21 }
0x1570   : > { %1967 = vrot.lane.b32.xlu0 %v3445_v8, %s2757_s21  ;;  %1781 = vrot.lane.b32.xlu1 %v3373_v24, %s2757_s21 }
0x1574   : > { %857 = vrot.lane.b32.xlu0 %v3016_v15, %s2757_s21  ;;  %1044 = vrot.lane.b32.xlu1 %v3086_v14, %s2757_s21  ;;  %v2135_v15 = vsel %vm2131_vm1, %v2092_v22, %v2080_v31  ;;  %v2137_v14 = vstv %s2136_s26 }
0x1575   : > { %vm3512_vm3 = vcmp.eq.s32.totalorder %v2137_v14, 1 }
0x1576   : > { %v2142_v8 = vsel %vm3512_vm3, %v2119_v30, %v2107_v62 }
0x1578   : > { %1231 = vrot.lane.b32.xlu0 %v3157_v17, %s2757_s21  ;;  %1414 = vrot.lane.b32.xlu1 %v3227_v16, %s2757_s21 }
0x157c   : > { %1591 = vrot.lane.b32.xlu0 %v3309_v34, %s2757_s21  ;;  %1776 = vrot.lane.b32.xlu1 %v3381_v35, %s2757_s21  ;;  %v2132_v35 = vrot.slane %v3451_v9, 6 }
0x1580   : > { %1962 = vrot.lane.b32.xlu0 %v3451_v9, %s2757_s21 }
0x1584   : > { %2155 = vrot.lane.b32.xlu0 %v2135_v15, %s2758_s29 }
0x15d2   : > { %v2123_v20 = vpop.permute.xlu0 %2122 }
0x15d3   : > { %v2125_v17 = vmul.f32 %v2734_v60, %v2123_v20 }
0x15d5   : > { %v2141_v27 = vsel %vm3512_vm3, %v2125_v17, %v2139_v25 }
0x15d6   : > { %v852_v19 = vpop.permute.xlu0 %851  ;;  %2149 = vrot.lane.b32.xlu1 %v2141_v27, %s2757_s21  ;;  %v2096_v34 = vpop.permute.xlu1 %2095 }
0x15d7   : > { %855 = vst.msk [vmem:[#allocation2] sm:$0x3] %vm854_vm2, %v852_v19  ;;  %v2098_v24 = vmul.f32 %v2736_v5, %v2096_v34 }
0x15d9   : > { %v2134_v28 = vsel %vm2131_vm1, %v2098_v24, %v2132_v35 }
0x15da   : > { %v1227_v18 = vpop.permute.xlu0 %1226  ;;  %2144 = vrot.lane.b32.xlu1 %v2134_v28, %s2757_s21  ;;  %v1039_v63 = vpop.permute.xlu1 %1038 }
0x15db   : > { %1229 = vst.msk [vmem:[#allocation2] sm:$0x30] %vm1047_vm4, %v1227_v18 }
0x15dc   : > { %1042 = vst.msk [vmem:[#allocation2] sm:$0xc] %vm1041_vm5, %v1039_v63 }
0x15de   : > { %v1597_v37 = vpop.permute.xlu0 %1596  ;;  %2161 = vrot.lane.b32.xlu1 %v2142_v8, %s2758_s29  ;;  %v1410_v38 = vpop.permute.xlu1 %1409 }
0x15df   : > { %1599 = vst.msk [vmem:[#allocation3] sm:$0xc0] %vm860_vm6, %v1597_v37  ;;  %1412 = vst.msk [vmem:[#allocation2] sm:$0xc0] %vm860_vm6, %v1410_v38 }
0x15e2   : > { %v1968_v39 = vpop.permute.xlu0 %1967  ;;  %v1782_v40 = vpop.permute.xlu1 %1781 }
0x15e3   : > { %1970 = vst.msk [vmem:[#allocation3] sm:$0xc] %vm1041_vm5, %v1968_v39 }
0x15e4   : > { %1784 = vst.msk [vmem:[#allocation3] sm:$0x30] %vm1047_vm4, %v1782_v40 }
0x15e6   : > { %v858_v41 = vpop.permute.xlu0 %857  ;;  %v2165_v9 = vld [vmem:[#allocation2] sm:$0xff]  ;;  %v1045_v42 = vpop.permute.xlu1 %1044 }
0x15e7   : > { %861 = vst.msk [vmem:[#allocation3 + $0x8] sm:$0xc0] %vm860_vm6, %v858_v41  ;;  %v2387_v43 = vpack.c.bf16 %v2165_v9, %v2165_v9 }
0x15e8   : > { %1048 = vst.msk [vmem:[#allocation3 + $0x8] sm:$0x30] %vm1047_vm4, %v1045_v42 }
0x15e9   : > { %2176 = vst.msk [vmem:[%s2852_s23] sm:$0xf] %vm2175_vm7, %v2387_v43 }
0x15ea   : > { %v1232_v44 = vpop.permute.xlu0 %1231  ;;  %v1415_v10 = vpop.permute.xlu1 %1414 }
0x15eb   : > { %1234 = vst.msk [vmem:[#allocation3 + $0x8] sm:$0xc] %vm1041_vm5, %v1232_v44 }
0x15ec   : > { %1417 = vst.msk [vmem:[#allocation3 + $0x8] sm:$0x3] %vm854_vm2, %v1415_v10 }
0x15ee   : > { %v1592_v45 = vpop.permute.xlu0 %1591  ;;  %v1777_v46 = vpop.permute.xlu1 %1776 }
0x15ef   : > { %1594 = vst.msk [vmem:[#allocation2 + $0x8] sm:$0x3] %vm854_vm2, %v1592_v45 }
0x15f0   : > { %1779 = vst.msk [vmem:[#allocation2 + $0x8] sm:$0xc] %vm1041_vm5, %v1777_v46 }
0x15f2   : > { %v1963_v47 = vpop.permute.xlu0 %1962 }
0x15f3   : > { %1965 = vst.msk [vmem:[#allocation2 + $0x8] sm:$0x30] %vm1047_vm4, %v1963_v47  ;;  %v2179_v49 = vld [vmem:[#allocation3 + $0x8] sm:$0xff] }
0x15f4   : > { %v2390_v52 = vpack.c.bf16 %v2179_v49, %v2179_v49 }
0x15f6   : > { %v2156_v13 = vpop.permute.xlu0 %2155  ;;  %2189 = vst.msk [vmem:[%s2857_s25 + $0x4] sm:$0xf] %vm2175_vm7, %v2390_v52 }
0x15f7   : > { %2158 = vst.msk [vmem:[%s3580_s11 - $0x6] sm:$0xc0] %vm860_vm6, %v2156_v13 }
0x1648   : > { %v2150_v32 = vpop.permute.xlu1 %2149 }
0x1649   : > { %2152 = vst.msk [vmem:[#allocation3] sm:$0x3] %vm854_vm2, %v2150_v32  ;;  %2159 = vst.msk [vmem:[%s3581_s12] sm:$0x3] %vm854_vm2, %v2150_v32 }
0x164c   : > { %v2145_v48 = vpop.permute.xlu1 %2144 }
0x164d   : > { %2147 = vst.msk [vmem:[#allocation2 + $0x8] sm:$0xc0] %vm860_vm6, %v2145_v48  ;;  %2153 = vst.msk [vmem:[%s3579_s10 - $0x6] sm:$0xc0] %vm860_vm6, %v2145_v48 }
0x1650   : > { %v2178_v50 = vld [vmem:[#allocation3] sm:$0xff]  ;;  %v2162_v51 = vpop.permute.xlu1 %2161 }
0x1651   : > { %v2389_v2 = vpack.c.bf16 %v2178_v50, %v2178_v50  ;;  %2164 = vst.msk [vmem:[%s3582_s13] sm:$0x3] %vm854_vm2, %v2162_v51 }
0x1653   : > { %2188 = vst.msk [vmem:[%s2857_s25] sm:$0xf] %vm2175_vm7, %v2389_v2 }
0x1654   : > { %v2166_v33 = vld [vmem:[#allocation2 + $0x8] sm:$0xff] }
0x1655   : > { %v2388_v53 = vpack.c.bf16 %v2166_v33, %v2166_v33 }
0x1657   : > { %2177 = vst.msk [vmem:[%s2852_s23 + $0x4] sm:$0xf] %vm2175_vm7, %v2388_v53 }
0x1658 PF: > { %s3591_s22 = sld [smem:[#allocation4_spill]] }
0x165e   : > { %s24_s25 = sadd.s32 1, %s3591_s22  }
0x165f   : > { %p21_p8 = scmp.ge.s32.totalorder %s24_s25, 5  }
0x1661   :  { %23 = sbr.rel (!%p21_p8) target bundleno = 1 (0x1), region = 133 }

</bundles_post_ra>
